<compile_context>
chip_gen: v7x
topology: tpu7x:2x2x1
jax: 0.10.0
libtpu: 0.0.40
codegen_flags: <defaults>
</compile_context>

<pallas_src>
import jax
import jax.numpy as jnp
from jax.experimental import pallas as pl
from jax.experimental.pallas import tpu as pltpu


# ---------------------------------------------------------------------------
# Kernel factory
# ---------------------------------------------------------------------------
def _make_decoder_kernel(n_layers, hidden_dim, chunk_steps):
    H = hidden_dim
    L = n_layers
    # inputs: x_gates, enc, h0, c0, (w0_c, w0_h), (w_in, w_h, b)*(L-1), w_out, b_out
    n_in = 4 + 2 + 3 * (L - 1) + 2

    def kernel(*refs):
        in_refs = refs[:n_in]
        pred_ref, h_out_ref, c_out_ref = refs[n_in:n_in + 3]
        h_st, c_st = refs[n_in + 3:]            # VMEM scratch, persists across chunks

        it = iter(in_refs)
        xg_ref = next(it)        # (TT, B, 4H) precomputed x @ W0_x + b0 (streamed)
        enc_ref = next(it)       # (B, S, H)   resident
        h0_ref = next(it)        # (L, B, H)   initial hidden state
        c0_ref = next(it)        # (L, B, H)   initial cell state
        w0_c = next(it)[...]     # (H, 4H)     layer-0 ctx rows
        w0_h = next(it)[...]     # (H, 4H)     layer-0 recurrent rows
        w_in, w_h, b_l = [], [], []
        for _ in range(L - 1):
            w_in.append(next(it)[...])   # (H, 4H)
            w_h.append(next(it)[...])    # (H, 4H)
            b_l.append(next(it)[...])    # (1, 4H)
        w_out = next(it)[...]    # (H, O_pad)
        b_out = next(it)[...]    # (1, O_pad)

        chunk = pl.program_id(0)

        # Load the initial recurrent state into VMEM scratch once.
        @pl.when(chunk == 0)
        def _():
            h_st[...] = h0_ref[...]
            c_st[...] = c0_ref[...]

        enc = enc_ref[...]       # (B, S, H) stays resident for every step

        def apply_gates(gates, c_prev):
            # Gate columns were reordered to [i, f, o, g] and the sigmoid
            # columns pre-scaled by 0.5 at prep time, so a SINGLE tanh pass
            # evaluates all four gates: sigmoid(x) = 0.5*tanh(0.5*x) + 0.5.
            t_all = jnp.tanh(gates)                      # one EUP pass over 4H
            sig = 0.5 * t_all[:, :3 * H] + 0.5
            i_g = sig[:, 0:H]
            f_g = sig[:, H:2 * H]
            o_g = sig[:, 2 * H:3 * H]
            g_g = t_all[:, 3 * H:4 * H]
            c_new = f_g * c_prev + i_g * g_g
            h_new = o_g * jnp.tanh(c_new)
            return h_new, c_new

        def step(t, carry):
            h, c = carry                                 # tuples of (B, H)

            # ---- Attention over encoder outputs (softmax over S) ----
            # TODO(synk): for production S*H, batched dot_general + S-tiled
            # online-softmax; at S=8/H=32 the VPU reduce is noise.
            h_top = h[L - 1]
            scores = jnp.sum(enc * h_top[:, None, :], axis=-1)      # (B, S)
            m = jnp.max(scores, axis=1, keepdims=True)
            p = jnp.exp(scores - m)
            attn = p / jnp.sum(p, axis=1, keepdims=True)             # exact
            ctx = jnp.sum(attn[:, :, None] * enc, axis=1)            # (B, H)

            new_h, new_c = [], []

            # Layer 0: x-contribution (incl. bias) precomputed outside the
            # recurrence; only the ctx- and h-dependent dots stay serial.
            gates0 = (xg_ref[t]
                      + jnp.dot(ctx, w0_c, preferred_element_type=jnp.float32)
                      + jnp.dot(h[0], w0_h, preferred_element_type=jnp.float32))
            h_new, c_new = apply_gates(gates0, c[0])
            new_h.append(h_new)
            new_c.append(c_new)
            layer_in = h_new

            for l in range(1, L):
                gates = (b_l[l - 1]
                         + jnp.dot(layer_in, w_in[l - 1],
                                   preferred_element_type=jnp.float32)
                         + jnp.dot(h[l], w_h[l - 1],
                                   preferred_element_type=jnp.float32))
                h_new, c_new = apply_gates(gates, c[l])
                new_h.append(h_new)
                new_c.append(c_new)
                layer_in = h_new

            # Lane-dense (B, O_pad=128) store into the per-chunk pred slab.
            pred_ref[t] = (jnp.dot(layer_in, w_out,
                                   preferred_element_type=jnp.float32)
                           + b_out)
            return tuple(new_h), tuple(new_c)

        h_init = tuple(h_st[l] for l in range(L))
        c_init = tuple(c_st[l] for l in range(L))
        h_fin, c_fin = jax.lax.fori_loop(0, chunk_steps, step,
                                         (h_init, c_init), unroll=True)
        for l in range(L):
            h_st[l] = h_fin[l]
            c_st[l] = c_fin[l]

        # Final recurrent state written once, on the last chunk.
        @pl.when(chunk == pl.num_programs(0) - 1)
        def _():
            h_out_ref[...] = h_st[...]
            c_out_ref[...] = c_st[...]

    return kernel


# ---------------------------------------------------------------------------
# One-time weight preparation (hoisted out of the decode hot path)
# ---------------------------------------------------------------------------
def prepare_decoder_params(lstm_params, out_params, lane_pad=128):
    """Re-lay-out PyTorch-style weights once at init.

    lstm_params[l] = (w_ih (4H, in_l), w_hh (4H, H), b_ih (4H,), b_hh (4H,)),
        layer 0: in_0 = E + H (input = concat([x, ctx])), layers l>0: in_l = H.
    out_params = (w_out (O, H), b_out (O,))

    Performed once: transpose to right-multiplied (in, 4H) layout, reorder gate
    columns [i,f,g,o] -> [i,f,o,g], pre-scale the sigmoid columns/biases by 0.5
    (single-tanh gate evaluation), split layer-0 rows into x / ctx / h blocks,
    and zero-pad the output head to a 128-lane-dense store.
    # TODO(synk): cast resident weights/enc to bf16 on v6e/v7x (keep gate math
    # and preferred_element_type in f32); keep f32 vector math on v5e.
    """
    H = lstm_params[0][1].shape[1]

    def reorder_scale(m):
        # (..., 4H), torch order [i, f, g, o] -> [0.5*i, 0.5*f, 0.5*o, g]
        i = m[..., 0:H]
        f = m[..., H:2 * H]
        g = m[..., 2 * H:3 * H]
        o = m[..., 3 * H:4 * H]
        return jnp.concatenate([0.5 * i, 0.5 * f, 0.5 * o, g], axis=-1)

    w_ih0, w_hh0, b_ih0, b_hh0 = lstm_params[0]
    E = w_ih0.shape[1] - H
    w0 = reorder_scale(jnp.concatenate([w_ih0, w_hh0], axis=1).T
                       .astype(jnp.float32))                 # (E+2H, 4H)
    b0 = reorder_scale((b_ih0 + b_hh0).astype(jnp.float32))[None, :]
    params = {
        "w0_x": w0[:E],                # (E, 4H)  used in the T-step precompute
        "w0_c": w0[E:E + H],           # (H, 4H)
        "w0_h": w0[E + H:E + 2 * H],   # (H, 4H)
        "b0": b0,                      # (1, 4H)  folded into the precompute
        "layers": [],
    }
    for (w_ih, w_hh, b_ih, b_hh) in lstm_params[1:]:
        wi = reorder_scale(w_ih.T.astype(jnp.float32))       # (H, 4H)
        wh = reorder_scale(w_hh.T.astype(jnp.float32))       # (H, 4H)
        bl = reorder_scale((b_ih + b_hh).astype(jnp.float32))[None, :]
        params["layers"].append((wi, wh, bl))

    w_out, b_out = out_params
    O = w_out.shape[0]
    o_pad = ((O + lane_pad - 1) // lane_pad) * lane_pad
    params["w_out"] = jnp.zeros((H, o_pad), jnp.float32).at[:, :O].set(
        w_out.T.astype(jnp.float32))
    params["b_out"] = jnp.zeros((1, o_pad), jnp.float32).at[:, :O].set(
        b_out[None, :].astype(jnp.float32))
    return params


# ---------------------------------------------------------------------------
# Fused multi-step decode (one pallas_call; T-loop inside the kernel body)
# ---------------------------------------------------------------------------
def decoder_lstm_attention_decode(x_seq, enc, h0, c0, params, output_dim,
                                  chunk_steps=None, vmem_limit_bytes=None):
    T, B, E = x_seq.shape
    L, _, H = h0.shape
    o_pad = params["w_out"].shape[-1]
    f32 = jnp.float32
    B_pad = ((B + 7) // 8) * 8          # f32 sublane granularity

    # Steps per grid iteration: largest divisor of T that is <= 32 (per-step
    # work stays in-body; per-grid-step overhead amortized TT x).
    if chunk_steps is None:
        chunk_steps = 1
        for d in range(min(T, 32), 0, -1):
            if T % d == 0:
                chunk_steps = d
                break
    assert T % chunk_steps == 0
    n_chunks = T // chunk_steps

    def pad_b(a, axis):
        a = a.astype(f32)
        if B_pad == B:
            return a
        pads = [(0, 0)] * a.ndim
        pads[axis] = (0, B_pad - B)
        return jnp.pad(a, pads)

    x_p = pad_b(x_seq, 1)               # (T, B_pad, E)
    enc_p = pad_b(enc, 0)               # (B_pad, S, H)
    h0_p = pad_b(h0, 1)                 # (L, B_pad, H)
    c0_p = pad_b(c0, 1)

    # cuDNN-style restructuring: the x-contribution to the layer-0 gates for
    # all T steps is ONE well-shaped matmul outside the serial recurrence.
    xg = (jnp.einsum("tbe,ef->tbf", x_p, params["w0_x"],
                     precision=jax.lax.Precision.HIGHEST)
          + params["b0"])               # (T, B_pad, 4H), lane-dense (4H=128*k)

    flat_w = [params["w0_c"], params["w0_h"]]
    for (wi, wh, bl) in params["layers"]:
        flat_w += [wi, wh, bl]
    flat_w += [params["w_out"], params["b_out"]]

    def const_spec(arr):
        zeros = (0,) * arr.ndim
        # TODO(synk): pipeline_mode=pl.Buffered(1) for these resident blocks on
        # v7x (64 MiB physical VMEM) to avoid pointless double buffers.
        return pl.BlockSpec(arr.shape, lambda c: zeros)

    in_specs = [
        pl.BlockSpec((chunk_steps, B_pad, 4 * H), lambda c: (c, 0, 0)),  # xg
        const_spec(enc_p),
        const_spec(h0_p),
        const_spec(c0_p),
    ] + [const_spec(w) for w in flat_w]

    out_specs = (
        pl.BlockSpec((chunk_steps, B_pad, o_pad), lambda c: (c, 0, 0)),  # pred
        pl.BlockSpec((L, B_pad, H), lambda c: (0, 0, 0)),                # h
        pl.BlockSpec((L, B_pad, H), lambda c: (0, 0, 0)),                # c
    )
    out_shape = (
        jax.ShapeDtypeStruct((T, B_pad, o_pad), f32),
        jax.ShapeDtypeStruct((L, B_pad, H), f32),
        jax.ShapeDtypeStruct((L, B_pad, H), f32),
    )

    grid_spec = pltpu.PrefetchScalarGridSpec(
        num_scalar_prefetch=0,
        grid=(n_chunks,),
        in_specs=in_specs,
        out_specs=out_specs,
        scratch_shapes=[pltpu.VMEM((L, B_pad, H), f32),   # h state
                        pltpu.VMEM((L, B_pad, H), f32)],  # c state
    )

    compiler_kwargs = dict(dimension_semantics=("arbitrary",))
    if vmem_limit_bytes is not None:       # set explicitly for production S/H
        compiler_kwargs["vmem_limit_bytes"] = vmem_limit_bytes

    pred_pad, h_new, c_new = pl.pallas_call(
        _make_decoder_kernel(L, H, chunk_steps),
        out_shape=out_shape,
        grid_spec=grid_spec,
        compiler_params=pltpu.CompilerParams(**compiler_kwargs),
    )(xg, enc_p, h0_p, c0_p, *flat_w)

    return (pred_pad[:, :B, :output_dim],
            h_new[:, :B, :],
            c_new[:, :B, :])


def decoder_lstm_attention_forward(x, enc, h, c, params, output_dim):
    """Single decode step == original PyTorch module forward."""
    pred_seq, h_new, c_new = decoder_lstm_attention_decode(
        x[None], enc, h, c, params, output_dim)
    return pred_seq[0], h_new, c_new


# ---------------------------------------------------------------------------
# Pure-JAX reference mirroring the PyTorch module
# ---------------------------------------------------------------------------
def reference_forward(x, enc, h, c, lstm_params, out_params):
    hp = jax.lax.Precision.HIGHEST
    h_top = h[-1]
    scores = jnp.einsum("bsd,bd->bs", enc, h_top, precision=hp)
    attn = jax.nn.softmax(scores, axis=1)
    ctx = jnp.einsum("bs,bsd->bd", attn, enc, precision=hp)
    layer_in = jnp.concatenate([x, ctx], axis=-1)
    h_list, c_list = [], []
    for l, (w_ih, w_hh, b_ih, b_hh) in enumerate(lstm_params):
        gates = (jnp.dot(layer_in, w_ih.T, precision=hp) + b_ih
                 + jnp.dot(h[l], w_hh.T, precision=hp) + b_hh)
        i_g, f_g, g_g, o_g = jnp.split(gates, 4, axis=-1)
        i_g = jax.nn.sigmoid(i_g)
        f_g = jax.nn.sigmoid(f_g)
        g_g = jnp.tanh(g_g)
        o_g = jax.nn.sigmoid(o_g)
        c_new = f_g * c[l] + i_g * g_g
        h_new = o_g * jnp.tanh(c_new)
        h_list.append(h_new)
        c_list.append(c_new)
        layer_in = h_new
    w_out, b_out = out_params
    pred = jnp.dot(layer_in, w_out.T, precision=jax.lax.Precision.HIGHEST) + b_out
    return pred, jnp.stack(h_list), jnp.stack(c_list)


def reference_decode(x_seq, enc, h, c, lstm_params, out_params):
    preds = []
    for t in range(x_seq.shape[0]):
        p, h, c = reference_forward(x_seq[t], enc, h, c, lstm_params, out_params)
        preds.append(p)
    return jnp.stack(preds), h, c


# ---------------------------------------------------------------------------
if __name__ == "__main__":
    B, S = 2, 8           # batch, encoder sequence length
    E, H = 16, 32         # emb_dim, hidden_dim
    L, O = 2, 10          # n_layers, output_dim
    T = 4                 # fused (teacher-forced) decode steps

    key = jax.random.PRNGKey(0)
    keys = iter(jax.random.split(key, 32))
    k_init = 1.0 / jnp.sqrt(float(H))
    u = lambda shape, k: jax.random.uniform(k, shape, jnp.float32, -k_init, k_init)

    # PyTorch-style LSTM / Linear parameters.
    lstm_params = []
    for l in range(L):
        in_dim = (E + H) if l == 0 else H
        lstm_params.append((u((4 * H, in_dim), next(keys)),
                            u((4 * H, H), next(keys)),
                            u((4 * H,), next(keys)),
                            u((4 * H,), next(keys))))
    w_out = u((O, H), next(keys))
    b_out = u((O,), next(keys))
    out_params = (w_out, b_out)

    # One-time weight re-layout (hoisted out of the per-step path).
    params = prepare_decoder_params(lstm_params, out_params)

    # Example inputs.
    x_seq = jax.random.normal(next(keys), (T, B, E), jnp.float32)
    enc = jax.random.normal(next(keys), (B, S, H), jnp.float32)
    h0 = jax.random.normal(next(keys), (L, B, H), jnp.float32)
    c0 = jax.random.normal(next(keys), (L, B, H), jnp.float32)

    # Fused multi-step decode: one pallas_call, T-loop inside the body.
    pred_seq, h_new, c_new = decoder_lstm_attention_decode(
        x_seq, enc, h0, c0, params, O)
    jax.block_until_ready((pred_seq, h_new, c_new))

    # Single-step wrapper (== original module forward).
    pred1, h1, c1 = decoder_lstm_attention_forward(
        x_seq[0], enc, h0, c0, params, O)
    jax.block_until_ready((pred1, h1, c1))

    # Correctness vs the pure-JAX reference.  Transcendentals are exact now
    # (single-tanh gates, exact softmax divide), so the tolerance is tightened
    # 5x vs the previous approx-reciprocal version; remaining slack only covers
    # f32 matmul pass/accumulation-order differences between MXU and XLA.
    tol = dict(atol=2e-3, rtol=2e-3)
    pred_r, h_r, c_r = reference_decode(x_seq, enc, h0, c0, lstm_params, out_params)
    assert jnp.allclose(pred_seq, pred_r, **tol)
    assert jnp.allclose(h_new, h_r, **tol)
    assert jnp.allclose(c_new, c_r, **tol)

    pred1_r, h1_r, c1_r = reference_forward(
        x_seq[0], enc, h0, c0, lstm_params, out_params)
    assert jnp.allclose(pred1, pred1_r, **tol)
    assert jnp.allclose(h1, h1_r, **tol)
    assert jnp.allclose(c1, c1_r, **tol)

    print("KERNEL_OK")
</pallas_src>

<mosaic_0001>
module attributes {stable_mosaic.version = 11 : i64} {
  func.func @kernel(%arg0: i32, %arg1: memref<4x8x128xf32, #tpu.memory_space<vmem>>, %arg2: memref<8x8x32xf32, #tpu.memory_space<vmem>>, %arg3: memref<2x8x32xf32, #tpu.memory_space<vmem>>, %arg4: memref<2x8x32xf32, #tpu.memory_space<vmem>>, %arg5: memref<32x128xf32, #tpu.memory_space<vmem>>, %arg6: memref<32x128xf32, #tpu.memory_space<vmem>>, %arg7: memref<32x128xf32, #tpu.memory_space<vmem>>, %arg8: memref<32x128xf32, #tpu.memory_space<vmem>>, %arg9: memref<1x128xf32, #tpu.memory_space<vmem>>, %arg10: memref<32x128xf32, #tpu.memory_space<vmem>>, %arg11: memref<1x128xf32, #tpu.memory_space<vmem>>, %arg12: memref<4x8x128xf32, #tpu.memory_space<vmem>>, %arg13: memref<2x8x32xf32, #tpu.memory_space<vmem>>, %arg14: memref<2x8x32xf32, #tpu.memory_space<vmem>>, %arg15: memref<2x8x32xf32, #tpu.memory_space<vmem>>, %arg16: memref<2x8x32xf32, #tpu.memory_space<vmem>>) attributes {dimension_semantics = [#tpu.dimension_semantics<arbitrary>], iteration_bounds = array<i64: 1>, scalar_prefetch = 0 : i64, scratch_operands = 2 : i64, tpu.core_type = #tpu.core_type<tc>, window_params = [{transform_indices = @transform_0, window_bounds = array<i64: 4, 8, 128>}, {pipeline_mode = #tpu.pipeline_mode<synchronous>, transform_indices = @transform_1, window_bounds = array<i64: 8, 8, 32>}, {pipeline_mode = #tpu.pipeline_mode<synchronous>, transform_indices = @transform_2, window_bounds = array<i64: 2, 8, 32>}, {pipeline_mode = #tpu.pipeline_mode<synchronous>, transform_indices = @transform_3, window_bounds = array<i64: 2, 8, 32>}, {pipeline_mode = #tpu.pipeline_mode<synchronous>, transform_indices = @transform_4, window_bounds = array<i64: 32, 128>}, {pipeline_mode = #tpu.pipeline_mode<synchronous>, transform_indices = @transform_5, window_bounds = array<i64: 32, 128>}, {pipeline_mode = #tpu.pipeline_mode<synchronous>, transform_indices = @transform_6, window_bounds = array<i64: 32, 128>}, {pipeline_mode = #tpu.pipeline_mode<synchronous>, transform_indices = @transform_7, window_bounds = array<i64: 32, 128>}, {pipeline_mode = #tpu.pipeline_mode<synchronous>, transform_indices = @transform_8, window_bounds = array<i64: 1, 128>}, {pipeline_mode = #tpu.pipeline_mode<synchronous>, transform_indices = @transform_9, window_bounds = array<i64: 32, 128>}, {pipeline_mode = #tpu.pipeline_mode<synchronous>, transform_indices = @transform_10, window_bounds = array<i64: 1, 128>}, {transform_indices = @transform_11, window_bounds = array<i64: 4, 8, 128>}, {pipeline_mode = #tpu.pipeline_mode<synchronous>, transform_indices = @transform_12, window_bounds = array<i64: 2, 8, 32>}, {pipeline_mode = #tpu.pipeline_mode<synchronous>, transform_indices = @transform_13, window_bounds = array<i64: 2, 8, 32>}]} {
    %c0 = arith.constant 0 : index
    %c0_0 = arith.constant 0 : index
    %0 = vector.load %arg5[%c0, %c0_0] : memref<32x128xf32, #tpu.memory_space<vmem>>, vector<32x128xf32>
    %c0_1 = arith.constant 0 : index
    %c0_2 = arith.constant 0 : index
    %1 = vector.load %arg6[%c0_1, %c0_2] : memref<32x128xf32, #tpu.memory_space<vmem>>, vector<32x128xf32>
    %c0_3 = arith.constant 0 : index
    %c0_4 = arith.constant 0 : index
    %2 = vector.load %arg7[%c0_3, %c0_4] : memref<32x128xf32, #tpu.memory_space<vmem>>, vector<32x128xf32>
    %c0_5 = arith.constant 0 : index
    %c0_6 = arith.constant 0 : index
    %3 = vector.load %arg8[%c0_5, %c0_6] : memref<32x128xf32, #tpu.memory_space<vmem>>, vector<32x128xf32>
    %c0_7 = arith.constant 0 : index
    %c0_8 = arith.constant 0 : index
    %4 = vector.load %arg9[%c0_7, %c0_8] : memref<1x128xf32, #tpu.memory_space<vmem>>, vector<1x128xf32>
    %c0_9 = arith.constant 0 : index
    %c0_10 = arith.constant 0 : index
    %5 = vector.load %arg10[%c0_9, %c0_10] : memref<32x128xf32, #tpu.memory_space<vmem>>, vector<32x128xf32>
    %c0_11 = arith.constant 0 : index
    %c0_12 = arith.constant 0 : index
    %6 = vector.load %arg11[%c0_11, %c0_12] : memref<1x128xf32, #tpu.memory_space<vmem>>, vector<1x128xf32>
    %c0_i32 = arith.constant 0 : i32
    %7 = arith.cmpi eq, %arg0, %c0_i32 : i32
    %8 = arith.extui %7 : i1 to i32
    %c0_i32_13 = arith.constant 0 : i32
    %9 = arith.cmpi ne, %8, %c0_i32_13 : i32
    scf.if %9 {
      %c0_110 = arith.constant 0 : index
      %c0_111 = arith.constant 0 : index
      %c0_112 = arith.constant 0 : index
      %298 = vector.load %arg3[%c0_110, %c0_111, %c0_112] : memref<2x8x32xf32, #tpu.memory_space<vmem>>, vector<2x8x32xf32>
      %c0_113 = arith.constant 0 : index
      %c0_114 = arith.constant 0 : index
      %c0_115 = arith.constant 0 : index
      %299 = vector.load %arg15[%c0_113, %c0_114, %c0_115] : memref<2x8x32xf32, #tpu.memory_space<vmem>>, vector<2x8x32xf32>
      tpu.vector_store %arg15[%c0_113, %c0_114, %c0_115], %298 {strides = array<i32>} : memref<2x8x32xf32, #tpu.memory_space<vmem>>, vector<2x8x32xf32>,
      %c0_116 = arith.constant 0 : index
      %c0_117 = arith.constant 0 : index
      %c0_118 = arith.constant 0 : index
      %300 = vector.load %arg4[%c0_116, %c0_117, %c0_118] : memref<2x8x32xf32, #tpu.memory_space<vmem>>, vector<2x8x32xf32>
      %c0_119 = arith.constant 0 : index
      %c0_120 = arith.constant 0 : index
      %c0_121 = arith.constant 0 : index
      %301 = vector.load %arg16[%c0_119, %c0_120, %c0_121] : memref<2x8x32xf32, #tpu.memory_space<vmem>>, vector<2x8x32xf32>
      tpu.vector_store %arg16[%c0_119, %c0_120, %c0_121], %300 {strides = array<i32>} : memref<2x8x32xf32, #tpu.memory_space<vmem>>, vector<2x8x32xf32>,
    } else {
    }
    %c0_14 = arith.constant 0 : index
    %c0_15 = arith.constant 0 : index
    %c0_16 = arith.constant 0 : index
    %10 = vector.load %arg2[%c0_14, %c0_15, %c0_16] : memref<8x8x32xf32, #tpu.memory_space<vmem>>, vector<8x8x32xf32>
    %c0_17 = arith.constant 0 : index
    %c0_18 = arith.constant 0 : index
    %c0_19 = arith.constant 0 : index
    %11 = vector.load %arg15[%c0_17, %c0_18, %c0_19] : memref<2x8x32xf32, #tpu.memory_space<vmem>>, vector<1x8x32xf32>
    %12 = vector.shape_cast %11 : vector<1x8x32xf32> to vector<8x32xf32>
    %c1 = arith.constant 1 : index
    %c0_20 = arith.constant 0 : index
    %c0_21 = arith.constant 0 : index
    %13 = vector.load %arg15[%c1, %c0_20, %c0_21] : memref<2x8x32xf32, #tpu.memory_space<vmem>>, vector<1x8x32xf32>
    %14 = vector.shape_cast %13 : vector<1x8x32xf32> to vector<8x32xf32>
    %c0_22 = arith.constant 0 : index
    %c0_23 = arith.constant 0 : index
    %c0_24 = arith.constant 0 : index
    %15 = vector.load %arg16[%c0_22, %c0_23, %c0_24] : memref<2x8x32xf32, #tpu.memory_space<vmem>>, vector<1x8x32xf32>
    %16 = vector.shape_cast %15 : vector<1x8x32xf32> to vector<8x32xf32>
    %c1_25 = arith.constant 1 : index
    %c0_26 = arith.constant 0 : index
    %c0_27 = arith.constant 0 : index
    %17 = vector.load %arg16[%c1_25, %c0_26, %c0_27] : memref<2x8x32xf32, #tpu.memory_space<vmem>>, vector<1x8x32xf32>
    %18 = vector.shape_cast %17 : vector<1x8x32xf32> to vector<8x32xf32>
    %c0_i32_28 = arith.constant 0 : i32
    %19 = vector.shape_cast %14 : vector<8x32xf32> to vector<8x1x32xf32>
    %20 = vector.broadcast %19 : vector<8x1x32xf32> to vector<8x8x32xf32>
    %21 = arith.mulf %10, %20 : vector<8x8x32xf32>
    %cst = arith.constant dense<0.000000e+00> : vector<8x8xf32>
    %22 = vector.multi_reduction <add>, %21, %cst [2] : vector<8x8x32xf32> to vector<8x8xf32>
    %cst_29 = arith.constant dense<0xFF800000> : vector<8xf32>
    %23 = vector.multi_reduction <maximumf>, %22, %cst_29 [1] : vector<8x8xf32> to vector<8xf32>
    %24 = vector.shape_cast %23 : vector<8xf32> to vector<8x1xf32>
    %25 = vector.broadcast %24 : vector<8x1xf32> to vector<8x8xf32>
    %26 = arith.subf %22, %25 : vector<8x8xf32>
    %27 = math.exp %26 : vector<8x8xf32>
    %cst_30 = arith.constant dense<0.000000e+00> : vector<8xf32>
    %28 = vector.multi_reduction <add>, %27, %cst_30 [1] : vector<8x8xf32> to vector<8xf32>
    %29 = vector.shape_cast %28 : vector<8xf32> to vector<8x1xf32>
    %30 = vector.broadcast %29 : vector<8x1xf32> to vector<8x8xf32>
    %31 = arith.divf %27, %30 : vector<8x8xf32>
    %32 = vector.shape_cast %31 : vector<8x8xf32> to vector<8x8x1xf32>
    %33 = vector.broadcast %32 : vector<8x8x1xf32> to vector<8x8x32xf32>
    %34 = arith.mulf %33, %10 : vector<8x8x32xf32>
    %cst_31 = arith.constant dense<0.000000e+00> : vector<8x32xf32>
    %35 = vector.multi_reduction <add>, %34, %cst_31 [1] : vector<8x8x32xf32> to vector<8x32xf32>
    %36 = arith.index_cast %c0_i32_28 : i32 to index
    %c0_32 = arith.constant 0 : index
    %c0_33 = arith.constant 0 : index
    %37 = vector.load %arg1[%36, %c0_32, %c0_33] : memref<4x8x128xf32, #tpu.memory_space<vmem>>, vector<1x8x128xf32>
    %38 = vector.shape_cast %37 : vector<1x8x128xf32> to vector<8x128xf32>
    %cst_34 = arith.constant dense<0.000000e+00> : vector<8x128xf32>
    %39 = tpu.matmul %35, %0, %cst_34 {dimension_numbers = #tpu.dot_dimension_numbers<[1], [0], [0], [1], [0, 0, 1, 1], [], []>} : vector<8x32xf32>, vector<32x128xf32>, vector<8x128xf32> -> vector<8x128xf32>
    %40 = arith.addf %38, %39 : vector<8x128xf32>
    %cst_35 = arith.constant dense<0.000000e+00> : vector<8x128xf32>
    %41 = tpu.matmul %12, %1, %cst_35 {dimension_numbers = #tpu.dot_dimension_numbers<[1], [0], [0], [1], [0, 0, 1, 1], [], []>} : vector<8x32xf32>, vector<32x128xf32>, vector<8x128xf32> -> vector<8x128xf32>
    %42 = arith.addf %40, %41 : vector<8x128xf32>
    %43 = math.tanh %42 : vector<8x128xf32>
    %44 = vector.extract_strided_slice %43 {offsets = [0, 0], sizes = [8, 96], strides = [1, 1]} : vector<8x128xf32> to vector<8x96xf32>
    %cst_36 = arith.constant 5.000000e-01 : f32
    %45 = vector.broadcast %cst_36 : f32 to vector<8x96xf32>
    %46 = arith.mulf %45, %44 : vector<8x96xf32>
    %cst_37 = arith.constant 5.000000e-01 : f32
    %47 = vector.broadcast %cst_37 : f32 to vector<8x96xf32>
    %48 = arith.addf %46, %47 : vector<8x96xf32>
    %49 = vector.extract_strided_slice %48 {offsets = [0, 0], sizes = [8, 32], strides = [1, 1]} : vector<8x96xf32> to vector<8x32xf32>
    %50 = vector.extract_strided_slice %48 {offsets = [0, 32], sizes = [8, 32], strides = [1, 1]} : vector<8x96xf32> to vector<8x32xf32>
    %51 = vector.extract_strided_slice %48 {offsets = [0, 64], sizes = [8, 32], strides = [1, 1]} : vector<8x96xf32> to vector<8x32xf32>
    %52 = vector.extract_strided_slice %43 {offsets = [0, 96], sizes = [8, 32], strides = [1, 1]} : vector<8x128xf32> to vector<8x32xf32>
    %53 = arith.mulf %50, %16 : vector<8x32xf32>
    %54 = arith.mulf %49, %52 : vector<8x32xf32>
    %55 = arith.addf %53, %54 : vector<8x32xf32>
    %56 = math.tanh %55 : vector<8x32xf32>
    %57 = arith.mulf %51, %56 : vector<8x32xf32>
    %cst_38 = arith.constant dense<0.000000e+00> : vector<8x128xf32>
    %58 = tpu.matmul %57, %2, %cst_38 {dimension_numbers = #tpu.dot_dimension_numbers<[1], [0], [0], [1], [0, 0, 1, 1], [], []>} : vector<8x32xf32>, vector<32x128xf32>, vector<8x128xf32> -> vector<8x128xf32>
    %59 = vector.broadcast %4 : vector<1x128xf32> to vector<8x128xf32>
    %60 = arith.addf %59, %58 : vector<8x128xf32>
    %cst_39 = arith.constant dense<0.000000e+00> : vector<8x128xf32>
    %61 = tpu.matmul %14, %3, %cst_39 {dimension_numbers = #tpu.dot_dimension_numbers<[1], [0], [0], [1], [0, 0, 1, 1], [], []>} : vector<8x32xf32>, vector<32x128xf32>, vector<8x128xf32> -> vector<8x128xf32>
    %62 = arith.addf %60, %61 : vector<8x128xf32>
    %63 = math.tanh %62 : vector<8x128xf32>
    %64 = vector.extract_strided_slice %63 {offsets = [0, 0], sizes = [8, 96], strides = [1, 1]} : vector<8x128xf32> to vector<8x96xf32>
    %cst_40 = arith.constant 5.000000e-01 : f32
    %65 = vector.broadcast %cst_40 : f32 to vector<8x96xf32>
    %66 = arith.mulf %65, %64 : vector<8x96xf32>
    %cst_41 = arith.constant 5.000000e-01 : f32
    %67 = vector.broadcast %cst_41 : f32 to vector<8x96xf32>
    %68 = arith.addf %66, %67 : vector<8x96xf32>
    %69 = vector.extract_strided_slice %68 {offsets = [0, 0], sizes = [8, 32], strides = [1, 1]} : vector<8x96xf32> to vector<8x32xf32>
    %70 = vector.extract_strided_slice %68 {offsets = [0, 32], sizes = [8, 32], strides = [1, 1]} : vector<8x96xf32> to vector<8x32xf32>
    %71 = vector.extract_strided_slice %68 {offsets = [0, 64], sizes = [8, 32], strides = [1, 1]} : vector<8x96xf32> to vector<8x32xf32>
    %72 = vector.extract_strided_slice %63 {offsets = [0, 96], sizes = [8, 32], strides = [1, 1]} : vector<8x128xf32> to vector<8x32xf32>
    %73 = arith.mulf %70, %18 : vector<8x32xf32>
    %74 = arith.mulf %69, %72 : vector<8x32xf32>
    %75 = arith.addf %73, %74 : vector<8x32xf32>
    %76 = math.tanh %75 : vector<8x32xf32>
    %77 = arith.mulf %71, %76 : vector<8x32xf32>
    %cst_42 = arith.constant dense<0.000000e+00> : vector<8x128xf32>
    %78 = tpu.matmul %77, %5, %cst_42 {dimension_numbers = #tpu.dot_dimension_numbers<[1], [0], [0], [1], [0, 0, 1, 1], [], []>} : vector<8x32xf32>, vector<32x128xf32>, vector<8x128xf32> -> vector<8x128xf32>
    %79 = vector.broadcast %6 : vector<1x128xf32> to vector<8x128xf32>
    %80 = arith.addf %78, %79 : vector<8x128xf32>
    %81 = arith.index_cast %c0_i32_28 : i32 to index
    %c0_43 = arith.constant 0 : index
    %c0_44 = arith.constant 0 : index
    %82 = vector.load %arg12[%81, %c0_43, %c0_44] : memref<4x8x128xf32, #tpu.memory_space<vmem>>, vector<1x8x128xf32>
    %83 = vector.shape_cast %82 : vector<1x8x128xf32> to vector<8x128xf32>
    %84 = vector.shape_cast %80 : vector<8x128xf32> to vector<1x8x128xf32>
    tpu.vector_store %arg12[%81, %c0_43, %c0_44], %84 {strides = array<i32>} : memref<4x8x128xf32, #tpu.memory_space<vmem>>, vector<1x8x128xf32>,
    %c1_i32 = arith.constant 1 : i32
    %85 = vector.shape_cast %77 : vector<8x32xf32> to vector<8x1x32xf32>
    %86 = vector.broadcast %85 : vector<8x1x32xf32> to vector<8x8x32xf32>
    %87 = arith.mulf %10, %86 : vector<8x8x32xf32>
    %cst_45 = arith.constant dense<0.000000e+00> : vector<8x8xf32>
    %88 = vector.multi_reduction <add>, %87, %cst_45 [2] : vector<8x8x32xf32> to vector<8x8xf32>
    %cst_46 = arith.constant dense<0xFF800000> : vector<8xf32>
    %89 = vector.multi_reduction <maximumf>, %88, %cst_46 [1] : vector<8x8xf32> to vector<8xf32>
    %90 = vector.shape_cast %89 : vector<8xf32> to vector<8x1xf32>
    %91 = vector.broadcast %90 : vector<8x1xf32> to vector<8x8xf32>
    %92 = arith.subf %88, %91 : vector<8x8xf32>
    %93 = math.exp %92 : vector<8x8xf32>
    %cst_47 = arith.constant dense<0.000000e+00> : vector<8xf32>
    %94 = vector.multi_reduction <add>, %93, %cst_47 [1] : vector<8x8xf32> to vector<8xf32>
    %95 = vector.shape_cast %94 : vector<8xf32> to vector<8x1xf32>
    %96 = vector.broadcast %95 : vector<8x1xf32> to vector<8x8xf32>
    %97 = arith.divf %93, %96 : vector<8x8xf32>
    %98 = vector.shape_cast %97 : vector<8x8xf32> to vector<8x8x1xf32>
    %99 = vector.broadcast %98 : vector<8x8x1xf32> to vector<8x8x32xf32>
    %100 = arith.mulf %99, %10 : vector<8x8x32xf32>
    %cst_48 = arith.constant dense<0.000000e+00> : vector<8x32xf32>
    %101 = vector.multi_reduction <add>, %100, %cst_48 [1] : vector<8x8x32xf32> to vector<8x32xf32>
    %102 = arith.index_cast %c1_i32 : i32 to index
    %c0_49 = arith.constant 0 : index
    %c0_50 = arith.constant 0 : index
    %103 = vector.load %arg1[%102, %c0_49, %c0_50] : memref<4x8x128xf32, #tpu.memory_space<vmem>>, vector<1x8x128xf32>
    %104 = vector.shape_cast %103 : vector<1x8x128xf32> to vector<8x128xf32>
    %cst_51 = arith.constant dense<0.000000e+00> : vector<8x128xf32>
    %105 = tpu.matmul %101, %0, %cst_51 {dimension_numbers = #tpu.dot_dimension_numbers<[1], [0], [0], [1], [0, 0, 1, 1], [], []>} : vector<8x32xf32>, vector<32x128xf32>, vector<8x128xf32> -> vector<8x128xf32>
    %106 = arith.addf %104, %105 : vector<8x128xf32>
    %cst_52 = arith.constant dense<0.000000e+00> : vector<8x128xf32>
    %107 = tpu.matmul %57, %1, %cst_52 {dimension_numbers = #tpu.dot_dimension_numbers<[1], [0], [0], [1], [0, 0, 1, 1], [], []>} : vector<8x32xf32>, vector<32x128xf32>, vector<8x128xf32> -> vector<8x128xf32>
    %108 = arith.addf %106, %107 : vector<8x128xf32>
    %109 = math.tanh %108 : vector<8x128xf32>
    %110 = vector.extract_strided_slice %109 {offsets = [0, 0], sizes = [8, 96], strides = [1, 1]} : vector<8x128xf32> to vector<8x96xf32>
    %cst_53 = arith.constant 5.000000e-01 : f32
    %111 = vector.broadcast %cst_53 : f32 to vector<8x96xf32>
    %112 = arith.mulf %111, %110 : vector<8x96xf32>
    %cst_54 = arith.constant 5.000000e-01 : f32
    %113 = vector.broadcast %cst_54 : f32 to vector<8x96xf32>
    %114 = arith.addf %112, %113 : vector<8x96xf32>
    %115 = vector.extract_strided_slice %114 {offsets = [0, 0], sizes = [8, 32], strides = [1, 1]} : vector<8x96xf32> to vector<8x32xf32>
    %116 = vector.extract_strided_slice %114 {offsets = [0, 32], sizes = [8, 32], strides = [1, 1]} : vector<8x96xf32> to vector<8x32xf32>
    %117 = vector.extract_strided_slice %114 {offsets = [0, 64], sizes = [8, 32], strides = [1, 1]} : vector<8x96xf32> to vector<8x32xf32>
    %118 = vector.extract_strided_slice %109 {offsets = [0, 96], sizes = [8, 32], strides = [1, 1]} : vector<8x128xf32> to vector<8x32xf32>
    %119 = arith.mulf %116, %55 : vector<8x32xf32>
    %120 = arith.mulf %115, %118 : vector<8x32xf32>
    %121 = arith.addf %119, %120 : vector<8x32xf32>
    %122 = math.tanh %121 : vector<8x32xf32>
    %123 = arith.mulf %117, %122 : vector<8x32xf32>
    %cst_55 = arith.constant dense<0.000000e+00> : vector<8x128xf32>
    %124 = tpu.matmul %123, %2, %cst_55 {dimension_numbers = #tpu.dot_dimension_numbers<[1], [0], [0], [1], [0, 0, 1, 1], [], []>} : vector<8x32xf32>, vector<32x128xf32>, vector<8x128xf32> -> vector<8x128xf32>
    %125 = vector.broadcast %4 : vector<1x128xf32> to vector<8x128xf32>
    %126 = arith.addf %125, %124 : vector<8x128xf32>
    %cst_56 = arith.constant dense<0.000000e+00> : vector<8x128xf32>
    %127 = tpu.matmul %77, %3, %cst_56 {dimension_numbers = #tpu.dot_dimension_numbers<[1], [0], [0], [1], [0, 0, 1, 1], [], []>} : vector<8x32xf32>, vector<32x128xf32>, vector<8x128xf32> -> vector<8x128xf32>
    %128 = arith.addf %126, %127 : vector<8x128xf32>
    %129 = math.tanh %128 : vector<8x128xf32>
    %130 = vector.extract_strided_slice %129 {offsets = [0, 0], sizes = [8, 96], strides = [1, 1]} : vector<8x128xf32> to vector<8x96xf32>
    %cst_57 = arith.constant 5.000000e-01 : f32
    %131 = vector.broadcast %cst_57 : f32 to vector<8x96xf32>
    %132 = arith.mulf %131, %130 : vector<8x96xf32>
    %cst_58 = arith.constant 5.000000e-01 : f32
    %133 = vector.broadcast %cst_58 : f32 to vector<8x96xf32>
    %134 = arith.addf %132, %133 : vector<8x96xf32>
    %135 = vector.extract_strided_slice %134 {offsets = [0, 0], sizes = [8, 32], strides = [1, 1]} : vector<8x96xf32> to vector<8x32xf32>
    %136 = vector.extract_strided_slice %134 {offsets = [0, 32], sizes = [8, 32], strides = [1, 1]} : vector<8x96xf32> to vector<8x32xf32>
    %137 = vector.extract_strided_slice %134 {offsets = [0, 64], sizes = [8, 32], strides = [1, 1]} : vector<8x96xf32> to vector<8x32xf32>
    %138 = vector.extract_strided_slice %129 {offsets = [0, 96], sizes = [8, 32], strides = [1, 1]} : vector<8x128xf32> to vector<8x32xf32>
    %139 = arith.mulf %136, %75 : vector<8x32xf32>
    %140 = arith.mulf %135, %138 : vector<8x32xf32>
    %141 = arith.addf %139, %140 : vector<8x32xf32>
    %142 = math.tanh %141 : vector<8x32xf32>
    %143 = arith.mulf %137, %142 : vector<8x32xf32>
    %cst_59 = arith.constant dense<0.000000e+00> : vector<8x128xf32>
    %144 = tpu.matmul %143, %5, %cst_59 {dimension_numbers = #tpu.dot_dimension_numbers<[1], [0], [0], [1], [0, 0, 1, 1], [], []>} : vector<8x32xf32>, vector<32x128xf32>, vector<8x128xf32> -> vector<8x128xf32>
    %145 = vector.broadcast %6 : vector<1x128xf32> to vector<8x128xf32>
    %146 = arith.addf %144, %145 : vector<8x128xf32>
    %147 = arith.index_cast %c1_i32 : i32 to index
    %c0_60 = arith.constant 0 : index
    %c0_61 = arith.constant 0 : index
    %148 = vector.load %arg12[%147, %c0_60, %c0_61] : memref<4x8x128xf32, #tpu.memory_space<vmem>>, vector<1x8x128xf32>
    %149 = vector.shape_cast %148 : vector<1x8x128xf32> to vector<8x128xf32>
    %150 = vector.shape_cast %146 : vector<8x128xf32> to vector<1x8x128xf32>
    tpu.vector_store %arg12[%147, %c0_60, %c0_61], %150 {strides = array<i32>} : memref<4x8x128xf32, #tpu.memory_space<vmem>>, vector<1x8x128xf32>,
    %c2_i32 = arith.constant 2 : i32
    %151 = vector.shape_cast %143 : vector<8x32xf32> to vector<8x1x32xf32>
    %152 = vector.broadcast %151 : vector<8x1x32xf32> to vector<8x8x32xf32>
    %153 = arith.mulf %10, %152 : vector<8x8x32xf32>
    %cst_62 = arith.constant dense<0.000000e+00> : vector<8x8xf32>
    %154 = vector.multi_reduction <add>, %153, %cst_62 [2] : vector<8x8x32xf32> to vector<8x8xf32>
    %cst_63 = arith.constant dense<0xFF800000> : vector<8xf32>
    %155 = vector.multi_reduction <maximumf>, %154, %cst_63 [1] : vector<8x8xf32> to vector<8xf32>
    %156 = vector.shape_cast %155 : vector<8xf32> to vector<8x1xf32>
    %157 = vector.broadcast %156 : vector<8x1xf32> to vector<8x8xf32>
    %158 = arith.subf %154, %157 : vector<8x8xf32>
    %159 = math.exp %158 : vector<8x8xf32>
    %cst_64 = arith.constant dense<0.000000e+00> : vector<8xf32>
    %160 = vector.multi_reduction <add>, %159, %cst_64 [1] : vector<8x8xf32> to vector<8xf32>
    %161 = vector.shape_cast %160 : vector<8xf32> to vector<8x1xf32>
    %162 = vector.broadcast %161 : vector<8x1xf32> to vector<8x8xf32>
    %163 = arith.divf %159, %162 : vector<8x8xf32>
    %164 = vector.shape_cast %163 : vector<8x8xf32> to vector<8x8x1xf32>
    %165 = vector.broadcast %164 : vector<8x8x1xf32> to vector<8x8x32xf32>
    %166 = arith.mulf %165, %10 : vector<8x8x32xf32>
    %cst_65 = arith.constant dense<0.000000e+00> : vector<8x32xf32>
    %167 = vector.multi_reduction <add>, %166, %cst_65 [1] : vector<8x8x32xf32> to vector<8x32xf32>
    %168 = arith.index_cast %c2_i32 : i32 to index
    %c0_66 = arith.constant 0 : index
    %c0_67 = arith.constant 0 : index
    %169 = vector.load %arg1[%168, %c0_66, %c0_67] : memref<4x8x128xf32, #tpu.memory_space<vmem>>, vector<1x8x128xf32>
    %170 = vector.shape_cast %169 : vector<1x8x128xf32> to vector<8x128xf32>
    %cst_68 = arith.constant dense<0.000000e+00> : vector<8x128xf32>
    %171 = tpu.matmul %167, %0, %cst_68 {dimension_numbers = #tpu.dot_dimension_numbers<[1], [0], [0], [1], [0, 0, 1, 1], [], []>} : vector<8x32xf32>, vector<32x128xf32>, vector<8x128xf32> -> vector<8x128xf32>
    %172 = arith.addf %170, %171 : vector<8x128xf32>
    %cst_69 = arith.constant dense<0.000000e+00> : vector<8x128xf32>
    %173 = tpu.matmul %123, %1, %cst_69 {dimension_numbers = #tpu.dot_dimension_numbers<[1], [0], [0], [1], [0, 0, 1, 1], [], []>} : vector<8x32xf32>, vector<32x128xf32>, vector<8x128xf32> -> vector<8x128xf32>
    %174 = arith.addf %172, %173 : vector<8x128xf32>
    %175 = math.tanh %174 : vector<8x128xf32>
    %176 = vector.extract_strided_slice %175 {offsets = [0, 0], sizes = [8, 96], strides = [1, 1]} : vector<8x128xf32> to vector<8x96xf32>
    %cst_70 = arith.constant 5.000000e-01 : f32
    %177 = vector.broadcast %cst_70 : f32 to vector<8x96xf32>
    %178 = arith.mulf %177, %176 : vector<8x96xf32>
    %cst_71 = arith.constant 5.000000e-01 : f32
    %179 = vector.broadcast %cst_71 : f32 to vector<8x96xf32>
    %180 = arith.addf %178, %179 : vector<8x96xf32>
    %181 = vector.extract_strided_slice %180 {offsets = [0, 0], sizes = [8, 32], strides = [1, 1]} : vector<8x96xf32> to vector<8x32xf32>
    %182 = vector.extract_strided_slice %180 {offsets = [0, 32], sizes = [8, 32], strides = [1, 1]} : vector<8x96xf32> to vector<8x32xf32>
    %183 = vector.extract_strided_slice %180 {offsets = [0, 64], sizes = [8, 32], strides = [1, 1]} : vector<8x96xf32> to vector<8x32xf32>
    %184 = vector.extract_strided_slice %175 {offsets = [0, 96], sizes = [8, 32], strides = [1, 1]} : vector<8x128xf32> to vector<8x32xf32>
    %185 = arith.mulf %182, %121 : vector<8x32xf32>
    %186 = arith.mulf %181, %184 : vector<8x32xf32>
    %187 = arith.addf %185, %186 : vector<8x32xf32>
    %188 = math.tanh %187 : vector<8x32xf32>
    %189 = arith.mulf %183, %188 : vector<8x32xf32>
    %cst_72 = arith.constant dense<0.000000e+00> : vector<8x128xf32>
    %190 = tpu.matmul %189, %2, %cst_72 {dimension_numbers = #tpu.dot_dimension_numbers<[1], [0], [0], [1], [0, 0, 1, 1], [], []>} : vector<8x32xf32>, vector<32x128xf32>, vector<8x128xf32> -> vector<8x128xf32>
    %191 = vector.broadcast %4 : vector<1x128xf32> to vector<8x128xf32>
    %192 = arith.addf %191, %190 : vector<8x128xf32>
    %cst_73 = arith.constant dense<0.000000e+00> : vector<8x128xf32>
    %193 = tpu.matmul %143, %3, %cst_73 {dimension_numbers = #tpu.dot_dimension_numbers<[1], [0], [0], [1], [0, 0, 1, 1], [], []>} : vector<8x32xf32>, vector<32x128xf32>, vector<8x128xf32> -> vector<8x128xf32>
    %194 = arith.addf %192, %193 : vector<8x128xf32>
    %195 = math.tanh %194 : vector<8x128xf32>
    %196 = vector.extract_strided_slice %195 {offsets = [0, 0], sizes = [8, 96], strides = [1, 1]} : vector<8x128xf32> to vector<8x96xf32>
    %cst_74 = arith.constant 5.000000e-01 : f32
    %197 = vector.broadcast %cst_74 : f32 to vector<8x96xf32>
    %198 = arith.mulf %197, %196 : vector<8x96xf32>
    %cst_75 = arith.constant 5.000000e-01 : f32
    %199 = vector.broadcast %cst_75 : f32 to vector<8x96xf32>
    %200 = arith.addf %198, %199 : vector<8x96xf32>
    %201 = vector.extract_strided_slice %200 {offsets = [0, 0], sizes = [8, 32], strides = [1, 1]} : vector<8x96xf32> to vector<8x32xf32>
    %202 = vector.extract_strided_slice %200 {offsets = [0, 32], sizes = [8, 32], strides = [1, 1]} : vector<8x96xf32> to vector<8x32xf32>
    %203 = vector.extract_strided_slice %200 {offsets = [0, 64], sizes = [8, 32], strides = [1, 1]} : vector<8x96xf32> to vector<8x32xf32>
    %204 = vector.extract_strided_slice %195 {offsets = [0, 96], sizes = [8, 32], strides = [1, 1]} : vector<8x128xf32> to vector<8x32xf32>
    %205 = arith.mulf %202, %141 : vector<8x32xf32>
    %206 = arith.mulf %201, %204 : vector<8x32xf32>
    %207 = arith.addf %205, %206 : vector<8x32xf32>
    %208 = math.tanh %207 : vector<8x32xf32>
    %209 = arith.mulf %203, %208 : vector<8x32xf32>
    %cst_76 = arith.constant dense<0.000000e+00> : vector<8x128xf32>
    %210 = tpu.matmul %209, %5, %cst_76 {dimension_numbers = #tpu.dot_dimension_numbers<[1], [0], [0], [1], [0, 0, 1, 1], [], []>} : vector<8x32xf32>, vector<32x128xf32>, vector<8x128xf32> -> vector<8x128xf32>
    %211 = vector.broadcast %6 : vector<1x128xf32> to vector<8x128xf32>
    %212 = arith.addf %210, %211 : vector<8x128xf32>
    %213 = arith.index_cast %c2_i32 : i32 to index
    %c0_77 = arith.constant 0 : index
    %c0_78 = arith.constant 0 : index
    %214 = vector.load %arg12[%213, %c0_77, %c0_78] : memref<4x8x128xf32, #tpu.memory_space<vmem>>, vector<1x8x128xf32>
    %215 = vector.shape_cast %214 : vector<1x8x128xf32> to vector<8x128xf32>
    %216 = vector.shape_cast %212 : vector<8x128xf32> to vector<1x8x128xf32>
    tpu.vector_store %arg12[%213, %c0_77, %c0_78], %216 {strides = array<i32>} : memref<4x8x128xf32, #tpu.memory_space<vmem>>, vector<1x8x128xf32>,
    %c3_i32 = arith.constant 3 : i32
    %217 = vector.shape_cast %209 : vector<8x32xf32> to vector<8x1x32xf32>
    %218 = vector.broadcast %217 : vector<8x1x32xf32> to vector<8x8x32xf32>
    %219 = arith.mulf %10, %218 : vector<8x8x32xf32>
    %cst_79 = arith.constant dense<0.000000e+00> : vector<8x8xf32>
    %220 = vector.multi_reduction <add>, %219, %cst_79 [2] : vector<8x8x32xf32> to vector<8x8xf32>
    %cst_80 = arith.constant dense<0xFF800000> : vector<8xf32>
    %221 = vector.multi_reduction <maximumf>, %220, %cst_80 [1] : vector<8x8xf32> to vector<8xf32>
    %222 = vector.shape_cast %221 : vector<8xf32> to vector<8x1xf32>
    %223 = vector.broadcast %222 : vector<8x1xf32> to vector<8x8xf32>
    %224 = arith.subf %220, %223 : vector<8x8xf32>
    %225 = math.exp %224 : vector<8x8xf32>
    %cst_81 = arith.constant dense<0.000000e+00> : vector<8xf32>
    %226 = vector.multi_reduction <add>, %225, %cst_81 [1] : vector<8x8xf32> to vector<8xf32>
    %227 = vector.shape_cast %226 : vector<8xf32> to vector<8x1xf32>
    %228 = vector.broadcast %227 : vector<8x1xf32> to vector<8x8xf32>
    %229 = arith.divf %225, %228 : vector<8x8xf32>
    %230 = vector.shape_cast %229 : vector<8x8xf32> to vector<8x8x1xf32>
    %231 = vector.broadcast %230 : vector<8x8x1xf32> to vector<8x8x32xf32>
    %232 = arith.mulf %231, %10 : vector<8x8x32xf32>
    %cst_82 = arith.constant dense<0.000000e+00> : vector<8x32xf32>
    %233 = vector.multi_reduction <add>, %232, %cst_82 [1] : vector<8x8x32xf32> to vector<8x32xf32>
    %234 = arith.index_cast %c3_i32 : i32 to index
    %c0_83 = arith.constant 0 : index
    %c0_84 = arith.constant 0 : index
    %235 = vector.load %arg1[%234, %c0_83, %c0_84] : memref<4x8x128xf32, #tpu.memory_space<vmem>>, vector<1x8x128xf32>
    %236 = vector.shape_cast %235 : vector<1x8x128xf32> to vector<8x128xf32>
    %cst_85 = arith.constant dense<0.000000e+00> : vector<8x128xf32>
    %237 = tpu.matmul %233, %0, %cst_85 {dimension_numbers = #tpu.dot_dimension_numbers<[1], [0], [0], [1], [0, 0, 1, 1], [], []>} : vector<8x32xf32>, vector<32x128xf32>, vector<8x128xf32> -> vector<8x128xf32>
    %238 = arith.addf %236, %237 : vector<8x128xf32>
    %cst_86 = arith.constant dense<0.000000e+00> : vector<8x128xf32>
    %239 = tpu.matmul %189, %1, %cst_86 {dimension_numbers = #tpu.dot_dimension_numbers<[1], [0], [0], [1], [0, 0, 1, 1], [], []>} : vector<8x32xf32>, vector<32x128xf32>, vector<8x128xf32> -> vector<8x128xf32>
    %240 = arith.addf %238, %239 : vector<8x128xf32>
    %241 = math.tanh %240 : vector<8x128xf32>
    %242 = vector.extract_strided_slice %241 {offsets = [0, 0], sizes = [8, 96], strides = [1, 1]} : vector<8x128xf32> to vector<8x96xf32>
    %cst_87 = arith.constant 5.000000e-01 : f32
    %243 = vector.broadcast %cst_87 : f32 to vector<8x96xf32>
    %244 = arith.mulf %243, %242 : vector<8x96xf32>
    %cst_88 = arith.constant 5.000000e-01 : f32
    %245 = vector.broadcast %cst_88 : f32 to vector<8x96xf32>
    %246 = arith.addf %244, %245 : vector<8x96xf32>
    %247 = vector.extract_strided_slice %246 {offsets = [0, 0], sizes = [8, 32], strides = [1, 1]} : vector<8x96xf32> to vector<8x32xf32>
    %248 = vector.extract_strided_slice %246 {offsets = [0, 32], sizes = [8, 32], strides = [1, 1]} : vector<8x96xf32> to vector<8x32xf32>
    %249 = vector.extract_strided_slice %246 {offsets = [0, 64], sizes = [8, 32], strides = [1, 1]} : vector<8x96xf32> to vector<8x32xf32>
    %250 = vector.extract_strided_slice %241 {offsets = [0, 96], sizes = [8, 32], strides = [1, 1]} : vector<8x128xf32> to vector<8x32xf32>
    %251 = arith.mulf %248, %187 : vector<8x32xf32>
    %252 = arith.mulf %247, %250 : vector<8x32xf32>
    %253 = arith.addf %251, %252 : vector<8x32xf32>
    %254 = math.tanh %253 : vector<8x32xf32>
    %255 = arith.mulf %249, %254 : vector<8x32xf32>
    %cst_89 = arith.constant dense<0.000000e+00> : vector<8x128xf32>
    %256 = tpu.matmul %255, %2, %cst_89 {dimension_numbers = #tpu.dot_dimension_numbers<[1], [0], [0], [1], [0, 0, 1, 1], [], []>} : vector<8x32xf32>, vector<32x128xf32>, vector<8x128xf32> -> vector<8x128xf32>
    %257 = vector.broadcast %4 : vector<1x128xf32> to vector<8x128xf32>
    %258 = arith.addf %257, %256 : vector<8x128xf32>
    %cst_90 = arith.constant dense<0.000000e+00> : vector<8x128xf32>
    %259 = tpu.matmul %209, %3, %cst_90 {dimension_numbers = #tpu.dot_dimension_numbers<[1], [0], [0], [1], [0, 0, 1, 1], [], []>} : vector<8x32xf32>, vector<32x128xf32>, vector<8x128xf32> -> vector<8x128xf32>
    %260 = arith.addf %258, %259 : vector<8x128xf32>
    %261 = math.tanh %260 : vector<8x128xf32>
    %262 = vector.extract_strided_slice %261 {offsets = [0, 0], sizes = [8, 96], strides = [1, 1]} : vector<8x128xf32> to vector<8x96xf32>
    %cst_91 = arith.constant 5.000000e-01 : f32
    %263 = vector.broadcast %cst_91 : f32 to vector<8x96xf32>
    %264 = arith.mulf %263, %262 : vector<8x96xf32>
    %cst_92 = arith.constant 5.000000e-01 : f32
    %265 = vector.broadcast %cst_92 : f32 to vector<8x96xf32>
    %266 = arith.addf %264, %265 : vector<8x96xf32>
    %267 = vector.extract_strided_slice %266 {offsets = [0, 0], sizes = [8, 32], strides = [1, 1]} : vector<8x96xf32> to vector<8x32xf32>
    %268 = vector.extract_strided_slice %266 {offsets = [0, 32], sizes = [8, 32], strides = [1, 1]} : vector<8x96xf32> to vector<8x32xf32>
    %269 = vector.extract_strided_slice %266 {offsets = [0, 64], sizes = [8, 32], strides = [1, 1]} : vector<8x96xf32> to vector<8x32xf32>
    %270 = vector.extract_strided_slice %261 {offsets = [0, 96], sizes = [8, 32], strides = [1, 1]} : vector<8x128xf32> to vector<8x32xf32>
    %271 = arith.mulf %268, %207 : vector<8x32xf32>
    %272 = arith.mulf %267, %270 : vector<8x32xf32>
    %273 = arith.addf %271, %272 : vector<8x32xf32>
    %274 = math.tanh %273 : vector<8x32xf32>
    %275 = arith.mulf %269, %274 : vector<8x32xf32>
    %cst_93 = arith.constant dense<0.000000e+00> : vector<8x128xf32>
    %276 = tpu.matmul %275, %5, %cst_93 {dimension_numbers = #tpu.dot_dimension_numbers<[1], [0], [0], [1], [0, 0, 1, 1], [], []>} : vector<8x32xf32>, vector<32x128xf32>, vector<8x128xf32> -> vector<8x128xf32>
    %277 = vector.broadcast %6 : vector<1x128xf32> to vector<8x128xf32>
    %278 = arith.addf %276, %277 : vector<8x128xf32>
    %279 = arith.index_cast %c3_i32 : i32 to index
    %c0_94 = arith.constant 0 : index
    %c0_95 = arith.constant 0 : index
    %280 = vector.load %arg12[%279, %c0_94, %c0_95] : memref<4x8x128xf32, #tpu.memory_space<vmem>>, vector<1x8x128xf32>
    %281 = vector.shape_cast %280 : vector<1x8x128xf32> to vector<8x128xf32>
    %282 = vector.shape_cast %278 : vector<8x128xf32> to vector<1x8x128xf32>
    tpu.vector_store %arg12[%279, %c0_94, %c0_95], %282 {strides = array<i32>} : memref<4x8x128xf32, #tpu.memory_space<vmem>>, vector<1x8x128xf32>,
    %c4_i32 = arith.constant 4 : i32
    %c0_96 = arith.constant 0 : index
    %c0_97 = arith.constant 0 : index
    %c0_98 = arith.constant 0 : index
    %283 = vector.load %arg15[%c0_96, %c0_97, %c0_98] : memref<2x8x32xf32, #tpu.memory_space<vmem>>, vector<1x8x32xf32>
    %284 = vector.shape_cast %283 : vector<1x8x32xf32> to vector<8x32xf32>
    %285 = vector.shape_cast %255 : vector<8x32xf32> to vector<1x8x32xf32>
    tpu.vector_store %arg15[%c0_96, %c0_97, %c0_98], %285 {strides = array<i32>} : memref<2x8x32xf32, #tpu.memory_space<vmem>>, vector<1x8x32xf32>,
    %c0_99 = arith.constant 0 : index
    %c0_100 = arith.constant 0 : index
    %c0_101 = arith.constant 0 : index
    %286 = vector.load %arg16[%c0_99, %c0_100, %c0_101] : memref<2x8x32xf32, #tpu.memory_space<vmem>>, vector<1x8x32xf32>
    %287 = vector.shape_cast %286 : vector<1x8x32xf32> to vector<8x32xf32>
    %288 = vector.shape_cast %253 : vector<8x32xf32> to vector<1x8x32xf32>
    tpu.vector_store %arg16[%c0_99, %c0_100, %c0_101], %288 {strides = array<i32>} : memref<2x8x32xf32, #tpu.memory_space<vmem>>, vector<1x8x32xf32>,
    %c1_102 = arith.constant 1 : index
    %c0_103 = arith.constant 0 : index
    %c0_104 = arith.constant 0 : index
    %289 = vector.load %arg15[%c1_102, %c0_103, %c0_104] : memref<2x8x32xf32, #tpu.memory_space<vmem>>, vector<1x8x32xf32>
    %290 = vector.shape_cast %289 : vector<1x8x32xf32> to vector<8x32xf32>
    %291 = vector.shape_cast %275 : vector<8x32xf32> to vector<1x8x32xf32>
    tpu.vector_store %arg15[%c1_102, %c0_103, %c0_104], %291 {strides = array<i32>} : memref<2x8x32xf32, #tpu.memory_space<vmem>>, vector<1x8x32xf32>,
    %c1_105 = arith.constant 1 : index
    %c0_106 = arith.constant 0 : index
    %c0_107 = arith.constant 0 : index
    %292 = vector.load %arg16[%c1_105, %c0_106, %c0_107] : memref<2x8x32xf32, #tpu.memory_space<vmem>>, vector<1x8x32xf32>
    %293 = vector.shape_cast %292 : vector<1x8x32xf32> to vector<8x32xf32>
    %294 = vector.shape_cast %273 : vector<8x32xf32> to vector<1x8x32xf32>
    tpu.vector_store %arg16[%c1_105, %c0_106, %c0_107], %294 {strides = array<i32>} : memref<2x8x32xf32, #tpu.memory_space<vmem>>, vector<1x8x32xf32>,
    %c0_i32_108 = arith.constant 0 : i32
    %295 = arith.cmpi eq, %arg0, %c0_i32_108 : i32
    %296 = arith.extui %295 : i1 to i32
    %c0_i32_109 = arith.constant 0 : i32
    %297 = arith.cmpi ne, %296, %c0_i32_109 : i32
    scf.if %297 {
      %c0_110 = arith.constant 0 : index
      %c0_111 = arith.constant 0 : index
      %c0_112 = arith.constant 0 : index
      %298 = vector.load %arg15[%c0_110, %c0_111, %c0_112] : memref<2x8x32xf32, #tpu.memory_space<vmem>>, vector<2x8x32xf32>
      %c0_113 = arith.constant 0 : index
      %c0_114 = arith.constant 0 : index
      %c0_115 = arith.constant 0 : index
      %299 = vector.load %arg13[%c0_113, %c0_114, %c0_115] : memref<2x8x32xf32, #tpu.memory_space<vmem>>, vector<2x8x32xf32>
      tpu.vector_store %arg13[%c0_113, %c0_114, %c0_115], %298 {strides = array<i32>} : memref<2x8x32xf32, #tpu.memory_space<vmem>>, vector<2x8x32xf32>,
      %c0_116 = arith.constant 0 : index
      %c0_117 = arith.constant 0 : index
      %c0_118 = arith.constant 0 : index
      %300 = vector.load %arg16[%c0_116, %c0_117, %c0_118] : memref<2x8x32xf32, #tpu.memory_space<vmem>>, vector<2x8x32xf32>
      %c0_119 = arith.constant 0 : index
      %c0_120 = arith.constant 0 : index
      %c0_121 = arith.constant 0 : index
      %301 = vector.load %arg14[%c0_119, %c0_120, %c0_121] : memref<2x8x32xf32, #tpu.memory_space<vmem>>, vector<2x8x32xf32>
      tpu.vector_store %arg14[%c0_119, %c0_120, %c0_121], %300 {strides = array<i32>} : memref<2x8x32xf32, #tpu.memory_space<vmem>>, vector<2x8x32xf32>,
    } else {
    }
    return
  }
  func.func @transform_0(%arg0: i32) -> (i32, i32, i32) {
    %c0_i32 = arith.constant 0 : i32
    %c0_i32_0 = arith.constant 0 : i32
    %c0_i32_1 = arith.constant 0 : i32
    return %arg0, %c0_i32, %c0_i32_0 : i32, i32, i32
  }
  func.func @transform_1(%arg0: i32) -> (i32, i32, i32) {
    %c0_i32 = arith.constant 0 : i32
    %c0_i32_0 = arith.constant 0 : i32
    %c0_i32_1 = arith.constant 0 : i32
    %c0_i32_2 = arith.constant 0 : i32
    return %c0_i32, %c0_i32_0, %c0_i32_1 : i32, i32, i32
  }
  func.func @transform_2(%arg0: i32) -> (i32, i32, i32) {
    %c0_i32 = arith.constant 0 : i32
    %c0_i32_0 = arith.constant 0 : i32
    %c0_i32_1 = arith.constant 0 : i32
    %c0_i32_2 = arith.constant 0 : i32
    return %c0_i32, %c0_i32_0, %c0_i32_1 : i32, i32, i32
  }
  func.func @transform_3(%arg0: i32) -> (i32, i32, i32) {
    %c0_i32 = arith.constant 0 : i32
    %c0_i32_0 = arith.constant 0 : i32
    %c0_i32_1 = arith.constant 0 : i32
    %c0_i32_2 = arith.constant 0 : i32
    return %c0_i32, %c0_i32_0, %c0_i32_1 : i32, i32, i32
  }
  func.func @transform_4(%arg0: i32) -> (i32, i32) {
    %c0_i32 = arith.constant 0 : i32
    %c0_i32_0 = arith.constant 0 : i32
    %c0_i32_1 = arith.constant 0 : i32
    return %c0_i32, %c0_i32_0 : i32, i32
  }
  func.func @transform_5(%arg0: i32) -> (i32, i32) {
    %c0_i32 = arith.constant 0 : i32
    %c0_i32_0 = arith.constant 0 : i32
    %c0_i32_1 = arith.constant 0 : i32
    return %c0_i32, %c0_i32_0 : i32, i32
  }
  func.func @transform_6(%arg0: i32) -> (i32, i32) {
    %c0_i32 = arith.constant 0 : i32
    %c0_i32_0 = arith.constant 0 : i32
    %c0_i32_1 = arith.constant 0 : i32
    return %c0_i32, %c0_i32_0 : i32, i32
  }
  func.func @transform_7(%arg0: i32) -> (i32, i32) {
    %c0_i32 = arith.constant 0 : i32
    %c0_i32_0 = arith.constant 0 : i32
    %c0_i32_1 = arith.constant 0 : i32
    return %c0_i32, %c0_i32_0 : i32, i32
  }
  func.func @transform_8(%arg0: i32) -> (i32, i32) {
    %c0_i32 = arith.constant 0 : i32
    %c0_i32_0 = arith.constant 0 : i32
    %c0_i32_1 = arith.constant 0 : i32
    return %c0_i32, %c0_i32_0 : i32, i32
  }
  func.func @transform_9(%arg0: i32) -> (i32, i32) {
    %c0_i32 = arith.constant 0 : i32
    %c0_i32_0 = arith.constant 0 : i32
    %c0_i32_1 = arith.constant 0 : i32
    return %c0_i32, %c0_i32_0 : i32, i32
  }
  func.func @transform_10(%arg0: i32) -> (i32, i32) {
    %c0_i32 = arith.constant 0 : i32
    %c0_i32_0 = arith.constant 0 : i32
    %c0_i32_1 = arith.constant 0 : i32
    return %c0_i32, %c0_i32_0 : i32, i32
  }
  func.func @transform_11(%arg0: i32) -> (i32, i32, i32) {
    %c0_i32 = arith.constant 0 : i32
    %c0_i32_0 = arith.constant 0 : i32
    %c0_i32_1 = arith.constant 0 : i32
    return %arg0, %c0_i32, %c0_i32_0 : i32, i32, i32
  }
  func.func @transform_12(%arg0: i32) -> (i32, i32, i32) {
    %c0_i32 = arith.constant 0 : i32
    %c0_i32_0 = arith.constant 0 : i32
    %c0_i32_1 = arith.constant 0 : i32
    %c0_i32_2 = arith.constant 0 : i32
    return %c0_i32, %c0_i32_0, %c0_i32_1 : i32, i32, i32
  }
  func.func @transform_13(%arg0: i32) -> (i32, i32, i32) {
    %c0_i32 = arith.constant 0 : i32
    %c0_i32_0 = arith.constant 0 : i32
    %c0_i32_1 = arith.constant 0 : i32
    %c0_i32_2 = arith.constant 0 : i32
    return %c0_i32, %c0_i32_0, %c0_i32_1 : i32, i32, i32
  }
}

</mosaic_0001>

<bundles_post_ra>
// kernel: tpu_custom_call.1
= control target key start
LH: loop header
LB: loop body
LE: loop exit
PB: predicated region body
PF: predicated region fallthrough
CT: control target
= control target key end

     0   :  { %19 = vsyncpa [#allocation5], 0  ;;  %s6063_s0 = inlined_call_operand.hbm [shape: f32[4,8,128], index: 0, kind: input, shape index: {}]   ;;  %s6064_s1 = inlined_call_operand.hbm [shape: f32[8,8,32], index: 1, kind: input, shape index: {}]   ;;  %s6065_s2 = inlined_call_operand.hbm [shape: f32[2,8,32], index: 2, kind: input, shape index: {}]   ;;  %s6066_s3 = inlined_call_operand.hbm [shape: f32[2,8,32], index: 3, kind: input, shape index: {}]   ;;  %s6067_s4 = inlined_call_operand.hbm [shape: f32[32,128], index: 4, kind: input, shape index: {}]   ;;  %s6068_s5 = inlined_call_operand.hbm [shape: f32[32,128], index: 5, kind: input, shape index: {}]   ;;  %s6069_s6 = inlined_call_operand.hbm [shape: f32[32,128], index: 6, kind: input, shape index: {}]   ;;  %s6070_s7 = inlined_call_operand.hbm [shape: f32[32,128], index: 7, kind: input, shape index: {}]   ;;  %s6071_s8 = inlined_call_operand.vmem [shape: f32[1,128], index: 8, kind: input, shape index: {}]   ;;  %s6072_s9 = inlined_call_operand.vmem [shape: f32[32,128], index: 9, kind: input, shape index: {}]   ;;  %s6073_s10 = inlined_call_operand.vmem [shape: f32[1,128], index: 10, kind: input, shape index: {}]   ;;  %s6074_s11 = inlined_call_operand.hbm [shape: f32[4,8,128], index: 11, kind: output, shape index: {0}]   ;;  %s6075_s12 = inlined_call_operand.hbm [shape: f32[2,8,32], index: 12, kind: output, shape index: {1}]   ;;  %s6076_s13 = inlined_call_operand.hbm [shape: f32[2,8,32], index: 13, kind: output, shape index: {2}]  }
   0x1   :  { %20 = vsyncpa [#allocation8], 0 }
   0x2   :  { %21 = vsyncpa [#allocation11], 0 }
   0x3   :  { %22 = vsyncpa [#allocation14], 0 }
   0x4   :  { %23 = vsyncpa [#allocation17], 0 }
   0x5   :  { %24 = vsyncpa [#allocation6], 0 }
   0x6   :  { %25 = vsyncpa [#allocation20], 0  ;;  %s4897_s25 = smov [#allocation7]   ;;  %s4898_s27 = smov [#allocation10]  }
   0x7   :  { %s43_s26 = sshll.u32 %s4897_s25, 4  ;;  %s67_s28 = sshll.u32 %s4898_s27, 4  ;;  %s44_s26 = int_to_ptr.vmem [resolvable:$true] %s43_s26  ;;  %s4988_s28 = int_to_ptr.vmem [resolvable:$true] %s67_s28 }
   0x8   :  { %s4641_s14 = scalar_lea.hbm %s6064_s1, 1024 }
   0x9   :  { %p4642_p0 = scmp.ne.s32.totalorder %s6064_s1, %s4641_s14  ;;  %p4645_p1 = scmp.lt.u32.totalorder %s4641_s14, %s6064_s1 }
   0xb   :  { %p4647_p2 = pnand %p4645_p1, %p4642_p0 }
   0xd   :  { %4650 = shalt.err (!%p4647_p2)
}
   0xe   :  { %s4651_s19 = scalar_lea.vmem %s44_s26, 1024  ;;  %p4656_p4 = scmp.lt.s32.totalorder %s44_s26, %s44_s26 }
   0xf   :  { %p4652_p3 = scmp.ne.s32.totalorder %s44_s26, %s4651_s19  ;;  %p4657_p5 = scmp.lt.s32.totalorder %s4651_s19, %s4651_s19 }
  0x11   :  { %p4658_p6 = por %p4657_p5, %p4656_p4 }
  0x13   :  { %p4659_p7 = pnand %p4658_p6, %p4652_p3 }
  0x15   :  { %4662 = shalt.err (!%p4659_p7)
}
  0x16   :  { %s4899_s20 = smov 128   ;;  %s4900_s21 = smov 8  }
  0x17   :  { %49 = dma.hbm_to_vmem [thread:$0]  %s6064_s1, 1024, %s44_s26, [#allocation8], %s4899_s20, %s4899_s20, %s4900_s21  }
  0x18   :  { %s4663_s27 = scalar_lea.hbm %s6066_s3, 256 }
  0x19   :  { %p4664_p8 = scmp.ne.s32.totalorder %s6066_s3, %s4663_s27  ;;  %p4667_p9 = scmp.lt.u32.totalorder %s4663_s27, %s6066_s3 }
  0x1b   :  { %p4669_p10 = pnand %p4667_p9, %p4664_p8 }
  0x1d   :  { %4672 = shalt.err (!%p4669_p10)
}
  0x1e   :  { %s4673_s16 = scalar_lea.vmem %s4988_s28, 256  ;;  %p4678_p12 = scmp.lt.s32.totalorder %s4988_s28, %s4988_s28 }
  0x1f   :  { %p4674_p11 = scmp.ne.s32.totalorder %s4988_s28, %s4673_s16  ;;  %p4679_p13 = scmp.lt.s32.totalorder %s4673_s16, %s4673_s16 }
  0x21   :  { %p4680_p0 = por %p4679_p13, %p4678_p12 }
  0x23   :  { %p4681_p1 = pnand %p4680_p0, %p4674_p11 }
  0x25   :  { %4684 = shalt.err (!%p4681_p1)
}
  0x26   :  { %73 = dma.hbm_to_vmem [thread:$0]  %s6066_s3, 256, %s4988_s28, [#allocation11], %s4899_s20, %s4899_s20, %s4900_s21  }
  0x27   :  { %s4901_s17 = smov [#allocation13]   ;;  %s4902_s19 = smov [#allocation4]  }
  0x28   :  { %s91_s18 = sshll.u32 %s4901_s17, 4  ;;  %s31_s22 = sshll.u32 %s4902_s19, 4  ;;  %s92_s18 = int_to_ptr.vmem [resolvable:$true] %s91_s18  ;;  %s5025_s22 = int_to_ptr.vmem [resolvable:$true] %s31_s22 }
  0x29   :  { %s4685_s25 = scalar_lea.hbm %s6068_s5, 512 }
  0x2a   :  { %p4686_p2 = scmp.ne.s32.totalorder %s6068_s5, %s4685_s25  ;;  %p4689_p3 = scmp.lt.u32.totalorder %s4685_s25, %s6068_s5 }
  0x2c   :  { %p4691_p4 = pnand %p4689_p3, %p4686_p2 }
  0x2e   :  { %4694 = shalt.err (!%p4691_p4)
}
  0x2f   :  { %s4695_s3 = scalar_lea.vmem %s92_s18, 512  ;;  %p4700_p6 = scmp.lt.s32.totalorder %s92_s18, %s92_s18 }
  0x30   :  { %p4696_p5 = scmp.ne.s32.totalorder %s92_s18, %s4695_s3  ;;  %p4701_p7 = scmp.lt.s32.totalorder %s4695_s3, %s4695_s3 }
  0x32   :  { %p4702_p8 = por %p4701_p7, %p4700_p6 }
  0x34   :  { %p4703_p9 = pnand %p4702_p8, %p4696_p5 }
  0x36   :  { %4706 = shalt.err (!%p4703_p9)
}
  0x37   :  { %97 = dma.hbm_to_vmem [thread:$0]  %s6068_s5, 512, %s92_s18, [#allocation14], %s4899_s20, %s4899_s20, %s4900_s21  }
  0x38   :  { %s4707_s26 = scalar_lea.hbm %s6063_s0, 512 }
  0x39   :  { %p4708_p10 = scmp.ne.s32.totalorder %s6063_s0, %s4707_s26  ;;  %p4711_p11 = scmp.lt.u32.totalorder %s4707_s26, %s6063_s0 }
  0x3b   :  { %p4713_p12 = pnand %p4711_p11, %p4708_p10 }
  0x3d   :  { %4716 = shalt.err (!%p4713_p12)
}
  0x3e   :  { %s4717_s25 = scalar_lea.vmem %s5025_s22, 512  ;;  %p4722_p0 = scmp.lt.s32.totalorder %s5025_s22, %s5025_s22 }
  0x3f   :  { %p4718_p13 = scmp.ne.s32.totalorder %s5025_s22, %s4717_s25  ;;  %p4723_p1 = scmp.lt.s32.totalorder %s4717_s25, %s4717_s25 }
  0x41   :  { %p4724_p2 = por %p4723_p1, %p4722_p0 }
  0x43   :  { %p4725_p3 = pnand %p4724_p2, %p4718_p13 }
  0x45   :  { %4728 = shalt.err (!%p4725_p3)
}
  0x46   :  { %37 = dma.hbm_to_vmem [thread:$0]  %s6063_s0, 512, %s5025_s22, [#allocation5], %s4899_s20, %s4899_s20, %s4900_s21  }
  0x47   :  { %s4903_s27 = smov [#allocation9]   ;;  %s4904_s30 = smov [#allocation12]  }
  0x48   :  { %s55_s29 = sshll.u32 %s4903_s27, 4  ;;  %s79_s14 = sshll.u32 %s4904_s30, 4  ;;  %s56_s29 = int_to_ptr.vmem [resolvable:$true] %s55_s29  ;;  %s5062_s14 = int_to_ptr.vmem [resolvable:$true] %s79_s14 }
  0x49   :  { %s4729_s15 = scalar_lea.hbm %s6065_s2, 256 }
  0x4a   :  { %p4730_p4 = scmp.ne.s32.totalorder %s6065_s2, %s4729_s15  ;;  %p4733_p5 = scmp.lt.u32.totalorder %s4729_s15, %s6065_s2 }
  0x4c   :  { %p4735_p6 = pnand %p4733_p5, %p4730_p4 }
  0x4e   :  { %4738 = shalt.err (!%p4735_p6)
}
  0x4f   :  { %s4739_s0 = scalar_lea.vmem %s56_s29, 256  ;;  %p4744_p8 = scmp.lt.s32.totalorder %s56_s29, %s56_s29 }
  0x50   :  { %p4740_p7 = scmp.ne.s32.totalorder %s56_s29, %s4739_s0  ;;  %p4745_p9 = scmp.lt.s32.totalorder %s4739_s0, %s4739_s0 }
  0x52   :  { %p4746_p10 = por %p4745_p9, %p4744_p8 }
  0x54   :  { %p4747_p11 = pnand %p4746_p10, %p4740_p7 }
  0x56   :  { %4750 = shalt.err (!%p4747_p11)
}
  0x57   :  { %61 = dma.hbm_to_vmem [thread:$0]  %s6065_s2, 256, %s56_s29, [#allocation8], %s4899_s20, %s4899_s20, %s4900_s21  }
  0x58   :  { %s4751_s25 = scalar_lea.hbm %s6067_s4, 512 }
  0x59   :  { %p4752_p12 = scmp.ne.s32.totalorder %s6067_s4, %s4751_s25  ;;  %p4755_p13 = scmp.lt.u32.totalorder %s4751_s25, %s6067_s4 }
  0x5b   :  { %p4757_p0 = pnand %p4755_p13, %p4752_p12 }
  0x5d   :  { %4760 = shalt.err (!%p4757_p0)
}
  0x5e   :  { %s4761_s3 = scalar_lea.vmem %s5062_s14, 512  ;;  %p4766_p2 = scmp.lt.s32.totalorder %s5062_s14, %s5062_s14 }
  0x5f   :  { %p4762_p1 = scmp.ne.s32.totalorder %s5062_s14, %s4761_s3  ;;  %p4767_p3 = scmp.lt.s32.totalorder %s4761_s3, %s4761_s3 }
  0x61   :  { %p4768_p4 = por %p4767_p3, %p4766_p2 }
  0x63   :  { %p4769_p5 = pnand %p4768_p4, %p4762_p1 }
  0x65   :  { %4772 = shalt.err (!%p4769_p5)
}
  0x66   :  { %85 = dma.hbm_to_vmem [thread:$0]  %s6067_s4, 512, %s5062_s14, [#allocation11], %s4899_s20, %s4899_s20, %s4900_s21  }
  0x67   :  { %s4905_s28 = smov [#allocation15]   ;;  %s4906_s16 = smov [#allocation16]  }
  0x68   :  { %s103_s15 = sshll.u32 %s4905_s28, 4  ;;  %s115_s1 = sshll.u32 %s4906_s16, 4  ;;  %s104_s15 = int_to_ptr.vmem [resolvable:$true] %s103_s15  ;;  %s5099_s1 = int_to_ptr.vmem [resolvable:$true] %s115_s1 }
  0x69   :  { %s4773_s0 = scalar_lea.hbm %s6069_s6, 512 }
  0x6a   :  { %p4774_p6 = scmp.ne.s32.totalorder %s6069_s6, %s4773_s0  ;;  %p4777_p7 = scmp.lt.u32.totalorder %s4773_s0, %s6069_s6 }
  0x6c   :  { %p4779_p8 = pnand %p4777_p7, %p4774_p6 }
  0x6e   :  { %4782 = shalt.err (!%p4779_p8)
}
  0x6f   :  { %s4783_s4 = scalar_lea.vmem %s104_s15, 512  ;;  %p4788_p10 = scmp.lt.s32.totalorder %s104_s15, %s104_s15 }
  0x70   :  { %p4784_p9 = scmp.ne.s32.totalorder %s104_s15, %s4783_s4  ;;  %p4789_p11 = scmp.lt.s32.totalorder %s4783_s4, %s4783_s4 }
  0x72   :  { %p4790_p12 = por %p4789_p11, %p4788_p10 }
  0x74   :  { %p4791_p13 = pnand %p4790_p12, %p4784_p9 }
  0x76   :  { %4794 = shalt.err (!%p4791_p13)
}
  0x77   :  { %109 = dma.hbm_to_vmem [thread:$0]  %s6069_s6, 512, %s104_s15, [#allocation14], %s4899_s20, %s4899_s20, %s4900_s21  }
  0x78   :  { %s4795_s27 = scalar_lea.hbm %s6070_s7, 512 }
  0x79   :  { %p4796_p0 = scmp.ne.s32.totalorder %s6070_s7, %s4795_s27  ;;  %p4799_p1 = scmp.lt.u32.totalorder %s4795_s27, %s6070_s7 }
  0x7b   :  { %p4801_p2 = pnand %p4799_p1, %p4796_p0 }
  0x7d   :  { %4804 = shalt.err (!%p4801_p2)
}
  0x7e   :  { %s4805_s28 = scalar_lea.vmem %s5099_s1, 512  ;;  %p4810_p4 = scmp.lt.s32.totalorder %s5099_s1, %s5099_s1 }
  0x7f   :  { %p4806_p3 = scmp.ne.s32.totalorder %s5099_s1, %s4805_s28  ;;  %p4811_p5 = scmp.lt.s32.totalorder %s4805_s28, %s4805_s28 }
  0x81   :  { %p4812_p6 = por %p4811_p5, %p4810_p4 }
  0x83   :  { %p4813_p7 = pnand %p4812_p6, %p4806_p3 }
  0x85   :  { %4816 = shalt.err (!%p4813_p7)
}
  0x86   :  { %121 = dma.hbm_to_vmem [thread:$0]  %s6070_s7, 512, %s5099_s1, [#allocation17], %s4899_s20, %s4899_s20, %s4900_s21  }
  0x87   :  { %4883 = dma.done.wait [#allocation5], 512  }
  0x88   :  { %4884 = vsyncadd [#allocation5], 4294966784 }
  0x89   :  { %4885 = dma.done.wait [#allocation8], 1280  }
  0x8a   :  { %4886 = vsyncadd [#allocation8], 4294966016 }
  0x8b   :  { %4887 = dma.done.wait [#allocation11], 768  }
  0x8c   :  { %4888 = vsyncadd [#allocation11], 4294966528 }
  0x8d   :  { %4889 = dma.done.wait [#allocation14], 1024  }
  0x8e   :  { %4890 = vsyncadd [#allocation14], 4294966272 }
  0x8f   :  { %4891 = dma.done.wait [#allocation17], 512  }
  0x90   :  { %4892 = vsyncadd [#allocation17], 4294966784  ;;  %v206_v0 = vlaneseq  ;;  %v4907_v3 = vmov 1966171168   ;;  %vm180_vm0 = vcmask 261120   ;;  %v179_v6 = vld [vmem:[#allocation9 + $0x8] sm:$0xff] }
  0x91   :  { %v204_v4 = vunpack.c.l.s4 %v4907_v3  ;;  %182 = vst.msk [vmem:[#allocation2 + $0x8] sm:$0xff] %vm180_vm0, %v179_v6  ;;  %v5156_v16 = vld [vmem:[#allocation7] sm:$0xff]  ;;  %v5161_v21 = vld [vmem:[#allocation7 + $0x10] sm:$0xff]  ;;  %v5163_v22 = vld [vmem:[#allocation7 + $0x8] sm:$0xff]  ;;  %vm366_vm1 = vcmask 1041409   ;;  %vm368_vm2 = vcmask 1042434  }
  0x92   :  { %v5136_v1 = vshrl.u32 %v206_v0, 7  ;;  %v333_v2 = vand.u32 127, %v206_v0  ;;  %v5168_v28 = vld [vmem:[#allocation7 + $0x20] sm:$0xff]  ;;  %v5170_v29 = vld [vmem:[#allocation7 + $0x18] sm:$0xff]  ;;  %v5179_v38 = vld [vmem:[#allocation7 + $0x28] sm:$0xff]  ;;  %vm370_vm3 = vcmask 1043459  }
  0x93   :  { %v205_v7 = vunpack.c.0.s8 %v204_v4  ;;  %v5186_v45 = vld [vmem:[#allocation7 + $0x30] sm:$0xff]  ;;  %v5191_v49 = vld [vmem:[#allocation7 + $0x38] sm:$0xff]  ;;  %vm372_vm4 = vcmask 1044484   ;;  %vm374_vm5 = vcmask 1045509   ;;  %vm376_vm6 = vcmask 1046534   ;;  %s4912_s7 = smov 32  }
  0x94   :  { %v5139_v5 = vsub.s32 %v333_v2, %v5136_v1  ;;  %v5150_v11 = vsub.s32 0, %v5136_v1  ;;  %vm378_vm7 = vcmask 1047559   ;;  %vm381_vm8 = vcmask 64512   ;;  %s4913_s16 = smov 64   ;;  %s4915_s30 = smov [#allocation19]  }
  0x95   :  { %v5143_v8 = vsub.s32 %v205_v7, %v5136_v1  ;;  %vm4910_vm9 = vmmov 0   ;;  %s3918_s3 = sshll.u32 %s4915_s30, 4  ;;  %s3919_s3 = int_to_ptr.vmem [resolvable:$true] %s3918_s3 }
  0x96   :  { %s4817_s2 = scalar_lea.vmem %s3919_s3, 256  ;;  %p4822_p9 = scmp.lt.s32.totalorder %s3919_s3, %s3919_s3 }
  0x97   :  { %p4818_p8 = scmp.ne.s32.totalorder %s3919_s3, %s4817_s2  ;;  %p4823_p10 = scmp.lt.s32.totalorder %s4817_s2, %s4817_s2 }
  0x98   :  { %v5145_v9 = vld [vmem:[#allocation2 + $0x8] sm:$0xff] }
  0x99   :  { %v209_v10 = vrot.slane %v5145_v9, %v5143_v8  ;;  %v202_v12 = vcombine.high %v5145_v9, %v5145_v9  ;;  %p4824_p11 = por %p4823_p10, %p4822_p9 }
  0x9b   :  { %v225_v13 = vrot.slane %v209_v10, %v5143_v8  ;;  %v217_v14 = vcombine.high %v209_v10, %v209_v10  ;;  %v216_v15 = vrot.slane %v202_v12, %v5143_v8  ;;  %p4825_p12 = pnand %p4824_p11, %p4818_p8 }
  0x9d   :  { %v254_v17 = vrot.slane %v225_v13, %v5150_v11  ;;  %v247_v18 = vcombine.high %v225_v13, %v225_v13  ;;  %v239_v19 = vrot.slane %v217_v14, %v5143_v8  ;;  %v232_v20 = vrot.slane %v216_v15, %v5143_v8 }
  0x9e   :  { %v218_v23 = vcombine.high %v216_v15, %v216_v15 }
  0x9f   :  { %v291_v24 = vmul.f32 %v254_v17, %v5156_v16  ;;  %v262_v25 = vrot.slane %v247_v18, %v5150_v11  ;;  %v258_v26 = vrot.slane %v239_v19, %v5150_v11  ;;  %v249_v27 = vcombine.high %v239_v19, %v239_v19 }
  0xa0   :  { %v270_v30 = vrot.slane %v232_v20, %v5150_v11  ;;  %v246_v31 = vrot.slane %v218_v23, %v5143_v8  ;;  %v248_v32 = vcombine.high %v232_v20, %v232_v20 }
  0xa1   :  { %v300_v33 = vsel %vm180_vm0, %v291_v24, 0.0  ;;  %v293_v34 = vmul.f32 %v262_v25, %v5161_v21  ;;  %v292_v35 = vmul.f32 %v258_v26, %v5163_v22  ;;  %v266_v36 = vrot.slane %v249_v27, %v5150_v11 }
  0xa2   :  { %301 = vadd.xlane.f32.xlu0 %v300_v33  ;;  %v295_v37 = vmul.f32 %v270_v30, %v5168_v28  ;;  %v274_v39 = vrot.slane %v246_v31, %v5150_v11  ;;  %v250_v40 = vcombine.high %v246_v31, %v246_v31  ;;  %v278_v44 = vrot.slane %v248_v32, %v5150_v11 }
  0xa3   :  { %v306_v41 = vsel %vm180_vm0, %v293_v34, 0.0  ;;  %v303_v42 = vsel %vm180_vm0, %v292_v35, 0.0  ;;  %v294_v43 = vmul.f32 %v266_v36, %v5170_v29  ;;  %v4908_v24 = vmov 0  }
  0xa4   :  { %307 = vadd.xlane.f32.xlu1 %v306_v41  ;;  %v296_v47 = vmul.f32 %v274_v39, %v5179_v38  ;;  %v282_v48 = vrot.slane %v250_v40, %v5150_v11  ;;  %v312_v50 = vsel %vm180_vm0, %v295_v37, 0.0  ;;  %v297_v51 = vmul.f32 %v278_v44, %v5186_v45  ;;  %4461 = vset.pattern.permute.xlu0 %v4908_v24 }
  0xa5   :  { %v309_v46 = vsel %vm180_vm0, %v294_v43, 0.0  ;;  %4460 = vset.pattern.permute.xlu1 %v4908_v24  ;;  %v5216_v25 = vsub.s32 1, %v5136_v1  ;;  %v5219_v26 = vsub.s32 2, %v5136_v1  ;;  %v5222_v27 = vsub.s32 3, %v5136_v1 }
  0xa6   :  { %304 = vadd.xlane.f32.xlu0 %v303_v42  ;;  %v315_v52 = vsel %vm180_vm0, %v296_v47, 0.0  ;;  %v298_v53 = vmul.f32 %v282_v48, %v5191_v49  ;;  %v318_v54 = vsel %vm180_vm0, %v297_v51, 0.0  ;;  %v5228_v36 = vsub.s32 4, %v5136_v1 }
  0xa7   :  { %v5232_v42 = vsub.s32 5, %v5136_v1  ;;  %v5236_v47 = vsub.s32 6, %v5136_v1 }
  0xa8   :  { %310 = vadd.xlane.f32.xlu1 %v309_v46  ;;  %v321_v55 = vsel %vm180_vm0, %v298_v53, 0.0 }
  0xaa   :  { %313 = vadd.xlane.f32.xlu0 %v312_v50 }
  0xac   :  { %316 = vadd.xlane.f32.xlu1 %v315_v52  ;;  %v5240_v52 = vsub.s32 7, %v5136_v1 }
  0xae   :  { %319 = vadd.xlane.f32.xlu0 %v318_v54 }
  0xb0   :  { %322 = vadd.xlane.f32.xlu1 %v321_v55 }
 0x12f   :  { %v302_v56 = vpop.xlane.xlu0 %301 }
 0x130   :  { %v337_v59 = vrot.slane %v302_v56, %v5139_v5 }
 0x131   :  { %v308_v57 = vpop.xlane.xlu1 %307 }
 0x132   :  { %v345_v61 = vrot.slane %v308_v57, %v5139_v5 }
 0x133   :  { %v305_v58 = vpop.xlane.xlu0 %304 }
 0x134   :  { %v341_v60 = vrot.slane %v305_v58, %v5139_v5 }
 0x135   :  { %v311_v62 = vpop.xlane.xlu1 %310 }
 0x136   :  { %v367_v63 = vsel %vm366_vm1, %v341_v60, %v337_v59  ;;  %v349_v0 = vrot.slane %v311_v62, %v5139_v5 }
 0x137   :  { %v369_v2 = vsel %vm368_vm2, %v345_v61, %v367_v63  ;;  %v314_v3 = vpop.xlane.xlu0 %313 }
 0x138   :  { %v371_v4 = vsel %vm370_vm3, %v349_v0, %v369_v2  ;;  %v353_v6 = vrot.slane %v314_v3, %v5139_v5 }
 0x139   :  { %v317_v7 = vpop.xlane.xlu1 %316 }
 0x13a   :  { %v373_v10 = vsel %vm372_vm4, %v353_v6, %v371_v4  ;;  %v357_v12 = vrot.slane %v317_v7, %v5139_v5 }
 0x13b   :  { %v320_v13 = vpop.xlane.xlu0 %319 }
 0x13c   :  { %v361_v14 = vrot.slane %v320_v13, %v5139_v5  ;;  %v375_v15 = vsel %vm374_vm5, %v357_v12, %v373_v10 }
 0x13d   :  { %v323_v17 = vpop.xlane.xlu1 %322 }
 0x13e   :  { %v365_v18 = vrot.slane %v323_v17, %v5139_v5  ;;  %v377_v19 = vsel %vm376_vm6, %v361_v14, %v375_v15 }
 0x140   :  { %v379_v20 = vsel %vm378_vm7, %v365_v18, %v377_v19 }
 0x141   :  { %v382_v23 = vsel %vm381_vm8, %v379_v20, -inf }
 0x142   :  { %383 = vmax.xlane.f32.xlu0 %v382_v23 }
 0x1cf   :  { %v384_v30 = vpop.xlane.xlu0 %383 }
 0x1d0   :  { %v389_v31 = vrot.slane %v384_v30, %v5150_v11  ;;  %v393_v32 = vrot.slane %v384_v30, %v5216_v25  ;;  %v397_v33 = vrot.slane %v384_v30, %v5219_v26  ;;  %v401_v37 = vrot.slane %v384_v30, %v5222_v27 }
 0x1d1   :  { %v405_v43 = vrot.slane %v384_v30, %v5228_v36  ;;  %v409_v48 = vrot.slane %v384_v30, %v5232_v42  ;;  %v413_v53 = vrot.slane %v384_v30, %v5236_v47 }
 0x1d2   :  { %v427_v34 = vsub.f32 %v305_v58, %v393_v32  ;;  %v426_v35 = vsub.f32 %v302_v56, %v389_v31  ;;  %v428_v39 = vsub.f32 %v308_v57, %v397_v33  ;;  %v429_v46 = vsub.f32 %v311_v62, %v401_v37 }
 0x1d3   :  { %v430_v51 = vsub.f32 %v314_v3, %v405_v43  ;;  %v431_v55 = vsub.f32 %v317_v7, %v409_v48  ;;  %v417_v58 = vrot.slane %v384_v30, %v5240_v52  ;;  %v432_v60 = vsub.f32 %v320_v13, %v413_v53 }
 0x1d4   :  { %v436_v40 = vmul.f32 1.442695, %v427_v34  ;;  %v434_v41 = vmul.f32 1.442695, %v426_v35  ;;  %v438_v44 = vmul.f32 1.442695, %v428_v39 }
 0x1d5   :  { %v440_v50 = vmul.f32 1.442695, %v429_v46  ;;  %v442_v54 = vmul.f32 1.442695, %v430_v51  ;;  %v444_v59 = vmul.f32 1.442695, %v431_v55  ;;  %v433_v62 = vsub.f32 %v323_v17, %v417_v58 }
 0x1d6   :  { %4463 = vpow2.f32 %v436_v40  ;;  %v446_v1 = vmul.f32 1.442695, %v432_v60 }
 0x1d7   :  { %4465 = vpow2.f32 %v434_v41  ;;  %v448_v0 = vmul.f32 1.442695, %v433_v62 }
 0x1d8   :  { %4467 = vpow2.f32 %v438_v44 }
 0x1d9   :  { %4469 = vpow2.f32 %v440_v50 }
 0x1da   :  { %4471 = vpow2.f32 %v442_v54 }
 0x1db   :  { %4473 = vpow2.f32 %v444_v59 }
 0x1dc   :  { %4475 = vpow2.f32 %v446_v1 }
 0x1dd   :  { %4477 = vpow2.f32 %v448_v0 }
 0x1e0   :  { %v5243_v56 = vpop.eup %4463 }
 0x1e1   :  { %v4466_v57 = vpop.eup %4465  ;;  %462 = vperm.xlu0 %4461, %v5243_v56  }
 0x1e2   :  { %459 = vperm.xlu1 %4460, %v4466_v57   ;;  %v5247_v61 = vpop.eup %4467 }
 0x1e3   :  { %v5250_v63 = vpop.eup %4469 }
 0x1e4   :  { %v5253_v2 = vpop.eup %4471 }
 0x1e5   :  { %v5256_v3 = vpop.eup %4473 }
 0x1e6   :  { %465 = vperm.xlu1 %4460, %v5247_v61   ;;  %v5259_v4 = vpop.eup %4475 }
 0x1e7   :  { %v5262_v6 = vpop.eup %4477 }
 0x1ea   :  { %468 = vperm.xlu1 %4460, %v5250_v63  }
 0x1ee   :  { %471 = vperm.xlu1 %4460, %v5253_v2  }
 0x1f2   :  { %474 = vperm.xlu1 %4460, %v5256_v3  }
 0x1f6   :  { %477 = vperm.xlu1 %4460, %v5259_v4  }
 0x1fa   :  { %480 = vperm.xlu1 %4460, %v5262_v6  }
 0x260   :  { %v463_v14 = vpop.permute.xlu0 %462 }
 0x261   :  { %v460_v7 = vpop.permute.xlu1 %459  ;;  %v489_v17 = vrot.slane %v463_v14, %v5139_v5 }
 0x262   :  { %v485_v18 = vrot.slane %v460_v7, %v5139_v5 }
 0x264   :  { %v514_v30 = vsel %vm366_vm1, %v489_v17, %v485_v18 }
 0x265   :  { %v466_v10 = vpop.permute.xlu1 %465 }
 0x266   :  { %v493_v19 = vrot.slane %v466_v10, %v5139_v5 }
 0x268   :  { %v515_v32 = vsel %vm368_vm2, %v493_v19, %v514_v30  ;;  %v155_v30 = vld [vmem:[#allocation12 + $0x18] sm:$0xff] }
 0x269   :  { %v469_v12 = vpop.permute.xlu1 %468 }
 0x26a   :  { %v497_v20 = vrot.slane %v469_v12, %v5139_v5 }
 0x26c   :  { %v516_v34 = vsel %vm370_vm3, %v497_v20, %v515_v32  ;;  %v152_v20 = vld [vmem:[#allocation12] sm:$0xff] }
 0x26d   :  { %v472_v13 = vpop.permute.xlu1 %471 }
 0x26e   :  { %v501_v23 = vrot.slane %v472_v13, %v5139_v5 }
 0x270   :  { %v517_v35 = vsel %vm372_vm4, %v501_v23, %v516_v34  ;;  %v154_v23 = vld [vmem:[#allocation12 + $0x10] sm:$0xff] }
 0x271   :  { %v475_v15 = vpop.permute.xlu1 %474 }
 0x272   :  { %v505_v31 = vrot.slane %v475_v15, %v5139_v5 }
 0x274   :  { %v518_v40 = vsel %vm374_vm5, %v505_v31, %v517_v35  ;;  %v183_v31 = vld [vmem:[#allocation10] sm:$0xff] }
 0x275   :  { %v478_v24 = vpop.permute.xlu1 %477  ;;  %185 = vst.msk [vmem:[#allocation3] sm:$0xff] %vm180_vm0, %v183_v31 }
 0x276   :  { %v509_v33 = vrot.slane %v478_v24, %v5139_v5  ;;  %v6077_v24 = vmov 0.0|0.0  }
 0x277   :  { %4295 = vmatprep.subr.bf16.mxu0 %v6077_v24  ;;  %4307 = vmatprep.subr.bf16.mxu1 %v6077_v24 }
 0x278   :  { %v519_v41 = vsel %vm376_vm6, %v509_v33, %v518_v40 }
 0x279   :  { %v481_v37 = vpop.permute.xlu1 %480 }
 0x27a   :  { %v513_v39 = vrot.slane %v481_v37, %v5139_v5 }
 0x27c   :  { %v520_v43 = vsel %vm378_vm7, %v513_v39, %v519_v41  ;;  %v198_v32 = vld [vmem:[#allocation3] sm:$0xff] }
 0x27d   :  { %v522_v44 = vsel %vm381_vm8, %v520_v43, 0.0 }
 0x27e   :  { %523 = vadd.xlane.f32.xlu1 %v522_v44 }
 0x30b   :  { %v524_v46 = vpop.xlane.xlu1 %523 }
 0x30c   :  { %v529_v48 = vrot.slane %v524_v46, %v5150_v11  ;;  %v533_v50 = vrot.slane %v524_v46, %v5216_v25  ;;  %v537_v51 = vrot.slane %v524_v46, %v5219_v26  ;;  %v541_v53 = vrot.slane %v524_v46, %v5222_v27 }
 0x30d   :  { %v545_v55 = vrot.slane %v524_v46, %v5228_v36  ;;  %v549_v60 = vrot.slane %v524_v46, %v5232_v42  ;;  %v553_v0 = vrot.slane %v524_v46, %v5236_v47  ;;  %v557_v12 = vrot.slane %v524_v46, %v5240_v52 }
 0x30e   :  { %4479 = vrcp.f32 %v529_v48 }
 0x30f   :  { %4481 = vrcp.f32 %v533_v50 }
 0x310   :  { %4483 = vrcp.f32 %v537_v51 }
 0x311   :  { %4485 = vrcp.f32 %v541_v53 }
 0x312   :  { %4487 = vrcp.f32 %v545_v55 }
 0x313   :  { %4489 = vrcp.f32 %v549_v60 }
 0x314   :  { %4491 = vrcp.f32 %v553_v0 }
 0x315   :  { %4493 = vrcp.f32 %v557_v12 }
 0x318   :  { %v4480_v54 = vpop.eup %4479 }
 0x319   :  { %v567_v58 = vmul.f32 %v4480_v54, %v4466_v57  ;;  %v4482_v59 = vpop.eup %4481 }
 0x31a   :  { %v569_v1 = vmul.f32 %v4482_v59, %v5243_v56  ;;  %v4484_v62 = vpop.eup %4483 }
 0x31b   :  { %584 = vperm.xlu0 %4461, %v567_v58   ;;  %v571_v7 = vmul.f32 %v4484_v62, %v5247_v61  ;;  %v4486_v10 = vpop.eup %4485 }
 0x31c   :  { %v573_v57 = vmul.f32 %v4486_v10, %v5250_v63  ;;  %v4488_v13 = vpop.eup %4487  ;;  %v153_v63 = vld [vmem:[#allocation12 + $0x8] sm:$0xff] }
 0x31d   :  { %v575_v14 = vmul.f32 %v4488_v13, %v5253_v2  ;;  %v4490_v56 = vpop.eup %4489  ;;  %v5297_v2 = vpack.c.bf16 %v153_v63, %v152_v20 }
 0x31e   :  { %v577_v15 = vmul.f32 %v4490_v56, %v5256_v3  ;;  %v4492_v17 = vpop.eup %4491  ;;  %v4911_v3 = vmov 0.0  }
 0x31f   :  { %589 = vperm.xlu0 %4461, %v569_v1   ;;  %v579_v61 = vmul.f32 %v4492_v17, %v5259_v4  ;;  %v4494_v18 = vpop.eup %4493  ;;  %4083 = vmatprep.mubr.msk.f32.mxu0 %vm4910_vm9, %v4911_v3  ;;  %v5305_v4 = vpack.c.bf16 %v155_v30, %v154_v23 }
 0x320   :  { %v581_v19 = vmul.f32 %v4494_v18, %v5262_v6  ;;  %4105 = vmatprep.mubr.msk.f32.mxu1 %vm4910_vm9, %v4911_v3  ;;  %4297 = vmatpush3.bf16.msra.mxu0 %v5297_v2  ;;  %v178_v6 = vld [vmem:[#allocation9] sm:$0xff] }
 0x321   :  { %4298 = vmatprep.subr.bf16.mxu0 %v6077_v24  ;;  %181 = vst.msk [vmem:[#allocation2] sm:$0xff] %vm180_vm0, %v178_v6 }
 0x323   :  { %594 = vperm.xlu0 %4461, %v571_v7  }
 0x324   :  { %4300 = vmatpush3.bf16.msra.mxu0 %v5305_v4 }
 0x325   :  { %4301 = vmatprep.subr.bf16.mxu0 %v6077_v24 }
 0x327   :  { %599 = vperm.xlu0 %4461, %v573_v57  }
 0x32b   :  { %604 = vperm.xlu0 %4461, %v575_v14  }
 0x32f   :  { %609 = vperm.xlu0 %4461, %v577_v15  }
 0x333   :  { %614 = vperm.xlu0 %4461, %v579_v61  }
 0x337   :  { %619 = vperm.xlu0 %4461, %v581_v19  }
 0x33b   :  { %853 = vrot.lane.b32.xlu0 %v198_v32, %s4912_s7 }
 0x39a   :  { %v585_v33 = vpop.permute.xlu0 %584 }
 0x39b   :  { %v622_v39 = vmul.f32 %v585_v33, %v5156_v16 }
 0x39d   :  { %v630_v46 = vsel %vm180_vm0, %v622_v39, 0.0 }
 0x39e   :  { %v590_v34 = vpop.permute.xlu0 %589  ;;  %v631_v54 = vrot.slane %v630_v46, 4 }
 0x39f   :  { %v623_v35 = vmul.f32 %v590_v34, %v5163_v22 }
 0x3a0   :  { %v632_v0 = vadd.f32 %v631_v54, %v630_v46 }
 0x3a1   :  { %v637_v41 = vsel %vm180_vm0, %v623_v35, 0.0 }
 0x3a2   :  { %v595_v37 = vpop.permute.xlu0 %594  ;;  %v638_v50 = vrot.slane %v637_v41, 4  ;;  %v633_v17 = vrot.slane %v632_v0, 2 }
 0x3a3   :  { %v624_v40 = vmul.f32 %v595_v37, %v5161_v21 }
 0x3a4   :  { %v639_v60 = vadd.f32 %v638_v50, %v637_v41  ;;  %v634_v32 = vadd.f32 %v633_v17, %v632_v0 }
 0x3a5   :  { %v644_v43 = vsel %vm180_vm0, %v624_v40, 0.0 }
 0x3a6   :  { %v600_v44 = vpop.permute.xlu0 %599  ;;  %v645_v51 = vrot.slane %v644_v43, 4  ;;  %v640_v13 = vrot.slane %v639_v60, 2  ;;  %v635_v50 = vrot.slane %v634_v32, 1 }
 0x3a7   :  { %v625_v48 = vmul.f32 %v600_v44, %v5170_v29 }
 0x3a8   :  { %v646_v1 = vadd.f32 %v645_v51, %v644_v43  ;;  %v641_v23 = vadd.f32 %v640_v13, %v639_v60  ;;  %v636_v0 = vadd.f32 %v635_v50, %v634_v32  ;;  %v158_v32 = vld [vmem:[#allocation13 + $0x10] sm:$0xff] }
 0x3a9   :  { %v651_v53 = vsel %vm180_vm0, %v625_v48, 0.0 }
 0x3aa   :  { %v652_v55 = vrot.slane %v651_v53, 4  ;;  %v605_v58 = vpop.permute.xlu0 %604  ;;  %v647_v56 = vrot.slane %v646_v1, 2  ;;  %v642_v41 = vrot.slane %v641_v23, 1 }
 0x3ab   :  { %v626_v59 = vmul.f32 %v605_v58, %v5168_v28 }
 0x3ac   :  { %v653_v7 = vadd.f32 %v652_v55, %v651_v53  ;;  %v648_v6 = vadd.f32 %v647_v56, %v646_v1  ;;  %v643_v58 = vadd.f32 %v642_v41, %v641_v23 }
 0x3ad   :  { %v658_v62 = vsel %vm180_vm0, %v626_v59, 0.0 }
 0x3ae   :  { %v659_v10 = vrot.slane %v658_v62, 4  ;;  %v610_v12 = vpop.permute.xlu0 %609  ;;  %v654_v61 = vrot.slane %v653_v7, 2  ;;  %v649_v46 = vrot.slane %v648_v6, 1  ;;  %v695_v13 = vsel %vm366_vm1, %v643_v58, %v636_v0  ;;  %v163_v0 = vld [vmem:[#allocation15 + $0x18] sm:$0xff] }
 0x3af   :  { %v627_v57 = vmul.f32 %v610_v12, %v5179_v38 }
 0x3b0   :  { %v660_v14 = vadd.f32 %v659_v10, %v658_v62  ;;  %v655_v33 = vadd.f32 %v654_v61, %v653_v7  ;;  %v650_v62 = vadd.f32 %v649_v46, %v648_v6  ;;  %v156_v61 = vld [vmem:[#allocation13] sm:$0xff] }
 0x3b1   :  { %v665_v15 = vsel %vm180_vm0, %v627_v57, 0.0 }
 0x3b2   :  { %v666_v18 = vrot.slane %v665_v15, 4  ;;  %v615_v19 = vpop.permute.xlu0 %614  ;;  %v661_v20 = vrot.slane %v660_v14, 2  ;;  %v656_v51 = vrot.slane %v655_v33, 1 }
 0x3b3   :  { %v628_v63 = vmul.f32 %v615_v19, %v5186_v45 }
 0x3b4   :  { %v667_v30 = vadd.f32 %v666_v18, %v665_v15  ;;  %v662_v39 = vadd.f32 %v661_v20, %v660_v14  ;;  %v657_v7 = vadd.f32 %v656_v51, %v655_v33  ;;  %v696_v15 = vsel %vm368_vm2, %v650_v62, %v695_v13  ;;  %v157_v18 = vld [vmem:[#allocation13 + $0x8] sm:$0xff]  ;;  %v159_v33 = vld [vmem:[#allocation13 + $0x18] sm:$0xff] }
 0x3b5   :  { %v672_v31 = vsel %vm180_vm0, %v628_v63, 0.0  ;;  %v5334_v6 = vpack.c.bf16 %v157_v18, %v156_v61  ;;  %v166_v61 = vld [vmem:[#allocation16 + $0x10] sm:$0xff]  ;;  %v167_v18 = vld [vmem:[#allocation16 + $0x18] sm:$0xff] }
 0x3b6   :  { %v668_v34 = vrot.slane %v667_v30, 2  ;;  %v673_v35 = vrot.slane %v672_v31, 4  ;;  %v620_v37 = vpop.permute.xlu0 %619  ;;  %v663_v55 = vrot.slane %v662_v39, 1  ;;  %v697_v20 = vsel %vm370_vm3, %v657_v7, %v696_v15  ;;  %v165_v15 = vld [vmem:[#allocation16 + $0x8] sm:$0xff] }
 0x3b7   :  { %v629_v40 = vmul.f32 %v620_v37, %v5191_v49  ;;  %v195_v37 = vld [vmem:[#allocation2] sm:$0xff] }
 0x3b8   :  { %v669_v43 = vadd.f32 %v668_v34, %v667_v30  ;;  %v674_v44 = vadd.f32 %v673_v35, %v672_v31  ;;  %v664_v57 = vadd.f32 %v663_v55, %v662_v39  ;;  %v5340_v35 = vpack.c.bf16 %v159_v33, %v158_v32  ;;  %v686_v39 = vld [vmem:[#allocation4] sm:$0xff] }
 0x3b9   :  { %v679_v48 = vsel %vm180_vm0, %v629_v40, 0.0 }
 0x3ba   :  { %v675_v53 = vrot.slane %v674_v44, 2  ;;  %v680_v54 = vrot.slane %v679_v48, 4  ;;  %v670_v59 = vrot.slane %v669_v43, 1  ;;  %v698_v63 = vsel %vm372_vm4, %v664_v57, %v697_v20 }
 0x3bb   :  { %v5374_v20 = vpack.c.bf16 %v167_v18, %v166_v61 }
 0x3bc   :  { %v676_v60 = vadd.f32 %v675_v53, %v674_v44  ;;  %v681_v1 = vadd.f32 %v680_v54, %v679_v48  ;;  %v671_v14 = vadd.f32 %v670_v59, %v669_v43  ;;  %v854_v53 = vpop.permute.xlu0 %853  ;;  %v160_v59 = vld [vmem:[#allocation15] sm:$0xff] }
 0x3be   :  { %v677_v10 = vrot.slane %v676_v60, 1  ;;  %v682_v12 = vrot.slane %v681_v1, 2  ;;  %v699_v30 = vsel %vm374_vm5, %v671_v14, %v698_v63  ;;  %v5392_v63 = vld [vmem:[%s6071_s8] ss:$0 sm:$0xff] }
 0x3c0   :  { %v683_v56 = vadd.f32 %v682_v12, %v681_v1  ;;  %v678_v17 = vadd.f32 %v677_v10, %v676_v60  ;;  %v161_v60 = vld [vmem:[#allocation15 + $0x8] sm:$0xff]  ;;  %v162_v1 = vld [vmem:[#allocation15 + $0x10] sm:$0xff]  ;;  %v184_v12 = vld [vmem:[#allocation10 + $0x8] sm:$0xff] }
 0x3c1   :  { %v5355_v62 = vpack.c.bf16 %v161_v60, %v160_v59  ;;  %v5358_v7 = vpack.c.bf16 %v163_v0, %v162_v1  ;;  %186 = vst.msk [vmem:[#allocation3 + $0x8] sm:$0xff] %vm180_vm0, %v184_v12 }
 0x3c2   :  { %v684_v19 = vrot.slane %v683_v56, 1  ;;  %v700_v31 = vsel %vm376_vm6, %v678_v17, %v699_v30 }
 0x3c3   :  { %4309 = vmatpush3.bf16.msra.mxu1 %v5355_v62 }
 0x3c4   :  { %v685_v23 = vadd.f32 %v684_v19, %v683_v56  ;;  %4310 = vmatprep.subr.bf16.mxu1 %v6077_v24  ;;  %v164_v56 = vld [vmem:[#allocation16] sm:$0xff] }
 0x3c5   :  { %v5367_v17 = vpack.c.bf16 %v165_v15, %v164_v56 }
 0x3c6   :  { %v701_v34 = vsel %vm378_vm7, %v685_v23, %v700_v31 }
 0x3c7   :  { %4084 = vmatmul.mubr.msk.f32.vlgmr.msra.gmra.mrb[0].mxu0 %vm180_vm0, %v701_v34  ;;  %4312 = vmatpush3.bf16.msra.mxu1 %v5358_v7 }
 0x3c8   :  { %4303 = vmatpush3.bf16.msra.mxu0 %v5334_v6  ;;  %4094 = vmatprep.mubr.msk.f32.mxu0 %vm4910_vm9, %v4911_v3  ;;  %v200_v14 = vld [vmem:[#allocation3 + $0x8] sm:$0xff] }
 0x3c9   :  { %4304 = vmatprep.subr.bf16.mxu0 %v6077_v24  ;;  %4313 = vmatprep.subr.bf16.mxu1 %v6077_v24 }
 0x3cc   :  { %4306 = vmatpush3.bf16.msra.mxu0 %v5340_v35 }
 0x3cd   :  { %4319 = vmatprep.subr.bf16.mxu0 %v6077_v24 }
 0x3cf   :  { %4095 = vmatmul.mubr.msk.f32.vlgmr.msra.gmra.mrb[0].mxu0 %vm180_vm0, %v195_v37 }
 0x3d0   :  { %4127 = vmatprep.mubr.msk.f32.mxu0 %vm4910_vm9, %v4911_v3 }
 0x4a2   :  { %v844_v40 = vpop.f32.mrb[0].mxu0 }
 0x4a3   :  { %v4415_v41 = vadd.f32 %v844_v40, %v686_v39  ;;  %v4096_v43 = vpop.f32.mrb[1].mxu0 }
 0x4a5   :  { %4495 = vtanh.f32 %v4415_v41 }
 0x4af   :  { %v4496_v44 = vpop.eup %4495 }
 0x4b0   :  { %858 = vrot.lane.b32.xlu1 %v4496_v44, %s4912_s7  ;;  %v850_v46 = vmul.f32 0.5, %v4496_v44 }
 0x4b2   :  { %v851_v48 = vadd.f32 0.5, %v850_v46 }
 0x4b4   :  { %v856_v54 = vmul.f32 %v854_v53, %v851_v48 }
 0x522   :  { %v859_v50 = vpop.permute.xlu1 %858 }
 0x523   :  { %v861_v51 = vmul.f32 %v859_v50, %v851_v48 }
 0x525   :  { %863 = vrot.lane.b32.xlu0 %v861_v51, %s4912_s7 }
 0x597   :  { %v864_v55 = vpop.permute.xlu0 %863 }
 0x598   :  { %v5352_v58 = vadd.f32 %v864_v55, %v856_v54 }
 0x59a   :  { %4497 = vtanh.f32 %v5352_v58 }
 0x5a4   :  { %v4498_v10 = vpop.eup %4497 }
 0x5a5   :  { %869 = vrot.lane.b32.xlu0 %v4498_v10, %s4912_s7 }
 0x617   :  { %v870_v57 = vpop.permute.xlu0 %869 }
 0x618   :  { %v872_v13 = vmul.f32 %v870_v57, %v851_v48 }
 0x61a   :  { %874 = vrot.lane.b32.xlu0 %v872_v13, %s4913_s16 }
 0x61e   :  { %1032 = vrot.lane.b32.xlu0 %v200_v14, %s4912_s7 }
 0x68c   :  { %v5369_v19 = vpop.permute.xlu0 %874 }
 0x68d   :  { %4106 = vmatmul.mubr.msk.f32.vlgmr.msra.gmra.mrb[0].mxu1 %vm180_vm0, %v5369_v19 }
 0x68e   :  { %4315 = vmatpush3.bf16.msra.mxu1 %v5367_v17  ;;  %4116 = vmatprep.mubr.msk.f32.mxu1 %vm4910_vm9, %v4911_v3 }
 0x68f   :  { %4316 = vmatprep.subr.bf16.mxu1 %v6077_v24 }
 0x690   :  { %v1033_v39 = vpop.permute.xlu0 %1032 }
 0x692   :  { %4318 = vmatpush3.bf16.msra.mxu1 %v5374_v20 }
 0x693   :  { %4325 = vmatprep.subr.bf16.mxu1 %v6077_v24 }
 0x695   :  { %4117 = vmatmul.mubr.msk.f32.vlgmr.msra.gmra.mrb[0].mxu1 %vm180_vm0, %v5145_v9 }
 0x696   :  { %4327 = vmatpush3.bf16.msra.mxu1 %v5297_v2  ;;  %4138 = vmatprep.mubr.msk.f32.mxu1 %vm4910_vm9, %v4911_v3 }
 0x697   :  { %4328 = vmatprep.subr.bf16.mxu1 %v6077_v24 }
 0x69a   :  { %4330 = vmatpush3.bf16.msra.mxu1 %v5305_v4 }
 0x69b   :  { %4331 = vmatprep.subr.bf16.mxu1 %v6077_v24 }
 0x768   :  { %v1023_v23 = vpop.f32.mrb[0].mxu1 }
 0x769   :  { %v4416_v30 = vadd.f32 %v5392_v63, %v1023_v23  ;;  %v4118_v9 = vpop.f32.mrb[1].mxu1 }
 0x76b   :  { %4499 = vtanh.f32 %v4416_v30 }
 0x775   :  { %v4500_v31 = vpop.eup %4499 }
 0x776   :  { %1037 = vrot.lane.b32.xlu1 %v4500_v31, %s4912_s7  ;;  %v1029_v32 = vmul.f32 0.5, %v4500_v31 }
 0x778   :  { %v1030_v33 = vadd.f32 0.5, %v1029_v32 }
 0x77a   :  { %v1035_v40 = vmul.f32 %v1033_v39, %v1030_v33 }
 0x7e8   :  { %v1038_v34 = vpop.permute.xlu1 %1037 }
 0x7e9   :  { %v1040_v37 = vmul.f32 %v1038_v34, %v1030_v33 }
 0x7eb   :  { %1042 = vrot.lane.b32.xlu1 %v1040_v37, %s4912_s7 }
 0x85d   :  { %v1043_v41 = vpop.permute.xlu1 %1042 }
 0x85e   :  { %v5397_v43 = vadd.f32 %v1043_v41, %v1035_v40 }
 0x860   :  { %4501 = vtanh.f32 %v5397_v43 }
 0x86a   :  { %v4502_v44 = vpop.eup %4501 }
 0x86b   :  { %1048 = vrot.lane.b32.xlu0 %v4502_v44, %s4912_s7 }
 0x8dd   :  { %v1049_v46 = vpop.permute.xlu0 %1048 }
 0x8de   :  { %v5401_v48 = vmul.f32 %v1049_v46, %v1030_v33 }
 0x8e0   :  { %v1134_v50 = vcombine.high %v5401_v48, %v5401_v48  ;;  %v1141_v51 = vrot.slane %v5401_v48, %v5143_v8 }
 0x8e2   :  { %v1157_v53 = vrot.slane %v1141_v51, %v5143_v8  ;;  %v1149_v54 = vcombine.high %v1141_v51, %v1141_v51  ;;  %v1148_v55 = vrot.slane %v1134_v50, %v5143_v8 }
 0x8e4   :  { %v1186_v59 = vrot.slane %v1157_v53, %v5150_v11  ;;  %v1171_v60 = vrot.slane %v1149_v54, %v5143_v8  ;;  %v1179_v1 = vcombine.high %v1157_v53, %v1157_v53  ;;  %v1150_v12 = vcombine.high %v1148_v55, %v1148_v55 }
 0x8e5   :  { %v1164_v13 = vrot.slane %v1148_v55, %v5143_v8 }
 0x8e6   :  { %1215 = vrot.lane.b32.xlu1 %v1186_v59, %s4913_s16  ;;  %v1190_v0 = vrot.slane %v1171_v60, %v5150_v11  ;;  %v1181_v10 = vcombine.high %v1171_v60, %v1171_v60  ;;  %v1194_v57 = vrot.slane %v1179_v1, %v5150_v11  ;;  %v1178_v56 = vrot.slane %v1150_v12, %v5143_v8 }
 0x8e7   :  { %v1202_v15 = vrot.slane %v1164_v13, %v5150_v11  ;;  %v1180_v61 = vcombine.high %v1164_v13, %v1164_v13 }
 0x8e8   :  { %1217 = vrot.lane.b32.xlu0 %v1190_v0, %s4913_s16  ;;  %v1198_v14 = vrot.slane %v1181_v10, %v5150_v11  ;;  %v1206_v18 = vrot.slane %v1178_v56, %v5150_v11  ;;  %v1182_v23 = vcombine.high %v1178_v56, %v1178_v56 }
 0x8e9   :  { %v1210_v30 = vrot.slane %v1180_v61, %v5150_v11 }
 0x8ea   :  { %1219 = vrot.lane.b32.xlu1 %v1194_v57, %s4913_s16  ;;  %v1214_v9 = vrot.slane %v1182_v23, %v5150_v11 }
 0x8ec   :  { %1221 = vrot.lane.b32.xlu0 %v1198_v14, %s4913_s16 }
 0x8ee   :  { %1223 = vrot.lane.b32.xlu1 %v1202_v15, %s4913_s16 }
 0x8f0   :  { %1225 = vrot.lane.b32.xlu0 %v1206_v18, %s4913_s16 }
 0x8f2   :  { %1227 = vrot.lane.b32.xlu1 %v1210_v30, %s4913_s16 }
 0x8f4   :  { %1229 = vrot.lane.b32.xlu0 %v1214_v9, %s4913_s16 }
 0x958   :  { %v1216_v31 = vpop.permute.xlu1 %1215 }
 0x959   :  { %v1239_v32 = vmul.f32 %v1216_v31, %v5156_v16 }
 0x95a   :  { %v1218_v33 = vpop.permute.xlu0 %1217 }
 0x95b   :  { %v1240_v34 = vmul.f32 %v1218_v33, %v5163_v22  ;;  %v1247_v37 = vsel %vm180_vm0, %v1239_v32, 0.0 }
 0x95c   :  { %v1220_v39 = vpop.permute.xlu1 %1219  ;;  %1248 = vadd.xlane.f32.xlu1 %v1247_v37 }
 0x95d   :  { %v1241_v40 = vmul.f32 %v1220_v39, %v5161_v21  ;;  %v1250_v41 = vsel %vm180_vm0, %v1240_v34, 0.0 }
 0x95e   :  { %v1222_v44 = vpop.permute.xlu0 %1221  ;;  %1251 = vadd.xlane.f32.xlu0 %v1250_v41 }
 0x95f   :  { %v1242_v46 = vmul.f32 %v1222_v44, %v5170_v29  ;;  %v1253_v53 = vsel %vm180_vm0, %v1241_v40, 0.0 }
 0x960   :  { %v1224_v50 = vpop.permute.xlu1 %1223 }
 0x961   :  { %v1243_v51 = vmul.f32 %v1224_v50, %v5168_v28  ;;  %v1256_v16 = vsel %vm180_vm0, %v1242_v46, 0.0 }
 0x962   :  { %1257 = vadd.xlane.f32.xlu1 %v1256_v16  ;;  %v1226_v22 = vpop.permute.xlu0 %1225  ;;  %1254 = vadd.xlane.f32.xlu0 %v1253_v53 }
 0x963   :  { %v1244_v54 = vmul.f32 %v1226_v22, %v5179_v38  ;;  %v1259_v60 = vsel %vm180_vm0, %v1243_v51, 0.0 }
 0x964   :  { %v1228_v55 = vpop.permute.xlu1 %1227 }
 0x965   :  { %v1245_v21 = vmul.f32 %v1228_v55, %v5186_v45  ;;  %v1262_v59 = vsel %vm180_vm0, %v1244_v54, 0.0 }
 0x966   :  { %1263 = vadd.xlane.f32.xlu1 %v1262_v59  ;;  %1260 = vadd.xlane.f32.xlu0 %v1259_v60  ;;  %v1230_v29 = vpop.permute.xlu0 %1229 }
 0x967   :  { %v1246_v28 = vmul.f32 %v1230_v29, %v5191_v49  ;;  %v1265_v1 = vsel %vm180_vm0, %v1245_v21, 0.0 }
 0x969   :  { %v1268_v0 = vsel %vm180_vm0, %v1246_v28, 0.0 }
 0x96a   :  { %1266 = vadd.xlane.f32.xlu0 %v1265_v1  ;;  %1269 = vadd.xlane.f32.xlu1 %v1268_v0 }
 0x9e9   :  { %v1249_v10 = vpop.xlane.xlu1 %1248 }
 0x9ea   :  { %v1282_v45 = vrot.slane %v1249_v10, %v5139_v5 }
 0x9eb   :  { %v1252_v38 = vpop.xlane.xlu0 %1251 }
 0x9ec   :  { %v1286_v12 = vrot.slane %v1252_v38, %v5139_v5 }
 0x9ee   :  { %v1311_v56 = vsel %vm366_vm1, %v1286_v12, %v1282_v45 }
 0x9ef   :  { %v1258_v57 = vpop.xlane.xlu1 %1257  ;;  %v1255_v13 = vpop.xlane.xlu0 %1254 }
 0x9f0   :  { %v1290_v14 = vrot.slane %v1255_v13, %v5139_v5  ;;  %v1294_v49 = vrot.slane %v1258_v57, %v5139_v5 }
 0x9f2   :  { %v1312_v15 = vsel %vm368_vm2, %v1290_v14, %v1311_v56 }
 0x9f3   :  { %v1264_v61 = vpop.xlane.xlu1 %1263  ;;  %v1261_v18 = vpop.xlane.xlu0 %1260  ;;  %v1313_v9 = vsel %vm370_vm3, %v1294_v49, %v1312_v15 }
 0x9f4   :  { %v1298_v23 = vrot.slane %v1261_v18, %v5139_v5  ;;  %v1302_v30 = vrot.slane %v1264_v61, %v5139_v5 }
 0x9f6   :  { %v1314_v31 = vsel %vm372_vm4, %v1298_v23, %v1313_v9 }
 0x9f7   :  { %v1270_v32 = vpop.xlane.xlu1 %1269  ;;  %v1267_v33 = vpop.xlane.xlu0 %1266  ;;  %v1315_v39 = vsel %vm374_vm5, %v1302_v30, %v1314_v31 }
 0x9f8   :  { %v1310_v34 = vrot.slane %v1270_v32, %v5139_v5  ;;  %v1306_v37 = vrot.slane %v1267_v33, %v5139_v5 }
 0x9fa   :  { %v1316_v40 = vsel %vm376_vm6, %v1306_v37, %v1315_v39 }
 0x9fb   :  { %v1317_v41 = vsel %vm378_vm7, %v1310_v34, %v1316_v40 }
 0x9fc   :  { %v1319_v44 = vsel %vm381_vm8, %v1317_v41, -inf }
 0x9fd   :  { %1320 = vmax.xlane.f32.xlu0 %v1319_v44 }
 0xa8a   :  { %v1321_v46 = vpop.xlane.xlu0 %1320 }
 0xa8b   :  { %v1326_v50 = vrot.slane %v1321_v46, %v5150_v11  ;;  %v1330_v51 = vrot.slane %v1321_v46, %v5216_v25  ;;  %v1334_v16 = vrot.slane %v1321_v46, %v5219_v26  ;;  %v1342_v53 = vrot.slane %v1321_v46, %v5228_v36 }
 0xa8c   :  { %v1350_v22 = vrot.slane %v1321_v46, %v5236_v47  ;;  %v1338_v21 = vrot.slane %v1321_v46, %v5222_v27  ;;  %v1346_v12 = vrot.slane %v1321_v46, %v5232_v42  ;;  %v1354_v49 = vrot.slane %v1321_v46, %v5240_v52 }
 0xa8d   :  { %v1364_v54 = vsub.f32 %v1252_v38, %v1330_v51  ;;  %v1363_v55 = vsub.f32 %v1249_v10, %v1326_v50  ;;  %v1367_v59 = vsub.f32 %v1261_v18, %v1342_v53  ;;  %v1365_v60 = vsub.f32 %v1255_v13, %v1334_v16 }
 0xa8e   :  { %v1369_v0 = vsub.f32 %v1267_v33, %v1350_v22  ;;  %v1366_v14 = vsub.f32 %v1258_v57, %v1338_v21  ;;  %v1368_v38 = vsub.f32 %v1264_v61, %v1346_v12  ;;  %v1370_v15 = vsub.f32 %v1270_v32, %v1354_v49 }
 0xa8f   :  { %v1373_v29 = vmul.f32 1.442695, %v1364_v54  ;;  %v1371_v28 = vmul.f32 1.442695, %v1363_v55  ;;  %v1379_v1 = vmul.f32 1.442695, %v1367_v59 }
 0xa90   :  { %v1375_v45 = vmul.f32 1.442695, %v1365_v60  ;;  %v1383_v56 = vmul.f32 1.442695, %v1369_v0  ;;  %v1377_v10 = vmul.f32 1.442695, %v1366_v14 }
 0xa91   :  { %4503 = vpow2.f32 %v1373_v29  ;;  %v1381_v13 = vmul.f32 1.442695, %v1368_v38  ;;  %v1385_v30 = vmul.f32 1.442695, %v1370_v15 }
 0xa92   :  { %4505 = vpow2.f32 %v1371_v28 }
 0xa93   :  { %4507 = vpow2.f32 %v1379_v1 }
 0xa94   :  { %4509 = vpow2.f32 %v1375_v45 }
 0xa95   :  { %4511 = vpow2.f32 %v1383_v56 }
 0xa96   :  { %4513 = vpow2.f32 %v1377_v10 }
 0xa97   :  { %4515 = vpow2.f32 %v1381_v13 }
 0xa98   :  { %4517 = vpow2.f32 %v1385_v30 }
 0xa9b   :  { %v4504_v18 = vpop.eup %4503 }
 0xa9c   :  { %v4506_v23 = vpop.eup %4505  ;;  %1399 = vperm.xlu0 %4461, %v4504_v18  }
 0xa9d   :  { %1396 = vperm.xlu1 %4460, %v4506_v23   ;;  %v5468_v9 = vpop.eup %4507 }
 0xa9e   :  { %v4510_v57 = vpop.eup %4509 }
 0xa9f   :  { %v5471_v31 = vpop.eup %4511 }
 0xaa0   :  { %1408 = vperm.xlu0 %4461, %v5468_v9   ;;  %v4514_v61 = vpop.eup %4513 }
 0xaa1   :  { %1402 = vperm.xlu1 %4460, %v4510_v57   ;;  %v4516_v32 = vpop.eup %4515 }
 0xaa2   :  { %v5474_v33 = vpop.eup %4517 }
 0xaa4   :  { %1414 = vperm.xlu0 %4461, %v5471_v31  }
 0xaa5   :  { %1405 = vperm.xlu1 %4460, %v4514_v61  }
 0xaa9   :  { %1411 = vperm.xlu1 %4460, %v4516_v32  }
 0xaad   :  { %1417 = vperm.xlu1 %4460, %v5474_v33  }
 0xb1b   :  { %v1400_v37 = vpop.permute.xlu0 %1399 }
 0xb1c   :  { %v1397_v34 = vpop.permute.xlu1 %1396  ;;  %v1426_v40 = vrot.slane %v1400_v37, %v5139_v5 }
 0xb1d   :  { %v1422_v41 = vrot.slane %v1397_v34, %v5139_v5 }
 0xb1f   :  { %v1409_v46 = vpop.permute.xlu0 %1408  ;;  %v1451_v51 = vsel %vm366_vm1, %v1426_v40, %v1422_v41 }
 0xb20   :  { %v1403_v39 = vpop.permute.xlu1 %1402  ;;  %v1438_v54 = vrot.slane %v1409_v46, %v5139_v5 }
 0xb21   :  { %v1430_v44 = vrot.slane %v1403_v39, %v5139_v5 }
 0xb23   :  { %v1452_v53 = vsel %vm368_vm2, %v1430_v44, %v1451_v51  ;;  %v1415_v21 = vpop.permute.xlu0 %1414 }
 0xb24   :  { %v1406_v50 = vpop.permute.xlu1 %1405  ;;  %v1446_v28 = vrot.slane %v1415_v21, %v5139_v5 }
 0xb25   :  { %v1434_v16 = vrot.slane %v1406_v50, %v5139_v5 }
 0xb27   :  { %v1453_v22 = vsel %vm370_vm3, %v1434_v16, %v1452_v53 }
 0xb28   :  { %v1412_v55 = vpop.permute.xlu1 %1411  ;;  %v1454_v60 = vsel %vm372_vm4, %v1438_v54, %v1453_v22 }
 0xb29   :  { %v1442_v59 = vrot.slane %v1412_v55, %v5139_v5 }
 0xb2b   :  { %v1455_v29 = vsel %vm374_vm5, %v1442_v59, %v1454_v60 }
 0xb2c   :  { %v1418_v1 = vpop.permute.xlu1 %1417  ;;  %v1456_v12 = vsel %vm376_vm6, %v1446_v28, %v1455_v29 }
 0xb2d   :  { %v1450_v0 = vrot.slane %v1418_v1, %v5139_v5  ;;  %v5510_v1 = vld [vmem:[#allocation7 + $0x10] sm:$0xff] }
 0xb2f   :  { %v1457_v45 = vsel %vm378_vm7, %v1450_v0, %v1456_v12 }
 0xb30   :  { %v1459_v14 = vsel %vm381_vm8, %v1457_v45, 0.0 }
 0xb31   :  { %1460 = vadd.xlane.f32.xlu0 %v1459_v14  ;;  %v5516_v14 = vld [vmem:[#allocation7 + $0x18] sm:$0xff] }
 0xbbe   :  { %v1461_v56 = vpop.xlane.xlu0 %1460 }
 0xbbf   :  { %v1466_v49 = vrot.slane %v1461_v56, %v5150_v11  ;;  %v1470_v10 = vrot.slane %v1461_v56, %v5216_v25  ;;  %v1474_v38 = vrot.slane %v1461_v56, %v5219_v26  ;;  %v1478_v13 = vrot.slane %v1461_v56, %v5222_v27 }
 0xbc0   :  { %v1482_v30 = vrot.slane %v1461_v56, %v5228_v36  ;;  %v1486_v39 = vrot.slane %v1461_v56, %v5232_v42  ;;  %v1490_v44 = vrot.slane %v1461_v56, %v5236_v47  ;;  %v1494_v51 = vrot.slane %v1461_v56, %v5240_v52 }
 0xbc1   :  { %4519 = vrcp.f32 %v1466_v49 }
 0xbc2   :  { %4521 = vrcp.f32 %v1470_v10 }
 0xbc3   :  { %4523 = vrcp.f32 %v1474_v38 }
 0xbc4   :  { %4525 = vrcp.f32 %v1478_v13 }
 0xbc5   :  { %4527 = vrcp.f32 %v1482_v30 }
 0xbc6   :  { %4529 = vrcp.f32 %v1486_v39 }
 0xbc7   :  { %4531 = vrcp.f32 %v1490_v44 }
 0xbc8   :  { %4533 = vrcp.f32 %v1494_v51 }
 0xbcb   :  { %v4520_v15 = vpop.eup %4519 }
 0xbcc   :  { %v1504_v34 = vmul.f32 %v4520_v15, %v4506_v23  ;;  %v4522_v37 = vpop.eup %4521 }
 0xbcd   :  { %v1506_v40 = vmul.f32 %v4522_v37, %v4504_v18  ;;  %v4524_v41 = vpop.eup %4523 }
 0xbce   :  { %1521 = vperm.xlu1 %4460, %v1504_v34   ;;  %v1508_v46 = vmul.f32 %v4524_v41, %v4510_v57  ;;  %v4526_v50 = vpop.eup %4525  ;;  %v5520_v34 = vld [vmem:[#allocation7 + $0x20] sm:$0xff] }
 0xbcf   :  { %v1510_v16 = vmul.f32 %v4526_v50, %v4514_v61  ;;  %v4528_v53 = vpop.eup %4527  ;;  %v5504_v61 = vld [vmem:[#allocation7 + $0x8] sm:$0xff] }
 0xbd0   :  { %v1512_v23 = vmul.f32 %v4528_v53, %v5468_v9  ;;  %v4530_v22 = vpop.eup %4529  ;;  %v5507_v9 = vld [vmem:[#allocation7] sm:$0xff] }
 0xbd1   :  { %v1514_v18 = vmul.f32 %v4530_v22, %v4516_v32  ;;  %v4532_v54 = vpop.eup %4531 }
 0xbd2   :  { %1526 = vperm.xlu1 %4460, %v1506_v40   ;;  %v1516_v55 = vmul.f32 %v4532_v54, %v5471_v31  ;;  %v4534_v21 = vpop.eup %4533 }
 0xbd3   :  { %v1518_v57 = vmul.f32 %v4534_v21, %v5474_v33 }
 0xbd6   :  { %1531 = vperm.xlu1 %4460, %v1508_v46  }
 0xbda   :  { %1536 = vperm.xlu1 %4460, %v1510_v16   ;;  %v5524_v16 = vld [vmem:[#allocation7 + $0x28] sm:$0xff] }
 0xbde   :  { %1541 = vperm.xlu1 %4460, %v1512_v23  }
 0xbe2   :  { %1546 = vperm.xlu1 %4460, %v1514_v18  }
 0xbe6   :  { %1551 = vperm.xlu1 %4460, %v1516_v55  }
 0xbea   :  { %1556 = vperm.xlu1 %4460, %v1518_v57  }
 0xc4d   :  { %v1522_v59 = vpop.permute.xlu1 %1521 }
 0xc4e   :  { %v1559_v32 = vmul.f32 %v5507_v9, %v1522_v59 }
 0xc50   :  { %v1567_v45 = vsel %vm180_vm0, %v1559_v32, 0.0 }
 0xc51   :  { %v1527_v60 = vpop.permute.xlu1 %1526  ;;  %v1568_v13 = vrot.slane %v1567_v45, 4 }
 0xc52   :  { %v1560_v29 = vmul.f32 %v5504_v61, %v1527_v60 }
 0xc53   :  { %v1569_v44 = vadd.f32 %v1568_v13, %v1567_v45  ;;  %v5532_v13 = vld [vmem:[#allocation7 + $0x38] sm:$0xff] }
 0xc54   :  { %v1574_v0 = vsel %vm180_vm0, %v1560_v29, 0.0  ;;  %v5528_v29 = vld [vmem:[#allocation7 + $0x30] sm:$0xff] }
 0xc55   :  { %v1532_v28 = vpop.permute.xlu1 %1531  ;;  %v1575_v49 = vrot.slane %v1574_v0, 4  ;;  %v1570_v55 = vrot.slane %v1569_v44, 2 }
 0xc56   :  { %v1561_v31 = vmul.f32 %v5510_v1, %v1532_v28 }
 0xc57   :  { %v1576_v39 = vadd.f32 %v1575_v49, %v1574_v0 }
 0xc58   :  { %v1581_v33 = vsel %vm180_vm0, %v1561_v31, 0.0 }
 0xc59   :  { %v1537_v12 = vpop.permute.xlu1 %1536  ;;  %v1582_v10 = vrot.slane %v1581_v33, 4  ;;  %v1577_v23 = vrot.slane %v1576_v39, 2 }
 0xc5a   :  { %v1562_v56 = vmul.f32 %v5516_v14, %v1537_v12  ;;  %v1571_v12 = vadd.f32 %v1570_v55, %v1569_v44 }
 0xc5b   :  { %v1583_v40 = vadd.f32 %v1582_v10, %v1581_v33  ;;  %v1578_v32 = vadd.f32 %v1577_v23, %v1576_v39 }
 0xc5c   :  { %v1588_v38 = vsel %vm180_vm0, %v1562_v56, 0.0 }
 0xc5d   :  { %v1589_v15 = vrot.slane %v1588_v38, 4  ;;  %v1542_v30 = vpop.permute.xlu1 %1541  ;;  %v1584_v18 = vrot.slane %v1583_v40, 2 }
 0xc5e   :  { %v1563_v37 = vmul.f32 %v5520_v34, %v1542_v30  ;;  %v1579_v30 = vrot.slane %v1578_v32, 1 }
 0xc5f   :  { %v1590_v46 = vadd.f32 %v1589_v15, %v1588_v38  ;;  %v1585_v0 = vadd.f32 %v1584_v18, %v1583_v40 }
 0xc60   :  { %v1595_v41 = vsel %vm180_vm0, %v1563_v37, 0.0 }
 0xc61   :  { %v1596_v50 = vrot.slane %v1595_v41, 4  ;;  %v1547_v51 = vpop.permute.xlu1 %1546  ;;  %v1591_v21 = vrot.slane %v1590_v46, 2 }
 0xc62   :  { %v1564_v53 = vmul.f32 %v5524_v16, %v1547_v51  ;;  %v1572_v51 = vrot.slane %v1571_v12, 1 }
 0xc63   :  { %v1597_v22 = vadd.f32 %v1596_v50, %v1595_v41  ;;  %v1592_v45 = vadd.f32 %v1591_v21, %v1590_v46  ;;  %v1586_v50 = vrot.slane %v1585_v0, 1  ;;  %v1580_v46 = vadd.f32 %v1579_v30, %v1578_v32 }
 0xc64   :  { %v1602_v54 = vsel %vm180_vm0, %v1564_v53, 0.0  ;;  %v1573_v21 = vadd.f32 %v1572_v51, %v1571_v12 }
 0xc65   :  { %v1603_v57 = vrot.slane %v1602_v54, 4  ;;  %v1552_v59 = vpop.permute.xlu1 %1551  ;;  %v1598_v60 = vrot.slane %v1597_v22, 2  ;;  %v1593_v40 = vrot.slane %v1592_v45, 1 }
 0xc66   :  { %v1565_v28 = vmul.f32 %v5528_v29, %v1552_v59 }
 0xc67   :  { %v1604_v31 = vadd.f32 %v1603_v57, %v1602_v54  ;;  %v1599_v38 = vadd.f32 %v1598_v60, %v1597_v22  ;;  %v1587_v22 = vadd.f32 %v1586_v50, %v1585_v0  ;;  %v1594_v57 = vadd.f32 %v1593_v40, %v1592_v45 }
 0xc68   :  { %v1609_v33 = vsel %vm180_vm0, %v1565_v28, 0.0 }
 0xc69   :  { %v1605_v56 = vrot.slane %v1604_v31, 2  ;;  %v1610_v49 = vrot.slane %v1609_v33, 4  ;;  %v1557_v10 = vpop.permute.xlu1 %1556  ;;  %v1600_v44 = vrot.slane %v1599_v38, 1 }
 0xc6a   :  { %v1566_v15 = vmul.f32 %v5532_v13, %v1557_v10 }
 0xc6b   :  { %v1606_v37 = vadd.f32 %v1605_v56, %v1604_v31  ;;  %v1611_v41 = vadd.f32 %v1610_v49, %v1609_v33  ;;  %v1601_v28 = vadd.f32 %v1600_v44, %v1599_v38  ;;  %v1633_v31 = vsel %vm366_vm1, %v1580_v46, %v1573_v21  ;;  %v170_v44 = vld [vmem:[%s6072_s9 + $0x8] sm:$0xff]  ;;  %v172_v21 = vld [vmem:[%s6072_s9 + $0x18] sm:$0xff] }
 0xc6c   :  { %v1616_v39 = vsel %vm180_vm0, %v1566_v15, 0.0  ;;  %v1634_v49 = vsel %vm368_vm2, %v1587_v22, %v1633_v31  ;;  %v6079_v38 = vmov 0.0|0.0   ;;  %v171_v22 = vld [vmem:[%s6072_s9 + $0x10] sm:$0xff] }
 0xc6d   :  { %v1612_v53 = vrot.slane %v1611_v41, 2  ;;  %v1617_v23 = vrot.slane %v1616_v39, 4  ;;  %v1607_v18 = vrot.slane %v1606_v37, 1  ;;  %v1635_v15 = vsel %vm370_vm3, %v1594_v57, %v1634_v49 }
 0xc6e   :  { %v1636_v32 = vsel %vm372_vm4, %v1601_v28, %v1635_v15  ;;  %v5577_v57 = vpack.c.bf16 %v172_v21, %v171_v22 }
 0xc6f   :  { %v1613_v54 = vadd.f32 %v1612_v53, %v1611_v41  ;;  %v1618_v55 = vadd.f32 %v1617_v23, %v1616_v39  ;;  %v1608_v33 = vadd.f32 %v1607_v18, %v1606_v37 }
 0xc71   :  { %v1614_v59 = vrot.slane %v1613_v54, 1  ;;  %v1619_v60 = vrot.slane %v1618_v55, 2  ;;  %v1637_v0 = vsel %vm374_vm5, %v1608_v33, %v1636_v32 }
 0xc73   :  { %v1620_v56 = vadd.f32 %v1619_v60, %v1618_v55  ;;  %v1615_v10 = vadd.f32 %v1614_v59, %v1613_v54 }
 0xc75   :  { %v1621_v24 = vrot.slane %v1620_v56, 1  ;;  %v1638_v12 = vsel %vm376_vm6, %v1615_v10, %v1637_v0 }
 0xc77   :  { %v1622_v30 = vadd.f32 %v1621_v24, %v1620_v56  ;;  %v1624_v24 = vld [vmem:[#allocation4 + $0x8] sm:$0xff] }
 0xc79   :  { %v1639_v45 = vsel %vm378_vm7, %v1622_v30, %v1638_v12 }
 0xc7a   :  { %4139 = vmatmul.mubr.msk.f32.vlgmr.msra.gmra.mrb[2].mxu1 %vm180_vm0, %v1639_v45 }
 0xc7b   :  { %4333 = vmatpush3.bf16.msra.mxu1 %v5334_v6  ;;  %4149 = vmatprep.mubr.msk.f32.mxu1 %vm4910_vm9, %v4911_v3 }
 0xc7c   :  { %4334 = vmatprep.subr.bf16.mxu1 %v6079_v38 }
 0xc7f   :  { %4336 = vmatpush3.bf16.msra.mxu1 %v5340_v35 }
 0xc80   :  { %4349 = vmatprep.subr.bf16.mxu1 %v6079_v38 }
 0xc82   :  { %4150 = vmatmul.mubr.msk.f32.vlgmr.msra.gmra.mrb[2].mxu1 %vm180_vm0, %v5369_v19  ;;  %v169_v19 = vld [vmem:[%s6072_s9] sm:$0xff] }
 0xc83   :  { %4182 = vmatprep.mubr.msk.f32.mxu1 %vm4910_vm9, %v4911_v3  ;;  %v5562_v46 = vpack.c.bf16 %v170_v44, %v169_v19 }
 0xc85   :  { %4321 = vmatpush3.bf16.msra.mxu0 %v5562_v46  ;;  %4351 = vmatpush3.bf16.msra.mxu1 %v5562_v46 }
 0xc86   :  { %4322 = vmatprep.subr.bf16.mxu0 %v6079_v38  ;;  %4352 = vmatprep.subr.bf16.mxu1 %v6079_v38 }
 0xc89   :  { %4324 = vmatpush3.bf16.msra.mxu0 %v5577_v57  ;;  %4354 = vmatpush3.bf16.msra.mxu1 %v5577_v57 }
 0xc8a   :  { %4337 = vmatprep.subr.bf16.mxu0 %v6079_v38  ;;  %4367 = vmatprep.subr.bf16.mxu1 %v6079_v38 }
 0xd55   :  { %v1779_v37 = vpop.f32.mrb[2].mxu1 }
 0xd56   :  { %v4417_v41 = vadd.f32 %v1779_v37, %v1624_v24  ;;  %v4151_v50 = vpop.f32.mrb[3].mxu1 }
 0xd58   :  { %4535 = vtanh.f32 %v4417_v41 }
 0xd62   :  { %v4536_v39 = vpop.eup %4535 }
 0xd63   :  { %1789 = vrot.lane.b32.xlu0 %v4536_v39, %s4912_s7  ;;  %v1785_v51 = vmul.f32 0.5, %v4536_v39 }
 0xd65   :  { %v1786_v40 = vadd.f32 0.5, %v1785_v51 }
 0xd67   :  { %v1787_v18 = vmul.f32 %v1786_v40, %v5352_v58 }
 0xdd5   :  { %v1790_v53 = vpop.permute.xlu0 %1789 }
 0xdd6   :  { %v1792_v23 = vmul.f32 %v1790_v53, %v1786_v40 }
 0xdd8   :  { %1794 = vrot.lane.b32.xlu1 %v1792_v23, %s4912_s7 }
 0xe4a   :  { %v1795_v54 = vpop.permute.xlu1 %1794 }
 0xe4b   :  { %v5569_v55 = vadd.f32 %v1795_v54, %v1787_v18 }
 0xe4d   :  { %4537 = vtanh.f32 %v5569_v55 }
 0xe57   :  { %v4538_v58 = vpop.eup %4537 }
 0xe58   :  { %1800 = vrot.lane.b32.xlu1 %v4538_v58, %s4912_s7 }
 0xe5c   :  { %1059 = vrot.lane.b32.xlu1 %v5401_v48, %s4913_s16  ;;  %v5615_v48 = vld [vmem:[%s6073_s10] ss:$0 sm:$0xff] }
 0xeca   :  { %v1801_v59 = vpop.permute.xlu1 %1800 }
 0xecb   :  { %v1803_v60 = vmul.f32 %v1801_v59, %v1786_v40 }
 0xecd   :  { %1805 = vrot.lane.b32.xlu1 %v1803_v60, %s4913_s16 }
 0xece   :  { %v1060_v28 = vpop.permute.xlu1 %1059 }
 0xecf   :  { %4128 = vmatmul.mubr.msk.f32.vlgmr.msra.gmra.mrb[2].mxu0 %vm180_vm0, %v1060_v28 }
 0xed0   :  { %4339 = vmatpush3.bf16.msra.mxu0 %v5355_v62  ;;  %4160 = vmatprep.mubr.msk.f32.mxu0 %vm4910_vm9, %v4911_v3 }
 0xed1   :  { %4340 = vmatprep.subr.bf16.mxu0 %v6079_v38 }
 0xed4   :  { %4342 = vmatpush3.bf16.msra.mxu0 %v5358_v7 }
 0xed5   :  { %4343 = vmatprep.subr.bf16.mxu0 %v6079_v38 }
 0xf3f   :  { %v5595_v31 = vpop.permute.xlu1 %1805 }
 0xf40   :  { %4161 = vmatmul.mubr.msk.f32.vlgmr.msra.gmra.mrb[4].mxu0 %vm180_vm0, %v5595_v31 }
 0xf41   :  { %4345 = vmatpush3.bf16.msra.mxu0 %v5367_v17  ;;  %4171 = vmatprep.mubr.msk.f32.mxu0 %vm4910_vm9, %v4911_v3 }
 0xf42   :  { %4346 = vmatprep.subr.bf16.mxu0 %v6079_v38 }
 0xf45   :  { %4348 = vmatpush3.bf16.msra.mxu0 %v5374_v20 }
 0xf46   :  { %4355 = vmatprep.subr.bf16.mxu0 %v6079_v38 }
 0xf48   :  { %4172 = vmatmul.mubr.msk.f32.vlgmr.msra.gmra.mrb[4].mxu0 %vm180_vm0, %v1060_v28 }
 0xf49   :  { %4357 = vmatpush3.bf16.msra.mxu0 %v5297_v2  ;;  %4193 = vmatprep.mubr.msk.f32.mxu0 %vm4910_vm9, %v4911_v3 }
 0xf4a   :  { %4358 = vmatprep.subr.bf16.mxu0 %v6079_v38 }
 0xf4d   :  { %4360 = vmatpush3.bf16.msra.mxu0 %v5305_v4 }
 0xf4e   :  { %4361 = vmatprep.subr.bf16.mxu0 %v6079_v38 }
 0xfa2   :  { %v1129_v33 = vpop.f32.mrb[2].mxu0 }
 0xfa3   :  { %v1130_v56 = vadd.f32 %v5615_v48, %v1129_v33  ;;  %v4129_v49 = vpop.f32.mrb[3].mxu0 }
 0xfa5   :  { %1133 = vst [vmem:[#allocation18] sm:$0xff] %v1130_v56 }
0x101b   :  { %v1946_v10 = vpop.f32.mrb[4].mxu0 }
0x101c   :  { %v4418_v15 = vadd.f32 %v5392_v63, %v1946_v10  ;;  %v4173_v32 = vpop.f32.mrb[5].mxu0 }
0x101e   :  { %4539 = vtanh.f32 %v4418_v15 }
0x1028   :  { %v4540_v30 = vpop.eup %4539 }
0x1029   :  { %1956 = vrot.lane.b32.xlu1 %v4540_v30, %s4912_s7  ;;  %v1952_v0 = vmul.f32 0.5, %v4540_v30 }
0x102b   :  { %v1953_v12 = vadd.f32 0.5, %v1952_v0 }
0x102d   :  { %v1954_v37 = vmul.f32 %v1953_v12, %v5397_v43 }
0x109b   :  { %v1957_v45 = vpop.permute.xlu1 %1956 }
0x109c   :  { %v1959_v24 = vmul.f32 %v1957_v45, %v1953_v12 }
0x109e   :  { %1961 = vrot.lane.b32.xlu0 %v1959_v24, %s4912_s7 }
0x1110   :  { %v1962_v41 = vpop.permute.xlu0 %1961 }
0x1111   :  { %v5622_v50 = vadd.f32 %v1962_v41, %v1954_v37 }
0x1113   :  { %4541 = vtanh.f32 %v5622_v50 }
0x111d   :  { %v4542_v39 = vpop.eup %4541 }
0x111e   :  { %1967 = vrot.lane.b32.xlu1 %v4542_v39, %s4912_s7 }
0x1190   :  { %v1968_v63 = vpop.permute.xlu1 %1967 }
0x1191   :  { %v5626_v51 = vmul.f32 %v1968_v63, %v1953_v12 }
0x1193   :  { %v2048_v40 = vcombine.high %v5626_v51, %v5626_v51  ;;  %v2055_v53 = vrot.slane %v5626_v51, %v5143_v8 }
0x1195   :  { %v2062_v23 = vrot.slane %v2048_v40, %v5143_v8  ;;  %v2063_v43 = vcombine.high %v2055_v53, %v2055_v53  ;;  %v2071_v19 = vrot.slane %v2055_v53, %v5143_v8 }
0x1197   :  { %v2100_v44 = vrot.slane %v2071_v19, %v5150_v11  ;;  %v2085_v18 = vrot.slane %v2063_v43, %v5143_v8  ;;  %v2093_v54 = vcombine.high %v2071_v19, %v2071_v19  ;;  %v2064_v58 = vcombine.high %v2062_v23, %v2062_v23 }
0x1198   :  { %v2078_v60 = vrot.slane %v2062_v23, %v5143_v8 }
0x1199   :  { %2129 = vrot.lane.b32.xlu0 %v2100_v44, %s4913_s16  ;;  %v2104_v22 = vrot.slane %v2085_v18, %v5150_v11  ;;  %v2095_v21 = vcombine.high %v2085_v18, %v2085_v18  ;;  %v2108_v59 = vrot.slane %v2093_v54, %v5150_v11  ;;  %v2092_v33 = vrot.slane %v2064_v58, %v5143_v8 }
0x119a   :  { %v2116_v56 = vrot.slane %v2078_v60, %v5150_v11  ;;  %v2094_v49 = vcombine.high %v2078_v60, %v2078_v60 }
0x119b   :  { %2131 = vrot.lane.b32.xlu1 %v2104_v22, %s4913_s16  ;;  %v2112_v28 = vrot.slane %v2095_v21, %v5150_v11  ;;  %v2120_v10 = vrot.slane %v2092_v33, %v5150_v11  ;;  %v2096_v15 = vcombine.high %v2092_v33, %v2092_v33 }
0x119c   :  { %v2124_v32 = vrot.slane %v2094_v49, %v5150_v11 }
0x119d   :  { %2133 = vrot.lane.b32.xlu0 %v2108_v59, %s4913_s16  ;;  %v2128_v30 = vrot.slane %v2096_v15, %v5150_v11 }
0x119f   :  { %2135 = vrot.lane.b32.xlu1 %v2112_v28, %s4913_s16 }
0x11a1   :  { %2137 = vrot.lane.b32.xlu0 %v2116_v56, %s4913_s16 }
0x11a3   :  { %2139 = vrot.lane.b32.xlu1 %v2120_v10, %s4913_s16 }
0x11a5   :  { %2141 = vrot.lane.b32.xlu0 %v2124_v32, %s4913_s16 }
0x11a7   :  { %2143 = vrot.lane.b32.xlu1 %v2128_v30, %s4913_s16 }
0x120b   :  { %v2130_v0 = vpop.permute.xlu0 %2129 }
0x120c   :  { %v2153_v12 = vmul.f32 %v5507_v9, %v2130_v0 }
0x120d   :  { %v2132_v45 = vpop.permute.xlu1 %2131 }
0x120e   :  { %v2154_v24 = vmul.f32 %v5504_v61, %v2132_v45  ;;  %v2161_v37 = vsel %vm180_vm0, %v2153_v12, 0.0 }
0x120f   :  { %v2134_v41 = vpop.permute.xlu0 %2133  ;;  %2162 = vadd.xlane.f32.xlu0 %v2161_v37 }
0x1210   :  { %v2155_v39 = vmul.f32 %v5510_v1, %v2134_v41  ;;  %v2164_v63 = vsel %vm180_vm0, %v2154_v24, 0.0 }
0x1211   :  { %v2136_v40 = vpop.permute.xlu1 %2135  ;;  %2165 = vadd.xlane.f32.xlu1 %v2164_v63 }
0x1212   :  { %v2156_v53 = vmul.f32 %v5516_v14, %v2136_v40  ;;  %v2167_v23 = vsel %vm180_vm0, %v2155_v39, 0.0 }
0x1213   :  { %v2138_v43 = vpop.permute.xlu0 %2137  ;;  %2168 = vadd.xlane.f32.xlu0 %v2167_v23 }
0x1214   :  { %v2157_v19 = vmul.f32 %v5520_v34, %v2138_v43  ;;  %v2170_v54 = vsel %vm180_vm0, %v2156_v53, 0.0 }
0x1215   :  { %v2140_v44 = vpop.permute.xlu1 %2139 }
0x1216   :  { %v2158_v18 = vmul.f32 %v5524_v16, %v2140_v44  ;;  %v2173_v22 = vsel %vm180_vm0, %v2157_v19, 0.0 }
0x1217   :  { %2171 = vadd.xlane.f32.xlu0 %v2170_v54  ;;  %v2142_v21 = vpop.permute.xlu0 %2141  ;;  %2174 = vadd.xlane.f32.xlu1 %v2173_v22 }
0x1218   :  { %v2159_v58 = vmul.f32 %v5528_v29, %v2142_v21  ;;  %v2176_v28 = vsel %vm180_vm0, %v2158_v18, 0.0 }
0x1219   :  { %v2144_v59 = vpop.permute.xlu1 %2143 }
0x121a   :  { %v2160_v60 = vmul.f32 %v5532_v13, %v2144_v59  ;;  %v2179_v33 = vsel %vm180_vm0, %v2159_v58, 0.0 }
0x121b   :  { %2177 = vadd.xlane.f32.xlu0 %v2176_v28  ;;  %2180 = vadd.xlane.f32.xlu1 %v2179_v33 }
0x121c   :  { %v2182_v56 = vsel %vm180_vm0, %v2160_v60, 0.0 }
0x121f   :  { %2183 = vadd.xlane.f32.xlu0 %v2182_v56 }
0x129c   :  { %v2163_v49 = vpop.xlane.xlu0 %2162 }
0x129d   :  { %v2196_v30 = vrot.slane %v2163_v49, %v5139_v5 }
0x129e   :  { %v2166_v10 = vpop.xlane.xlu1 %2165 }
0x129f   :  { %v2200_v15 = vrot.slane %v2166_v10, %v5139_v5 }
0x12a0   :  { %v2169_v32 = vpop.xlane.xlu0 %2168 }
0x12a1   :  { %v2204_v0 = vrot.slane %v2169_v32, %v5139_v5  ;;  %v2225_v12 = vsel %vm366_vm1, %v2200_v15, %v2196_v30 }
0x12a3   :  { %v2226_v41 = vsel %vm368_vm2, %v2204_v0, %v2225_v12 }
0x12a4   :  { %v2172_v45 = vpop.xlane.xlu0 %2171  ;;  %v2175_v24 = vpop.xlane.xlu1 %2174 }
0x12a5   :  { %v2208_v37 = vrot.slane %v2172_v45, %v5139_v5  ;;  %v2212_v39 = vrot.slane %v2175_v24, %v5139_v5 }
0x12a7   :  { %v2227_v63 = vsel %vm370_vm3, %v2208_v37, %v2226_v41 }
0x12a8   :  { %v2178_v40 = vpop.xlane.xlu0 %2177  ;;  %v2181_v53 = vpop.xlane.xlu1 %2180  ;;  %v2228_v43 = vsel %vm372_vm4, %v2212_v39, %v2227_v63 }
0x12a9   :  { %v2216_v23 = vrot.slane %v2178_v40, %v5139_v5  ;;  %v2220_v19 = vrot.slane %v2181_v53, %v5139_v5 }
0x12ab   :  { %v2229_v44 = vsel %vm374_vm5, %v2216_v23, %v2228_v43 }
0x12ac   :  { %v2184_v18 = vpop.xlane.xlu0 %2183  ;;  %v2230_v22 = vsel %vm376_vm6, %v2220_v19, %v2229_v44 }
0x12ad   :  { %v2224_v54 = vrot.slane %v2184_v18, %v5139_v5 }
0x12af   :  { %v2231_v21 = vsel %vm378_vm7, %v2224_v54, %v2230_v22 }
0x12b0   :  { %v2233_v58 = vsel %vm381_vm8, %v2231_v21, -inf }
0x12b1   :  { %2234 = vmax.xlane.f32.xlu1 %v2233_v58 }
0x133e   :  { %v2235_v59 = vpop.xlane.xlu1 %2234 }
0x133f   :  { %v2240_v60 = vrot.slane %v2235_v59, %v5150_v11  ;;  %v2244_v28 = vrot.slane %v2235_v59, %v5216_v25  ;;  %v2248_v33 = vrot.slane %v2235_v59, %v5219_v26  ;;  %v2252_v56 = vrot.slane %v2235_v59, %v5222_v27 }
0x1340   :  { %v2260_v15 = vrot.slane %v2235_v59, %v5232_v42  ;;  %v2256_v37 = vrot.slane %v2235_v59, %v5228_v36  ;;  %v2268_v23 = vrot.slane %v2235_v59, %v5240_v52  ;;  %v2264_v44 = vrot.slane %v2235_v59, %v5236_v47 }
0x1341   :  { %v2277_v30 = vsub.f32 %v2163_v49, %v2240_v60  ;;  %v2278_v0 = vsub.f32 %v2166_v10, %v2244_v28  ;;  %v2280_v12 = vsub.f32 %v2172_v45, %v2252_v56  ;;  %v2279_v41 = vsub.f32 %v2169_v32, %v2248_v33 }
0x1342   :  { %v2282_v43 = vsub.f32 %v2178_v40, %v2260_v15  ;;  %v2281_v54 = vsub.f32 %v2175_v24, %v2256_v37  ;;  %v2284_v21 = vsub.f32 %v2184_v18, %v2268_v23  ;;  %v2283_v10 = vsub.f32 %v2181_v53, %v2264_v44 }
0x1343   :  { %v2285_v39 = vmul.f32 1.442695, %v2277_v30  ;;  %v2287_v63 = vmul.f32 1.442695, %v2278_v0  ;;  %v2291_v19 = vmul.f32 1.442695, %v2280_v12 }
0x1344   :  { %v2289_v22 = vmul.f32 1.442695, %v2279_v41  ;;  %v2295_v49 = vmul.f32 1.442695, %v2282_v43  ;;  %v2293_v45 = vmul.f32 1.442695, %v2281_v54 }
0x1345   :  { %4543 = vpow2.f32 %v2285_v39  ;;  %v2299_v32 = vmul.f32 1.442695, %v2284_v21  ;;  %v2297_v58 = vmul.f32 1.442695, %v2283_v10 }
0x1346   :  { %4545 = vpow2.f32 %v2287_v63 }
0x1347   :  { %4547 = vpow2.f32 %v2291_v19 }
0x1348   :  { %4549 = vpow2.f32 %v2289_v22 }
0x1349   :  { %4551 = vpow2.f32 %v2295_v49 }
0x134a   :  { %4553 = vpow2.f32 %v2293_v45 }
0x134b   :  { %4555 = vpow2.f32 %v2299_v32 }
0x134c   :  { %4557 = vpow2.f32 %v2297_v58 }
0x134f   :  { %v4544_v60 = vpop.eup %4543 }
0x1350   :  { %v4546_v28 = vpop.eup %4545  ;;  %2310 = vperm.xlu0 %4461, %v4544_v60  }
0x1351   :  { %2313 = vperm.xlu1 %4460, %v4546_v28   ;;  %v5693_v40 = vpop.eup %4547 }
0x1352   :  { %v4550_v24 = vpop.eup %4549 }
0x1353   :  { %v5696_v18 = vpop.eup %4551 }
0x1354   :  { %2319 = vperm.xlu0 %4461, %v5693_v40   ;;  %v4554_v53 = vpop.eup %4553 }
0x1355   :  { %2316 = vperm.xlu1 %4460, %v4550_v24   ;;  %v5699_v59 = vpop.eup %4555 }
0x1356   :  { %v5701_v33 = vpop.eup %4557 }
0x1358   :  { %2325 = vperm.xlu0 %4461, %v5696_v18  }
0x1359   :  { %2322 = vperm.xlu1 %4460, %v4554_v53  }
0x135c   :  { %2331 = vperm.xlu0 %4461, %v5699_v59  }
0x135d   :  { %2328 = vperm.xlu1 %4460, %v5701_v33  }
0x13cf   :  { %v2311_v56 = vpop.permute.xlu0 %2310 }
0x13d0   :  { %v2314_v15 = vpop.permute.xlu1 %2313  ;;  %v2336_v0 = vrot.slane %v2311_v56, %v5139_v5 }
0x13d1   :  { %v2340_v30 = vrot.slane %v2314_v15, %v5139_v5 }
0x13d3   :  { %v2320_v12 = vpop.permute.xlu0 %2319  ;;  %v2365_v39 = vsel %vm366_vm1, %v2340_v30, %v2336_v0 }
0x13d4   :  { %v2317_v37 = vpop.permute.xlu1 %2316  ;;  %v2348_v63 = vrot.slane %v2320_v12, %v5139_v5 }
0x13d5   :  { %v2344_v41 = vrot.slane %v2317_v37, %v5139_v5 }
0x13d7   :  { %v2366_v23 = vsel %vm368_vm2, %v2344_v41, %v2365_v39  ;;  %v2326_v43 = vpop.permute.xlu0 %2325 }
0x13d8   :  { %v2323_v19 = vpop.permute.xlu1 %2322  ;;  %v2367_v54 = vsel %vm370_vm3, %v2348_v63, %v2366_v23  ;;  %v2356_v22 = vrot.slane %v2326_v43, %v5139_v5 }
0x13d9   :  { %v2352_v44 = vrot.slane %v2323_v19, %v5139_v5 }
0x13db   :  { %v2368_v21 = vsel %vm372_vm4, %v2352_v44, %v2367_v54  ;;  %v2332_v49 = vpop.permute.xlu0 %2331 }
0x13dc   :  { %v2329_v10 = vpop.permute.xlu1 %2328  ;;  %v2364_v45 = vrot.slane %v2332_v49, %v5139_v5  ;;  %v2369_v58 = vsel %vm374_vm5, %v2356_v22, %v2368_v21 }
0x13dd   :  { %v2360_v32 = vrot.slane %v2329_v10, %v5139_v5 }
0x13df   :  { %v2370_v56 = vsel %vm376_vm6, %v2360_v32, %v2369_v58 }
0x13e0   :  { %v2371_v15 = vsel %vm378_vm7, %v2364_v45, %v2370_v56 }
0x13e1   :  { %v2373_v30 = vsel %vm381_vm8, %v2371_v15, 0.0 }
0x13e2   :  { %2374 = vadd.xlane.f32.xlu1 %v2373_v30 }
0x146f   :  { %v2375_v0 = vpop.xlane.xlu1 %2374 }
0x1470   :  { %v2380_v12 = vrot.slane %v2375_v0, %v5150_v11  ;;  %v2384_v37 = vrot.slane %v2375_v0, %v5216_v25  ;;  %v2388_v41 = vrot.slane %v2375_v0, %v5219_v26  ;;  %v2392_v39 = vrot.slane %v2375_v0, %v5222_v27 }
0x1471   :  { %v2396_v23 = vrot.slane %v2375_v0, %v5228_v36  ;;  %v2400_v44 = vrot.slane %v2375_v0, %v5232_v42  ;;  %v2404_v21 = vrot.slane %v2375_v0, %v5236_v47  ;;  %v2408_v45 = vrot.slane %v2375_v0, %v5240_v52 }
0x1472   :  { %4559 = vrcp.f32 %v2380_v12 }
0x1473   :  { %4561 = vrcp.f32 %v2384_v37 }
0x1474   :  { %4563 = vrcp.f32 %v2388_v41 }
0x1475   :  { %4565 = vrcp.f32 %v2392_v39 }
0x1476   :  { %4567 = vrcp.f32 %v2396_v23 }
0x1477   :  { %4569 = vrcp.f32 %v2400_v44 }
0x1478   :  { %4571 = vrcp.f32 %v2404_v21 }
0x1479   :  { %4573 = vrcp.f32 %v2408_v45 }
0x147c   :  { %v4560_v63 = vpop.eup %4559 }
0x147d   :  { %v2418_v43 = vmul.f32 %v4560_v63, %v4544_v60  ;;  %v4562_v19 = vpop.eup %4561 }
0x147e   :  { %v2420_v54 = vmul.f32 %v4562_v19, %v4546_v28  ;;  %v4564_v22 = vpop.eup %4563 }
0x147f   :  { %2435 = vperm.xlu0 %4461, %v2418_v43   ;;  %v2422_v49 = vmul.f32 %v4564_v22, %v4550_v24  ;;  %v4566_v10 = vpop.eup %4565 }
0x1480   :  { %v2424_v32 = vmul.f32 %v4566_v10, %v5693_v40  ;;  %v4568_v60 = vpop.eup %4567 }
0x1481   :  { %v2426_v58 = vmul.f32 %v4568_v60, %v4554_v53  ;;  %v4570_v56 = vpop.eup %4569 }
0x1482   :  { %v2428_v28 = vmul.f32 %v4570_v56, %v5696_v18  ;;  %v4572_v15 = vpop.eup %4571 }
0x1483   :  { %2440 = vperm.xlu0 %4461, %v2420_v54   ;;  %v2430_v30 = vmul.f32 %v4572_v15, %v5701_v33  ;;  %v4574_v24 = vpop.eup %4573 }
0x1484   :  { %v2432_v12 = vmul.f32 %v4574_v24, %v5699_v59 }
0x1487   :  { %2445 = vperm.xlu0 %4461, %v2422_v49  }
0x148b   :  { %2450 = vperm.xlu0 %4461, %v2424_v32  }
0x148f   :  { %2455 = vperm.xlu0 %4461, %v2426_v58  }
0x1493   :  { %2460 = vperm.xlu0 %4461, %v2428_v28  }
0x1497   :  { %2465 = vperm.xlu0 %4461, %v2430_v30  }
0x149b   :  { %2470 = vperm.xlu0 %4461, %v2432_v12  }
0x14fe   :  { %v2436_v0 = vpop.permute.xlu0 %2435 }
0x14ff   :  { %v2473_v53 = vmul.f32 %v5507_v9, %v2436_v0 }
0x1501   :  { %v2481_v33 = vsel %vm180_vm0, %v2473_v53, 0.0 }
0x1502   :  { %v2441_v37 = vpop.permute.xlu0 %2440  ;;  %v2482_v54 = vrot.slane %v2481_v33, 4 }
0x1503   :  { %v2474_v40 = vmul.f32 %v5504_v61, %v2441_v37 }
0x1504   :  { %v2483_v10 = vadd.f32 %v2482_v54, %v2481_v33 }
0x1505   :  { %v2488_v18 = vsel %vm180_vm0, %v2474_v40, 0.0 }
0x1506   :  { %v2446_v41 = vpop.permute.xlu0 %2445  ;;  %v2489_v59 = vrot.slane %v2488_v18, 4  ;;  %v2484_v30 = vrot.slane %v2483_v10, 2 }
0x1507   :  { %v2475_v39 = vmul.f32 %v5510_v1, %v2446_v41 }
0x1508   :  { %v2490_v21 = vadd.f32 %v2489_v59, %v2488_v18  ;;  %v2485_v18 = vadd.f32 %v2484_v30, %v2483_v10 }
0x1509   :  { %v2495_v63 = vsel %vm180_vm0, %v2475_v39, 0.0 }
0x150a   :  { %v2451_v23 = vpop.permute.xlu0 %2450  ;;  %v2496_v19 = vrot.slane %v2495_v63, 4 }
0x150b   :  { %v2476_v43 = vmul.f32 %v5516_v14, %v2451_v23  ;;  %v2491_v14 = vrot.slane %v2490_v21, 2 }
0x150c   :  { %v2497_v1 = vadd.f32 %v2496_v19, %v2495_v63 }
0x150d   :  { %v2502_v44 = vsel %vm180_vm0, %v2476_v43, 0.0  ;;  %v2492_v40 = vadd.f32 %v2491_v14, %v2490_v21 }
0x150e   :  { %v2503_v61 = vrot.slane %v2502_v44, 4  ;;  %v2456_v22 = vpop.permute.xlu0 %2455  ;;  %v2498_v28 = vrot.slane %v2497_v1, 2 }
0x150f   :  { %v2477_v9 = vmul.f32 %v5520_v34, %v2456_v22  ;;  %v2493_v19 = vrot.slane %v2492_v40, 1 }
0x1510   :  { %v2504_v45 = vadd.f32 %v2503_v61, %v2502_v44  ;;  %v2499_v53 = vadd.f32 %v2498_v28, %v2497_v1 }
0x1511   :  { %v2509_v49 = vsel %vm180_vm0, %v2477_v9, 0.0 }
0x1512   :  { %v2510_v32 = vrot.slane %v2509_v49, 4  ;;  %v2461_v60 = vpop.permute.xlu0 %2460  ;;  %v2505_v24 = vrot.slane %v2504_v45, 2  ;;  %v2500_v61 = vrot.slane %v2499_v53, 1 }
0x1513   :  { %v2478_v58 = vmul.f32 %v5524_v16, %v2461_v60 }
0x1514   :  { %v2511_v56 = vadd.f32 %v2510_v32, %v2509_v49  ;;  %v2506_v63 = vadd.f32 %v2505_v24, %v2504_v45  ;;  %v2494_v32 = vadd.f32 %v2493_v19, %v2492_v40 }
0x1515   :  { %v2516_v15 = vsel %vm180_vm0, %v2478_v58, 0.0  ;;  %v2501_v58 = vadd.f32 %v2500_v61, %v2499_v53 }
0x1516   :  { %v2517_v12 = vrot.slane %v2516_v15, 4  ;;  %v2466_v0 = vpop.permute.xlu0 %2465  ;;  %v2512_v34 = vrot.slane %v2511_v56, 2  ;;  %v2507_v9 = vrot.slane %v2506_v63, 1 }
0x1517   :  { %v2479_v37 = vmul.f32 %v5528_v29, %v2466_v0  ;;  %v2486_v29 = vrot.slane %v2485_v18, 1 }
0x1518   :  { %v2518_v41 = vadd.f32 %v2517_v12, %v2516_v15  ;;  %v2513_v43 = vadd.f32 %v2512_v34, %v2511_v56  ;;  %v2508_v56 = vadd.f32 %v2507_v9, %v2506_v63 }
0x1519   :  { %v2523_v39 = vsel %vm180_vm0, %v2479_v37, 0.0  ;;  %v2487_v14 = vadd.f32 %v2486_v29, %v2485_v18 }
0x151a   :  { %v2519_v16 = vrot.slane %v2518_v41, 2  ;;  %v2524_v23 = vrot.slane %v2523_v39, 4  ;;  %v2471_v33 = vpop.permute.xlu0 %2470  ;;  %v2514_v49 = vrot.slane %v2513_v43, 1 }
0x151b   :  { %v2480_v59 = vmul.f32 %v5532_v13, %v2471_v33  ;;  %v2547_v30 = vsel %vm366_vm1, %v2494_v32, %v2487_v14 }
0x151c   :  { %v2520_v44 = vadd.f32 %v2519_v16, %v2518_v41  ;;  %v2525_v54 = vadd.f32 %v2524_v23, %v2523_v39  ;;  %v2515_v15 = vadd.f32 %v2514_v49, %v2513_v43  ;;  %v2548_v0 = vsel %vm368_vm2, %v2501_v58, %v2547_v30  ;;  %v2538_v16 = vld [vmem:[#allocation4 + $0x10] sm:$0xff] }
0x151d   :  { %v2530_v22 = vsel %vm180_vm0, %v2480_v59, 0.0  ;;  %v2549_v37 = vsel %vm370_vm3, %v2508_v56, %v2548_v0 }
0x151e   :  { %v2526_v21 = vrot.slane %v2525_v54, 2  ;;  %v2531_v1 = vrot.slane %v2530_v22, 4  ;;  %v2521_v10 = vrot.slane %v2520_v44, 1  ;;  %v2550_v40 = vsel %vm372_vm4, %v2515_v15, %v2549_v37 }
0x1520   :  { %v2527_v45 = vadd.f32 %v2526_v21, %v2525_v54  ;;  %v2532_v60 = vadd.f32 %v2531_v1, %v2530_v22  ;;  %v2522_v24 = vadd.f32 %v2521_v10, %v2520_v44 }
0x1522   :  { %v2528_v28 = vrot.slane %v2527_v45, 1  ;;  %v2533_v13 = vrot.slane %v2532_v60, 2  ;;  %v2551_v53 = vsel %vm374_vm5, %v2522_v24, %v2550_v40 }
0x1524   :  { %v2534_v12 = vadd.f32 %v2533_v13, %v2532_v60  ;;  %v2529_v34 = vadd.f32 %v2528_v28, %v2527_v45  ;;  %v5809_v60 = vld [vmem:[%s6071_s8] ss:$0 sm:$0xff] }
0x1526   :  { %v2535_v41 = vrot.slane %v2534_v12, 1  ;;  %v2552_v18 = vsel %vm376_vm6, %v2529_v34, %v2551_v53 }
0x1528   :  { %v2536_v39 = vadd.f32 %v2535_v41, %v2534_v12 }
0x152a   :  { %v2553_v63 = vsel %vm378_vm7, %v2536_v39, %v2552_v18 }
0x152b   :  { %4194 = vmatmul.mubr.msk.f32.vlgmr.msra.gmra.mrb[6].mxu0 %vm180_vm0, %v2553_v63 }
0x152c   :  { %4363 = vmatpush3.bf16.msra.mxu0 %v5334_v6  ;;  %4204 = vmatprep.mubr.msk.f32.mxu0 %vm4910_vm9, %v4911_v3 }
0x152d   :  { %4364 = vmatprep.subr.bf16.mxu0 %v6079_v38 }
0x1530   :  { %4366 = vmatpush3.bf16.msra.mxu0 %v5340_v35 }
0x1531   :  { %4379 = vmatprep.subr.bf16.mxu0 %v6079_v38 }
0x1533   :  { %4205 = vmatmul.mubr.msk.f32.vlgmr.msra.gmra.mrb[6].mxu0 %vm180_vm0, %v5595_v31 }
0x1534   :  { %4381 = vmatpush3.bf16.msra.mxu0 %v5562_v46  ;;  %4237 = vmatprep.mubr.msk.f32.mxu0 %vm4910_vm9, %v4911_v3 }
0x1535   :  { %4382 = vmatprep.subr.bf16.mxu0 %v6079_v38 }
0x1538   :  { %4384 = vmatpush3.bf16.msra.mxu0 %v5577_v57 }
0x1539   :  { %4397 = vmatprep.subr.bf16.mxu0 %v6079_v38 }
0x1606   :  { %v2693_v23 = vpop.f32.mrb[6].mxu0 }
0x1607   :  { %v4419_v33 = vadd.f32 %v2693_v23, %v2538_v16  ;;  %v4206_v43 = vpop.f32.mrb[7].mxu0 }
0x1609   :  { %4575 = vtanh.f32 %v4419_v33 }
0x1613   :  { %v4576_v59 = vpop.eup %4575 }
0x1614   :  { %2703 = vrot.lane.b32.xlu0 %v4576_v59, %s4912_s7  ;;  %v2699_v31 = vmul.f32 0.5, %v4576_v59 }
0x1616   :  { %v2700_v19 = vadd.f32 0.5, %v2699_v31 }
0x1618   :  { %v2701_v61 = vmul.f32 %v2700_v19, %v5569_v55 }
0x1686   :  { %v2704_v44 = vpop.permute.xlu0 %2703 }
0x1687   :  { %v2706_v54 = vmul.f32 %v2704_v44, %v2700_v19 }
0x1689   :  { %2708 = vrot.lane.b32.xlu1 %v2706_v54, %s4912_s7 }
0x16fb   :  { %v2709_v22 = vpop.permute.xlu1 %2708 }
0x16fc   :  { %v5774_v29 = vadd.f32 %v2709_v22, %v2701_v61 }
0x16fe   :  { %4577 = vtanh.f32 %v5774_v29 }
0x1708   :  { %v4578_v9 = vpop.eup %4577 }
0x1709   :  { %2714 = vrot.lane.b32.xlu0 %v4578_v9, %s4912_s7 }
0x170d   :  { %1972 = vrot.lane.b32.xlu0 %v5626_v51, %s4913_s16 }
0x177b   :  { %v2715_v21 = vpop.permute.xlu0 %2714 }
0x177c   :  { %v2717_v1 = vmul.f32 %v2715_v21, %v2700_v19  ;;  %v5846_v21 = vld [vmem:[#allocation7] sm:$0xff] }
0x177e   :  { %2719 = vrot.lane.b32.xlu0 %v2717_v1, %s4913_s16 }
0x177f   :  { %v1973_v49 = vpop.permute.xlu0 %1972 }
0x1780   :  { %4183 = vmatmul.mubr.msk.f32.vlgmr.msra.gmra.mrb[4].mxu1 %vm180_vm0, %v1973_v49 }
0x1781   :  { %4369 = vmatpush3.bf16.msra.mxu1 %v5355_v62  ;;  %4215 = vmatprep.mubr.msk.f32.mxu1 %vm4910_vm9, %v4911_v3 }
0x1782   :  { %4370 = vmatprep.subr.bf16.mxu1 %v6079_v38 }
0x1785   :  { %4372 = vmatpush3.bf16.msra.mxu1 %v5358_v7 }
0x1786   :  { %4373 = vmatprep.subr.bf16.mxu1 %v6079_v38 }
0x17f0   :  { %v5788_v55 = vpop.permute.xlu0 %2719 }
0x17f1   :  { %4216 = vmatmul.mubr.msk.f32.vlgmr.msra.gmra.mrb[6].mxu1 %vm180_vm0, %v5788_v55 }
0x17f2   :  { %4375 = vmatpush3.bf16.msra.mxu1 %v5367_v17  ;;  %4226 = vmatprep.mubr.msk.f32.mxu1 %vm4910_vm9, %v4911_v3 }
0x17f3   :  { %4376 = vmatprep.subr.bf16.mxu1 %v6079_v38 }
0x17f6   :  { %4378 = vmatpush3.bf16.msra.mxu1 %v5374_v20 }
0x17f7   :  { %4385 = vmatprep.subr.bf16.mxu1 %v6079_v38 }
0x17f9   :  { %4227 = vmatmul.mubr.msk.f32.vlgmr.msra.gmra.mrb[6].mxu1 %vm180_vm0, %v1973_v49 }
0x17fa   :  { %4387 = vmatpush3.bf16.msra.mxu1 %v5297_v2  ;;  %4248 = vmatprep.mubr.msk.f32.mxu1 %vm4910_vm9, %v4911_v3 }
0x17fb   :  { %4388 = vmatprep.subr.bf16.mxu1 %v6079_v38 }
0x17fe   :  { %4390 = vmatpush3.bf16.msra.mxu1 %v5305_v4 }
0x17ff   :  { %4391 = vmatprep.subr.bf16.mxu1 %v6079_v38 }
0x1853   :  { %v2042_v51 = vpop.f32.mrb[4].mxu1 }
0x1854   :  { %v2043_v32 = vadd.f32 %v5615_v48, %v2042_v51  ;;  %v4184_v10 = vpop.f32.mrb[5].mxu1  ;;  %v5849_v51 = vld [vmem:[#allocation7 + $0x8] sm:$0xff] }
0x1856   :  { %2047 = vst [vmem:[#allocation18 + $0x8] sm:$0xff] %v2043_v32 }
0x18cc   :  { %v2860_v45 = vpop.f32.mrb[6].mxu1 }
0x18cd   :  { %v4420_v2 = vadd.f32 %v5809_v60, %v2860_v45  ;;  %v4228_v58 = vpop.f32.mrb[7].mxu1 }
0x18ce   :  { %v5854_v58 = vld [vmem:[#allocation7 + $0x10] sm:$0xff] }
0x18cf   :  { %4579 = vtanh.f32 %v4420_v2 }
0x18d9   :  { %v4580_v14 = vpop.eup %4579 }
0x18da   :  { %2870 = vrot.lane.b32.xlu0 %v4580_v14, %s4912_s7  ;;  %v2866_v4 = vmul.f32 0.5, %v4580_v14 }
0x18dc   :  { %v2867_v56 = vadd.f32 0.5, %v2866_v4 }
0x18de   :  { %v2868_v48 = vmul.f32 %v2867_v56, %v5622_v50 }
0x194c   :  { %v2871_v28 = vpop.permute.xlu0 %2870 }
0x194d   :  { %v2873_v13 = vmul.f32 %v2871_v28, %v2867_v56 }
0x194f   :  { %2875 = vrot.lane.b32.xlu1 %v2873_v13, %s4912_s7 }
0x19c1   :  { %v2876_v15 = vpop.permute.xlu1 %2875 }
0x19c2   :  { %v5815_v30 = vadd.f32 %v2876_v15, %v2868_v48 }
0x19c4   :  { %4581 = vtanh.f32 %v5815_v30 }
0x19ce   :  { %v4582_v24 = vpop.eup %4581 }
0x19cf   :  { %2881 = vrot.lane.b32.xlu0 %v4582_v24, %s4912_s7  ;;  %v5862_v24 = vld [vmem:[#allocation7 + $0x20] sm:$0xff] }
0x1a41   :  { %v2882_v12 = vpop.permute.xlu0 %2881 }
0x1a42   :  { %v5819_v0 = vmul.f32 %v2882_v12, %v2867_v56  ;;  %v5857_v56 = vld [vmem:[#allocation7 + $0x18] sm:$0xff] }
0x1a44   :  { %v2962_v34 = vcombine.high %v5819_v0, %v5819_v0  ;;  %v2969_v37 = vrot.slane %v5819_v0, %v5143_v8 }
0x1a46   :  { %v2976_v41 = vrot.slane %v2962_v34, %v5143_v8  ;;  %v2977_v50 = vcombine.high %v2969_v37, %v2969_v37  ;;  %v2985_v40 = vrot.slane %v2969_v37, %v5143_v8  ;;  %v5865_v37 = vld [vmem:[#allocation7 + $0x28] sm:$0xff] }
0x1a48   :  { %v2999_v39 = vrot.slane %v2977_v50, %v5143_v8  ;;  %v3007_v53 = vcombine.high %v2985_v40, %v2985_v40  ;;  %v3014_v18 = vrot.slane %v2985_v40, %v5150_v11  ;;  %v2978_v63 = vcombine.high %v2976_v41, %v2976_v41 }
0x1a49   :  { %v2992_v33 = vrot.slane %v2976_v41, %v5143_v8 }
0x1a4a   :  { %v3018_v16 = vrot.slane %v2999_v39, %v5150_v11  ;;  %v3009_v23 = vcombine.high %v2999_v39, %v2999_v39  ;;  %3043 = vrot.lane.b32.xlu1 %v3014_v18, %s4913_s16  ;;  %v3022_v43 = vrot.slane %v3007_v53, %v5150_v11  ;;  %v3006_v31 = vrot.slane %v2978_v63, %v5143_v8  ;;  %v5870_v53 = vld [vmem:[#allocation7 + $0x30] sm:$0xff] }
0x1a4b   :  { %v3030_v19 = vrot.slane %v2992_v33, %v5150_v11  ;;  %v3008_v44 = vcombine.high %v2992_v33, %v2992_v33 }
0x1a4c   :  { %3045 = vrot.lane.b32.xlu0 %v3018_v16, %s4913_s16  ;;  %v3026_v59 = vrot.slane %v3009_v23, %v5150_v11  ;;  %v3034_v54 = vrot.slane %v3006_v31, %v5150_v11  ;;  %v3010_v61 = vcombine.high %v3006_v31, %v3006_v31  ;;  %v5873_v16 = vld [vmem:[#allocation7 + $0x38] sm:$0xff] }
0x1a4d   :  { %v3038_v22 = vrot.slane %v3008_v44, %v5150_v11 }
0x1a4e   :  { %3047 = vrot.lane.b32.xlu1 %v3022_v43, %s4913_s16  ;;  %v3042_v9 = vrot.slane %v3010_v61, %v5150_v11 }
0x1a50   :  { %3049 = vrot.lane.b32.xlu0 %v3026_v59, %s4913_s16 }
0x1a52   :  { %3051 = vrot.lane.b32.xlu1 %v3030_v19, %s4913_s16 }
0x1a54   :  { %3053 = vrot.lane.b32.xlu0 %v3034_v54, %s4913_s16 }
0x1a56   :  { %3055 = vrot.lane.b32.xlu1 %v3038_v22, %s4913_s16 }
0x1a58   :  { %3057 = vrot.lane.b32.xlu0 %v3042_v9, %s4913_s16 }
0x1abc   :  { %v3044_v8 = vpop.permute.xlu1 %3043 }
0x1abd   :  { %v3067_v1 = vmul.f32 %v5846_v21, %v3044_v8 }
0x1abe   :  { %v3046_v49 = vpop.permute.xlu0 %3045 }
0x1abf   :  { %v3068_v32 = vmul.f32 %v5849_v51, %v3046_v49  ;;  %v3075_v10 = vsel %vm180_vm0, %v3067_v1, 0.0 }
0x1ac0   :  { %v3048_v45 = vpop.permute.xlu1 %3047  ;;  %3076 = vadd.xlane.f32.xlu1 %v3075_v10 }
0x1ac1   :  { %v3078_v2 = vsel %vm180_vm0, %v3068_v32, 0.0  ;;  %v3069_v14 = vmul.f32 %v5854_v58, %v3048_v45 }
0x1ac2   :  { %v3050_v4 = vpop.permute.xlu0 %3049  ;;  %3079 = vadd.xlane.f32.xlu0 %v3078_v2 }
0x1ac3   :  { %v3070_v28 = vmul.f32 %v5857_v56, %v3050_v4  ;;  %v3081_v15 = vsel %vm180_vm0, %v3069_v14, 0.0 }
0x1ac4   :  { %v3052_v13 = vpop.permute.xlu1 %3051 }
0x1ac5   :  { %v3084_v48 = vsel %vm180_vm0, %v3070_v28, 0.0  ;;  %v3071_v12 = vmul.f32 %v5862_v24, %v3052_v13 }
0x1ac6   :  { %3085 = vadd.xlane.f32.xlu1 %v3084_v48  ;;  %v3054_v34 = vpop.permute.xlu0 %3053  ;;  %3082 = vadd.xlane.f32.xlu0 %v3081_v15 }
0x1ac7   :  { %v3072_v41 = vmul.f32 %v5865_v37, %v3054_v34  ;;  %v3087_v39 = vsel %vm180_vm0, %v3071_v12, 0.0 }
0x1ac8   :  { %v3056_v50 = vpop.permute.xlu1 %3055 }
0x1ac9   :  { %v3090_v40 = vsel %vm180_vm0, %v3072_v41, 0.0  ;;  %v3073_v18 = vmul.f32 %v5870_v53, %v3056_v50 }
0x1aca   :  { %3091 = vadd.xlane.f32.xlu1 %v3090_v40  ;;  %3088 = vadd.xlane.f32.xlu0 %v3087_v39  ;;  %v3058_v63 = vpop.permute.xlu0 %3057 }
0x1acb   :  { %v3074_v23 = vmul.f32 %v5873_v16, %v3058_v63  ;;  %v3093_v33 = vsel %vm180_vm0, %v3073_v18, 0.0 }
0x1acd   :  { %v3096_v43 = vsel %vm180_vm0, %v3074_v23, 0.0 }
0x1ace   :  { %3094 = vadd.xlane.f32.xlu0 %v3093_v33  ;;  %3097 = vadd.xlane.f32.xlu1 %v3096_v43 }
0x1b4d   :  { %v3077_v59 = vpop.xlane.xlu1 %3076 }
0x1b4e   :  { %v3110_v44 = vrot.slane %v3077_v59, %v5139_v5 }
0x1b4f   :  { %v3080_v31 = vpop.xlane.xlu0 %3079 }
0x1b50   :  { %v3114_v19 = vrot.slane %v3080_v31, %v5139_v5 }
0x1b52   :  { %v3139_v9 = vsel %vm366_vm1, %v3114_v19, %v3110_v44 }
0x1b53   :  { %v3086_v54 = vpop.xlane.xlu1 %3085  ;;  %v3083_v61 = vpop.xlane.xlu0 %3082 }
0x1b54   :  { %v3118_v22 = vrot.slane %v3083_v61, %v5139_v5  ;;  %v3122_v8 = vrot.slane %v3086_v54, %v5139_v5 }
0x1b56   :  { %v3140_v1 = vsel %vm368_vm2, %v3118_v22, %v3139_v9 }
0x1b57   :  { %v3092_v49 = vpop.xlane.xlu1 %3091  ;;  %v3089_v32 = vpop.xlane.xlu0 %3088  ;;  %v3141_v2 = vsel %vm370_vm3, %v3122_v8, %v3140_v1 }
0x1b58   :  { %v3126_v10 = vrot.slane %v3089_v32, %v5139_v5  ;;  %v3130_v45 = vrot.slane %v3092_v49, %v5139_v5 }
0x1b5a   :  { %v3142_v14 = vsel %vm372_vm4, %v3126_v10, %v3141_v2 }
0x1b5b   :  { %v3098_v4 = vpop.xlane.xlu1 %3097  ;;  %v3095_v28 = vpop.xlane.xlu0 %3094  ;;  %v3143_v15 = vsel %vm374_vm5, %v3130_v45, %v3142_v14 }
0x1b5c   :  { %v3138_v13 = vrot.slane %v3098_v4, %v5139_v5  ;;  %v3134_v48 = vrot.slane %v3095_v28, %v5139_v5 }
0x1b5e   :  { %v3144_v12 = vsel %vm376_vm6, %v3134_v48, %v3143_v15 }
0x1b5f   :  { %v3145_v34 = vsel %vm378_vm7, %v3138_v13, %v3144_v12 }
0x1b60   :  { %v3147_v41 = vsel %vm381_vm8, %v3145_v34, -inf }
0x1b61   :  { %3148 = vmax.xlane.f32.xlu0 %v3147_v41 }
0x1bee   :  { %v3149_v50 = vpop.xlane.xlu0 %3148 }
0x1bef   :  { %v3154_v40 = vrot.slane %v3149_v50, %v5150_v11  ;;  %v3158_v39 = vrot.slane %v3149_v50, %v5216_v25  ;;  %v3162_v18 = vrot.slane %v3149_v50, %v5219_v26  ;;  %v3170_v63 = vrot.slane %v3149_v50, %v5228_v36 }
0x1bf0   :  { %v3166_v23 = vrot.slane %v3149_v50, %v5222_v27  ;;  %v3178_v44 = vrot.slane %v3149_v50, %v5236_v47  ;;  %v3174_v1 = vrot.slane %v3149_v50, %v5232_v42  ;;  %v3182_v13 = vrot.slane %v3149_v50, %v5240_v52 }
0x1bf1   :  { %v3191_v33 = vsub.f32 %v3077_v59, %v3154_v40  ;;  %v3192_v43 = vsub.f32 %v3080_v31, %v3158_v39  ;;  %v3193_v19 = vsub.f32 %v3083_v61, %v3162_v18  ;;  %v3195_v22 = vsub.f32 %v3089_v32, %v3170_v63 }
0x1bf2   :  { %v3194_v10 = vsub.f32 %v3086_v54, %v3166_v23  ;;  %v3197_v2 = vsub.f32 %v3095_v28, %v3178_v44  ;;  %v3196_v48 = vsub.f32 %v3092_v49, %v3174_v1  ;;  %v3198_v61 = vsub.f32 %v3098_v4, %v3182_v13 }
0x1bf3   :  { %v3199_v9 = vmul.f32 1.442695, %v3191_v33  ;;  %v3201_v8 = vmul.f32 1.442695, %v3192_v43  ;;  %v3203_v45 = vmul.f32 1.442695, %v3193_v19 }
0x1bf4   :  { %v3207_v14 = vmul.f32 1.442695, %v3195_v22  ;;  %v3205_v59 = vmul.f32 1.442695, %v3194_v10  ;;  %v3211_v31 = vmul.f32 1.442695, %v3197_v2 }
0x1bf5   :  { %4583 = vpow2.f32 %v3199_v9  ;;  %v3209_v32 = vmul.f32 1.442695, %v3196_v48  ;;  %v3213_v54 = vmul.f32 1.442695, %v3198_v61 }
0x1bf6   :  { %4585 = vpow2.f32 %v3201_v8 }
0x1bf7   :  { %4587 = vpow2.f32 %v3203_v45 }
0x1bf8   :  { %4589 = vpow2.f32 %v3207_v14 }
0x1bf9   :  { %4591 = vpow2.f32 %v3205_v59 }
0x1bfa   :  { %4593 = vpow2.f32 %v3211_v31 }
0x1bfb   :  { %4595 = vpow2.f32 %v3209_v32 }
0x1bfc   :  { %4597 = vpow2.f32 %v3213_v54 }
0x1bff   :  { %v4584_v15 = vpop.eup %4583 }
0x1c00   :  { %v4586_v12 = vpop.eup %4585  ;;  %3224 = vperm.xlu1 %4460, %v4584_v15  }
0x1c01   :  { %3227 = vperm.xlu0 %4461, %v4586_v12   ;;  %v4588_v28 = vpop.eup %4587 }
0x1c02   :  { %v5902_v34 = vpop.eup %4589 }
0x1c03   :  { %v4592_v49 = vpop.eup %4591 }
0x1c04   :  { %3230 = vperm.xlu1 %4460, %v4588_v28   ;;  %v5905_v41 = vpop.eup %4593 }
0x1c05   :  { %3236 = vperm.xlu0 %4461, %v5902_v34   ;;  %v4596_v4 = vpop.eup %4595 }
0x1c06   :  { %v5908_v50 = vpop.eup %4597 }
0x1c08   :  { %3233 = vperm.xlu1 %4460, %v4592_v49  }
0x1c09   :  { %3242 = vperm.xlu0 %4461, %v5905_v41  }
0x1c0c   :  { %3239 = vperm.xlu1 %4460, %v4596_v4  }
0x1c10   :  { %3245 = vperm.xlu1 %4460, %v5908_v50  }
0x1c7f   :  { %v3225_v40 = vpop.permute.xlu1 %3224 }
0x1c80   :  { %v3228_v39 = vpop.permute.xlu0 %3227  ;;  %v3250_v23 = vrot.slane %v3225_v40, %v5139_v5 }
0x1c81   :  { %v3254_v63 = vrot.slane %v3228_v39, %v5139_v5 }
0x1c83   :  { %v3231_v18 = vpop.permute.xlu1 %3230  ;;  %v3279_v44 = vsel %vm366_vm1, %v3254_v63, %v3250_v23 }
0x1c84   :  { %v3258_v33 = vrot.slane %v3231_v18, %v5139_v5  ;;  %v3237_v43 = vpop.permute.xlu0 %3236 }
0x1c85   :  { %v3266_v1 = vrot.slane %v3237_v43, %v5139_v5 }
0x1c86   :  { %v3280_v9 = vsel %vm368_vm2, %v3258_v33, %v3279_v44 }
0x1c87   :  { %v3234_v19 = vpop.permute.xlu1 %3233 }
0x1c88   :  { %v3262_v22 = vrot.slane %v3234_v19, %v5139_v5  ;;  %v3243_v45 = vpop.permute.xlu0 %3242 }
0x1c89   :  { %v3274_v48 = vrot.slane %v3243_v45, %v5139_v5 }
0x1c8a   :  { %v3281_v8 = vsel %vm370_vm3, %v3262_v22, %v3280_v9 }
0x1c8b   :  { %v3240_v10 = vpop.permute.xlu1 %3239  ;;  %v3282_v14 = vsel %vm372_vm4, %v3266_v1, %v3281_v8 }
0x1c8c   :  { %v3270_v2 = vrot.slane %v3240_v10, %v5139_v5 }
0x1c8e   :  { %v3283_v13 = vsel %vm374_vm5, %v3270_v2, %v3282_v14 }
0x1c8f   :  { %v3246_v59 = vpop.permute.xlu1 %3245  ;;  %v3284_v61 = vsel %vm376_vm6, %v3274_v48, %v3283_v13 }
0x1c90   :  { %v3278_v31 = vrot.slane %v3246_v59, %v5139_v5 }
0x1c92   :  { %v3285_v32 = vsel %vm378_vm7, %v3278_v31, %v3284_v61 }
0x1c93   :  { %v3287_v54 = vsel %vm381_vm8, %v3285_v32, 0.0 }
0x1c94   :  { %3288 = vadd.xlane.f32.xlu0 %v3287_v54 }
0x1d21   :  { %v3289_v40 = vpop.xlane.xlu0 %3288 }
0x1d22   :  { %v3294_v39 = vrot.slane %v3289_v40, %v5150_v11  ;;  %v3298_v18 = vrot.slane %v3289_v40, %v5216_v25  ;;  %v3302_v63 = vrot.slane %v3289_v40, %v5219_v26  ;;  %v3306_v23 = vrot.slane %v3289_v40, %v5222_v27 }
0x1d23   :  { %v3310_v33 = vrot.slane %v3289_v40, %v5228_v36  ;;  %v3314_v44 = vrot.slane %v3289_v40, %v5232_v42  ;;  %v3318_v25 = vrot.slane %v3289_v40, %v5236_v47  ;;  %v3322_v27 = vrot.slane %v3289_v40, %v5240_v52 }
0x1d24   :  { %4599 = vrcp.f32 %v3294_v39 }
0x1d25   :  { %4601 = vrcp.f32 %v3298_v18 }
0x1d26   :  { %4603 = vrcp.f32 %v3302_v63 }
0x1d27   :  { %4605 = vrcp.f32 %v3306_v23 }
0x1d28   :  { %4607 = vrcp.f32 %v3310_v33 }
0x1d29   :  { %4609 = vrcp.f32 %v3314_v44 }
0x1d2a   :  { %4611 = vrcp.f32 %v3318_v25 }
0x1d2b   :  { %4613 = vrcp.f32 %v3322_v27 }
0x1d2e   :  { %v4600_v5 = vpop.eup %4599 }
0x1d2f   :  { %v3332_v43 = vmul.f32 %v4600_v5, %v4584_v15  ;;  %v4602_v19 = vpop.eup %4601 }
0x1d30   :  { %v3334_v11 = vmul.f32 %v4602_v19, %v4586_v12  ;;  %v4604_v22 = vpop.eup %4603 }
0x1d31   :  { %3349 = vperm.xlu1 %4460, %v3332_v43   ;;  %v3336_v26 = vmul.f32 %v4604_v22, %v4588_v28  ;;  %v4606_v9 = vpop.eup %4605 }
0x1d32   :  { %v3338_v8 = vmul.f32 %v4606_v9, %v4592_v49  ;;  %v4608_v36 = vpop.eup %4607 }
0x1d33   :  { %v3340_v15 = vmul.f32 %v4608_v36, %v5902_v34  ;;  %v4610_v1 = vpop.eup %4609 }
0x1d34   :  { %v3342_v42 = vmul.f32 %v4610_v1, %v4596_v4  ;;  %v4612_v12 = vpop.eup %4611 }
0x1d35   :  { %3354 = vperm.xlu1 %4460, %v3334_v11   ;;  %v3344_v10 = vmul.f32 %v4612_v12, %v5905_v41  ;;  %v4614_v47 = vpop.eup %4613 }
0x1d36   :  { %v3346_v28 = vmul.f32 %v4614_v47, %v5908_v50 }
0x1d39   :  { %3359 = vperm.xlu1 %4460, %v3336_v26  }
0x1d3d   :  { %3364 = vperm.xlu1 %4460, %v3338_v8  }
0x1d41   :  { %3369 = vperm.xlu1 %4460, %v3340_v15  }
0x1d45   :  { %3374 = vperm.xlu1 %4460, %v3342_v42  }
0x1d49   :  { %3379 = vperm.xlu1 %4460, %v3344_v10  }
0x1d4d   :  { %3384 = vperm.xlu1 %4460, %v3346_v28  }
0x1db0   :  { %v3350_v45 = vpop.permute.xlu1 %3349 }
0x1db1   :  { %v3387_v14 = vmul.f32 %v5846_v21, %v3350_v45 }
0x1db3   :  { %v3395_v41 = vsel %vm180_vm0, %v3387_v14, 0.0 }
0x1db4   :  { %v3355_v52 = vpop.permute.xlu1 %3354  ;;  %v3396_v32 = vrot.slane %v3395_v41, 4 }
0x1db5   :  { %v3388_v49 = vmul.f32 %v5849_v51, %v3355_v52 }
0x1db6   :  { %v3397_v18 = vadd.f32 %v3396_v32, %v3395_v41 }
0x1db7   :  { %v3402_v4 = vsel %vm180_vm0, %v3388_v49, 0.0 }
0x1db8   :  { %v3360_v2 = vpop.permute.xlu1 %3359  ;;  %v3403_v50 = vrot.slane %v3402_v4, 4  ;;  %v3398_v11 = vrot.slane %v3397_v18, 2 }
0x1db9   :  { %v3389_v34 = vmul.f32 %v5854_v58, %v3360_v2 }
0x1dba   :  { %v3404_v40 = vadd.f32 %v3403_v50, %v3402_v4  ;;  %v3399_v1 = vadd.f32 %v3398_v11, %v3397_v18 }
0x1dbb   :  { %v3409_v13 = vsel %vm180_vm0, %v3389_v34, 0.0 }
0x1dbc   :  { %v3365_v48 = vpop.permute.xlu1 %3364  ;;  %v3410_v31 = vrot.slane %v3409_v13, 4 }
0x1dbd   :  { %v3390_v59 = vmul.f32 %v5857_v56, %v3365_v48  ;;  %v3405_v56 = vrot.slane %v3404_v40, 2 }
0x1dbe   :  { %v3411_v58 = vadd.f32 %v3410_v31, %v3409_v13 }
0x1dbf   :  { %v3416_v61 = vsel %vm180_vm0, %v3390_v59, 0.0  ;;  %v3406_v27 = vadd.f32 %v3405_v56, %v3404_v40 }
0x1dc0   :  { %v3417_v51 = vrot.slane %v3416_v61, 4  ;;  %v3370_v54 = vpop.permute.xlu1 %3369  ;;  %v3412_v19 = vrot.slane %v3411_v58, 2 }
0x1dc1   :  { %v3391_v21 = vmul.f32 %v5862_v24, %v3370_v54  ;;  %v3407_v45 = vrot.slane %v3406_v27, 1 }
0x1dc2   :  { %v3418_v63 = vadd.f32 %v3417_v51, %v3416_v61  ;;  %v3413_v36 = vadd.f32 %v3412_v19, %v3411_v58 }
0x1dc3   :  { %v3423_v39 = vsel %vm180_vm0, %v3391_v21, 0.0  ;;  %v3408_v41 = vadd.f32 %v3407_v45, %v3406_v27 }
0x1dc4   :  { %v3424_v23 = vrot.slane %v3423_v39, 4  ;;  %v3375_v5 = vpop.permute.xlu1 %3374  ;;  %v3419_v22 = vrot.slane %v3418_v63, 2  ;;  %v3414_v2 = vrot.slane %v3413_v36, 1 }
0x1dc5   :  { %v3392_v33 = vmul.f32 %v5865_v37, %v3375_v5 }
0x1dc6   :  { %v3425_v43 = vadd.f32 %v3424_v23, %v3423_v39  ;;  %v3420_v42 = vadd.f32 %v3419_v22, %v3418_v63  ;;  %v3415_v61 = vadd.f32 %v3414_v2, %v3413_v36 }
0x1dc7   :  { %v3430_v44 = vsel %vm180_vm0, %v3392_v33, 0.0 }
0x1dc8   :  { %v3431_v25 = vrot.slane %v3430_v44, 4  ;;  %v3380_v26 = vpop.permute.xlu1 %3379  ;;  %v3426_v24 = vrot.slane %v3425_v43, 2  ;;  %v3421_v34 = vrot.slane %v3420_v42, 1 }
0x1dc9   :  { %v3393_v9 = vmul.f32 %v5870_v53, %v3380_v26  ;;  %v3400_v53 = vrot.slane %v3399_v1, 1 }
0x1dca   :  { %v3432_v8 = vadd.f32 %v3431_v25, %v3430_v44  ;;  %v3427_v47 = vadd.f32 %v3426_v24, %v3425_v43  ;;  %v3422_v51 = vadd.f32 %v3421_v34, %v3420_v42 }
0x1dcb   :  { %v3437_v15 = vsel %vm180_vm0, %v3393_v9, 0.0  ;;  %v3401_v32 = vadd.f32 %v3400_v53, %v3399_v1 }
0x1dcc   :  { %v3433_v37 = vrot.slane %v3432_v8, 2  ;;  %v3438_v12 = vrot.slane %v3437_v15, 4  ;;  %v3385_v10 = vpop.permute.xlu1 %3384  ;;  %v3428_v48 = vrot.slane %v3427_v47, 1 }
0x1dcd   :  { %v3394_v28 = vmul.f32 %v5873_v16, %v3385_v10  ;;  %v3461_v40 = vsel %vm366_vm1, %v3408_v41, %v3401_v32 }
0x1dce   :  { %v3434_v52 = vadd.f32 %v3433_v37, %v3432_v8  ;;  %v3439_v49 = vadd.f32 %v3438_v12, %v3437_v15  ;;  %v3429_v21 = vadd.f32 %v3428_v48, %v3427_v47  ;;  %v3462_v18 = vsel %vm368_vm2, %v3415_v61, %v3461_v40 }
0x1dcf   :  { %v3444_v14 = vsel %vm180_vm0, %v3394_v28, 0.0  ;;  %v3463_v23 = vsel %vm370_vm3, %v3422_v51, %v3462_v18 }
0x1dd0   :  { %v3440_v4 = vrot.slane %v3439_v49, 2  ;;  %v3445_v13 = vrot.slane %v3444_v14, 4  ;;  %v3435_v59 = vrot.slane %v3434_v52, 1  ;;  %v3464_v33 = vsel %vm372_vm4, %v3429_v21, %v3463_v23 }
0x1dd2   :  { %v3441_v50 = vadd.f32 %v3440_v4, %v3439_v49  ;;  %v3446_v31 = vadd.f32 %v3445_v13, %v3444_v14  ;;  %v3436_v58 = vadd.f32 %v3435_v59, %v3434_v52 }
0x1dd4   :  { %v3442_v54 = vrot.slane %v3441_v50, 1  ;;  %v3447_v16 = vrot.slane %v3446_v31, 2  ;;  %v3465_v43 = vsel %vm374_vm5, %v3436_v58, %v3464_v33 }
0x1dd6   :  { %v3448_v39 = vadd.f32 %v3447_v16, %v3446_v31  ;;  %v3443_v63 = vadd.f32 %v3442_v54, %v3441_v50 }
0x1dd8   :  { %v3449_v5 = vrot.slane %v3448_v39, 1  ;;  %v3466_v19 = vsel %vm376_vm6, %v3443_v63, %v3465_v43 }
0x1dda   :  { %v3450_v56 = vadd.f32 %v3449_v5, %v3448_v39 }
0x1ddc   :  { %v3467_v44 = vsel %vm378_vm7, %v3450_v56, %v3466_v19 }
0x1ddd   :  { %4249 = vmatmul.mubr.msk.f32.vlgmr.msra.gmra.mrb[8].mxu1 %vm180_vm0, %v3467_v44 }
0x1dde   :  { %4393 = vmatpush3.bf16.msra.mxu1 %v5334_v6  ;;  %4259 = vmatprep.mubr.msk.f32.mxu1 %vm4910_vm9, %v4911_v3  ;;  %v3452_v6 = vld [vmem:[#allocation4 + $0x18] sm:$0xff] }
0x1ddf   :  { %4394 = vmatprep.subr.bf16.mxu1 %v6079_v38 }
0x1de2   :  { %4396 = vmatpush3.bf16.msra.mxu1 %v5340_v35 }
0x1de3   :  { %4409 = vmatprep.subr.bf16.mxu1 %v6079_v38 }
0x1de5   :  { %4260 = vmatmul.mubr.msk.f32.vlgmr.msra.gmra.mrb[8].mxu1 %vm180_vm0, %v5788_v55 }
0x1de6   :  { %4411 = vmatpush3.bf16.msra.mxu1 %v5562_v46  ;;  %4292 = vmatprep.mubr.msk.f32.mxu1 %vm4910_vm9, %v4911_v3 }
0x1de7   :  { %4412 = vmatprep.subr.bf16.mxu1 %v6079_v38 }
0x1dea   :  { %4414 = vmatpush3.bf16.msra.mxu1 %v5577_v57 }
0x1eb8   :  { %v3607_v11 = vpop.f32.mrb[8].mxu1 }
0x1eb9   :  { %v4421_v22 = vadd.f32 %v3607_v11, %v3452_v6  ;;  %v4261_v25 = vpop.f32.mrb[9].mxu1 }
0x1ebb   :  { %4615 = vtanh.f32 %v4421_v22 }
0x1ec5   :  { %v4616_v35 = vpop.eup %4615 }
0x1ec6   :  { %3617 = vrot.lane.b32.xlu0 %v4616_v35, %s4912_s7  ;;  %v3613_v26 = vmul.f32 0.5, %v4616_v35 }
0x1ec8   :  { %v3614_v24 = vadd.f32 0.5, %v3613_v26 }
0x1eca   :  { %v3615_v46 = vmul.f32 %v3614_v24, %v5774_v29 }
0x1f38   :  { %v3618_v55 = vpop.permute.xlu0 %3617 }
0x1f39   :  { %v3620_v9 = vmul.f32 %v3618_v55, %v3614_v24 }
0x1f3b   :  { %3622 = vrot.lane.b32.xlu1 %v3620_v9, %s4912_s7 }
0x1fad   :  { %v3623_v27 = vpop.permute.xlu1 %3622 }
0x1fae   :  { %v3625_v8 = vadd.f32 %v3623_v27, %v3615_v46 }
0x1fb0   :  { %4617 = vtanh.f32 %v3625_v8 }
0x1fba   :  { %v4618_v57 = vpop.eup %4617 }
0x1fbb   :  { %3628 = vrot.lane.b32.xlu1 %v4618_v57, %s4912_s7 }
0x1fbf   :  { %2886 = vrot.lane.b32.xlu1 %v5819_v0, %s4913_s16  ;;  %v6001_v0 = vld [vmem:[%s6073_s10] ss:$0 sm:$0xff]  ;;  %s4914_s10 = smov 96  }
0x202d   :  { %v3629_v36 = vpop.permute.xlu1 %3628 }
0x202e   :  { %v3631_v15 = vmul.f32 %v3629_v36, %v3614_v24 }
0x2030   :  { %3633 = vrot.lane.b32.xlu1 %v3631_v15, %s4913_s16 }
0x2031   :  { %v2887_v1 = vpop.permute.xlu1 %2886 }
0x2032   :  { %4238 = vmatmul.mubr.msk.f32.vlgmr.msra.gmra.mrb[8].mxu0 %vm180_vm0, %v2887_v1 }
0x2033   :  { %4399 = vmatpush3.bf16.msra.mxu0 %v5355_v62  ;;  %4270 = vmatprep.mubr.msk.f32.mxu0 %vm4910_vm9, %v4911_v3 }
0x2034   :  { %4400 = vmatprep.subr.bf16.mxu0 %v6079_v38 }
0x2037   :  { %4402 = vmatpush3.bf16.msra.mxu0 %v5358_v7 }
0x2038   :  { %4403 = vmatprep.subr.bf16.mxu0 %v6079_v38 }
0x20a2   :  { %v3634_v29 = vpop.permute.xlu1 %3633 }
0x20a3   :  { %3877 = vst.msk [vmem:[#allocation2] sm:$0xff] %vm180_vm0, %v3634_v29  ;;  %4271 = vmatmul.mubr.msk.f32.vlgmr.msra.gmra.mrb[10].mxu0 %vm180_vm0, %v3634_v29 }
0x20a4   :  { %4405 = vmatpush3.bf16.msra.mxu0 %v5367_v17  ;;  %4281 = vmatprep.mubr.msk.f32.mxu0 %vm4910_vm9, %v4911_v3 }
0x20a5   :  { %4406 = vmatprep.subr.bf16.mxu0 %v6079_v38 }
0x20a8   :  { %4408 = vmatpush3.bf16.msra.mxu0 %v5374_v20 }
0x20aa   :  { %v3893_v62 = vld [vmem:[#allocation2] sm:$0xff] }
0x20ab   :  { %4282 = vmatmul.mubr.msk.f32.vlgmr.msra.gmra.mrb[10].mxu0 %vm180_vm0, %v2887_v1  ;;  %3895 = vst.msk [vmem:[#allocation19] sm:$0xff] %vm180_vm0, %v3893_v62 }
0x2105   :  { %v2956_v7 = vpop.f32.mrb[8].mxu0 }
0x2106   :  { %v2957_v17 = vadd.f32 %v6001_v0, %v2956_v7  ;;  %v4239_v42 = vpop.f32.mrb[9].mxu0 }
0x2108   :  { %2961 = vst [vmem:[#allocation18 + $0x10] sm:$0xff] %v2957_v17 }
0x217e   :  { %v3774_v3 = vpop.f32.mrb[10].mxu0 }
0x217f   :  { %v4422_v38 = vadd.f32 %v5809_v60, %v3774_v3  ;;  %v4283_v37 = vpop.f32.mrb[11].mxu0 }
0x2181   :  { %4619 = vtanh.f32 %v4422_v38 }
0x218b   :  { %v4620_v20 = vpop.eup %4619 }
0x218c   :  { %3784 = vrot.lane.b32.xlu1 %v4620_v20, %s4912_s7  ;;  %v3780_v12 = vmul.f32 0.5, %v4620_v20 }
0x218e   :  { %v3781_v10 = vadd.f32 0.5, %v3780_v12 }
0x2190   :  { %v3782_v45 = vmul.f32 %v3781_v10, %v5815_v30 }
0x21fe   :  { %v3785_v47 = vpop.permute.xlu1 %3784 }
0x21ff   :  { %v3787_v28 = vmul.f32 %v3785_v47, %v3781_v10 }
0x2201   :  { %3789 = vrot.lane.b32.xlu0 %v3787_v28, %s4912_s7 }
0x2273   :  { %v3790_v52 = vpop.permute.xlu0 %3789 }
0x2274   :  { %v3792_v49 = vadd.f32 %v3790_v52, %v3782_v45 }
0x2276   :  { %4621 = vtanh.f32 %v3792_v49 }
0x2280   :  { %v4622_v2 = vpop.eup %4621 }
0x2281   :  { %3795 = vrot.lane.b32.xlu1 %v4622_v2, %s4912_s7 }
0x2285   :  { %3879 = vrot.lane.b32.xlu1 %v3625_v8, %s4914_s10 }
0x22f3   :  { %v3796_v60 = vpop.permute.xlu1 %3795 }
0x22f4   :  { %v3798_v14 = vmul.f32 %v3796_v60, %v3781_v10 }
0x22f6   :  { %3800 = vrot.lane.b32.xlu0 %v3798_v14, %s4913_s16 }
0x22f7   :  { %v3880_v53 = vpop.permute.xlu1 %3879 }
0x22f8   :  { %3882 = vst.msk [vmem:[#allocation3] sm:$0xff] %vm180_vm0, %v3880_v53 }
0x22fa   :  { %3886 = vrot.lane.b32.xlu0 %v3792_v49, %s4914_s10 }
0x22ff   :  { %v3897_v34 = vld [vmem:[#allocation3] sm:$0xff] }
0x2300   :  { %3899 = vst.msk [vmem:[#allocation21] sm:$0xff] %vm180_vm0, %v3897_v34 }
0x2368   :  { %v3801_v30 = vpop.permute.xlu0 %3800 }
0x2369   :  { %3884 = vst.msk [vmem:[#allocation2 + $0x8] sm:$0xff] %vm180_vm0, %v3801_v30  ;;  %4293 = vmatmul.mubr.msk.f32.vlgmr.msra.gmra.mrb[10].mxu1 %vm180_vm0, %v3801_v30 }
0x236c   :  { %v3887_v4 = vpop.permute.xlu0 %3886 }
0x236d   :  { %3889 = vst.msk [vmem:[#allocation3 + $0x8] sm:$0xff] %vm180_vm0, %v3887_v4 }
0x2370   :  { %v3894_v13 = vld [vmem:[#allocation2 + $0x8] sm:$0xff] }
0x2371   :  { %3896 = vst.msk [vmem:[#allocation19 + $0x8] sm:$0xff] %vm180_vm0, %v3894_v13 }
0x2374   :  { %v3898_v48 = vld [vmem:[#allocation3 + $0x8] sm:$0xff] }
0x2375   :  { %3900 = vst.msk [vmem:[#allocation21 + $0x8] sm:$0xff] %vm180_vm0, %v3898_v48 }
0x2376   :  { %4828 = shalt.err (!%p4825_p12)
}
0x2377   :  { %s4829_s6 = scalar_lea.hbm %s6075_s12, 256 }
0x2378   :  { %p4830_p13 = scmp.ne.s32.totalorder %s6075_s12, %s4829_s6  ;;  %p4833_p0 = scmp.lt.u32.totalorder %s4829_s6, %s6075_s12 }
0x237a   :  { %p4835_p1 = pnand %p4833_p0, %p4830_p13 }
0x237c   :  { %4838 = shalt.err (!%p4835_p1)
}
0x237d   :  { %3924 = dma.vmem_to_hbm [thread:$0]  %s3919_s3, 256, %s6075_s12, [#allocation20], %s4899_s20, %s4899_s20, %s4900_s21  }
0x237e   :  { %s4916_s0 = smov [#allocation21]  }
0x237f   :  { %s3930_s22 = sshll.u32 %s4916_s0, 4  ;;  %s3931_s22 = int_to_ptr.vmem [resolvable:$true] %s3930_s22 }
0x2380   :  { %s4839_s19 = scalar_lea.vmem %s3931_s22, 256  ;;  %p4844_p3 = scmp.lt.s32.totalorder %s3931_s22, %s3931_s22 }
0x2381   :  { %p4840_p2 = scmp.ne.s32.totalorder %s3931_s22, %s4839_s19  ;;  %p4845_p4 = scmp.lt.s32.totalorder %s4839_s19, %s4839_s19 }
0x2383   :  { %p4846_p5 = por %p4845_p4, %p4844_p3 }
0x2385   :  { %p4847_p6 = pnand %p4846_p5, %p4840_p2 }
0x2387   :  { %4850 = shalt.err (!%p4847_p6)
}
0x2388   :  { %s4851_s4 = scalar_lea.hbm %s6076_s13, 256 }
0x2389   :  { %p4852_p7 = scmp.ne.s32.totalorder %s6076_s13, %s4851_s4  ;;  %p4855_p8 = scmp.lt.u32.totalorder %s4851_s4, %s6076_s13 }
0x238b   :  { %p4857_p9 = pnand %p4855_p8, %p4852_p7 }
0x238d   :  { %4860 = shalt.err (!%p4857_p9)
}
0x238e   :  { %3936 = dma.vmem_to_hbm [thread:$0]  %s3931_s22, 256, %s6076_s13, [#allocation20], %s4899_s20, %s4899_s20, %s4900_s21  }
0x238f   :  { %s4917_s8 = smov [#allocation18]  }
0x2390   :  { %s3906_s27 = sshll.u32 %s4917_s8, 4  ;;  %s3907_s27 = int_to_ptr.vmem [resolvable:$true] %s3906_s27 }
0x2391   :  { %s4861_s10 = scalar_lea.vmem %s3907_s27, 512  ;;  %p4866_p11 = scmp.lt.s32.totalorder %s3907_s27, %s3907_s27 }
0x2392   :  { %p4862_p10 = scmp.ne.s32.totalorder %s3907_s27, %s4861_s10  ;;  %p4867_p12 = scmp.lt.s32.totalorder %s4861_s10, %s4861_s10 }
0x2394   :  { %p4868_p13 = por %p4867_p12, %p4866_p11 }
0x2396   :  { %p4869_p0 = pnand %p4868_p13, %p4862_p10 }
0x243c   :  { %v3870_v41 = vpop.f32.mrb[10].mxu1 }
0x243d   :  { %v3871_v59 = vadd.f32 %v6001_v0, %v3870_v41  ;;  %v4294_v50 = vpop.f32.mrb[11].mxu1 }
0x243f   :  { %3875 = vst [vmem:[#allocation18 + $0x18] sm:$0xff] %v3871_v59 }
0x2440   :  { %4872 = shalt.err (!%p4869_p0)
}
0x2441   :  { %s4873_s2 = scalar_lea.hbm %s6074_s11, 512 }
0x2442   :  { %p4874_p1 = scmp.ne.s32.totalorder %s6074_s11, %s4873_s2  ;;  %p4877_p2 = scmp.lt.u32.totalorder %s4873_s2, %s6074_s11 }
0x2444   :  { %p4879_p3 = pnand %p4877_p2, %p4874_p1 }
0x2446   :  { %4882 = shalt.err (!%p4879_p3)
}
0x2447   :  { %3912 = dma.vmem_to_hbm [thread:$0]  %s3907_s27, 512, %s6074_s11, [#allocation6], %s4899_s20, %s4899_s20, %s4900_s21  }
0x2448   :  { %4893 = dma.done.wait [#allocation6], 512  }
0x2449   :  { %4894 = vsyncadd [#allocation6], 4294966784 }
0x244a   :  { %4895 = dma.done.wait [#allocation20], 512  }
0x244b   :  { %4896 = vsyncadd [#allocation20], 4294966784 }
0x244c   :  { %3946 = vsyncpa [#allocation5], 1 }
0x244d   :  { %3947 = vsyncpa [#allocation8], 1 }
0x244e   :  { %3948 = vsyncpa [#allocation11], 1 }
0x244f   :  { %3949 = vsyncpa [#allocation14], 1 }
0x2450   :  { %3950 = vsyncpa [#allocation17], 1 }
0x2451   :  { %3951 = vsyncpa [#allocation6], 1 }
0x2452   :  { %3952 = vsyncpa [#allocation20], 1 }

</bundles_post_ra>
